<compile_context>
chip_gen: v7x
topology: tpu7x:2x2x1
jax: 0.10.0
libtpu: 0.0.40
codegen_flags: <defaults>
</compile_context>

<pallas_src>
import functools

import jax
import jax.numpy as jnp
from jax.experimental import pallas as pl
from jax.experimental.pallas import tpu as pltpu

W_IMG_SCALE = 0.7692
W_PT_SCALE = 0.2307


def _combine_kernel(img_ref, pt_ref, flag_ref, wimg_ref, wpt_ref, out_ref,
                    *, n_batch, n_view, n_point):
    # img_ref : (B*V, Din)  f32 flattened multi-view images       (resident block)
    # pt_ref  : (B*N, 3)    f32 point coordinates, coord on lanes (resident block)
    # flag_ref: (B, 1)      f32 per-sample gate                   (resident block)
    # wimg_ref: (Din, TF)   f32 image-branch weight columns for this F tile
    # wpt_ref : (3, TF)     f32 point-branch weight columns for this F tile
    # out_ref : (B, 2, TF)  f32 [0.7692*ft_img | 0.2307*flag*ft_pt] for this F tile
    B, V, N = n_batch, n_view, n_point
    TF = wimg_ref.shape[1]

    # ---- image branch: bf16 cast in-kernel, single collapsed MXU matmul, f32 acc ----
    h_img = jnp.dot(img_ref[...].astype(jnp.bfloat16),
                    wimg_ref[...].astype(jnp.bfloat16),
                    preferred_element_type=jnp.float32)              # (B*V, TF)
    # max over views (layout-preserving reshape since V % 8 == 0); ReLU hoisted after
    ft_img = jnp.maximum(jnp.max(h_img.reshape(B, V, TF), axis=1), 0.0)   # (B, TF)

    # ---- point branch: K=3 contraction on the (otherwise idle) MXU, f32 acc ----
    h_pt = jnp.dot(pt_ref[...], wpt_ref[...],
                   preferred_element_type=jnp.float32)               # (B*N, TF)
    ft_pt = jnp.maximum(jnp.max(h_pt.reshape(B, N, TF), axis=1), 0.0)     # (B, TF)

    flag = flag_ref[...]                                             # (B, 1)
    out_ref[:, 0, :] = W_IMG_SCALE * ft_img
    out_ref[:, 1, :] = (W_PT_SCALE * flag) * ft_pt


def combine_forward(img, pt, flag, w_img, w_pt, *, f_tile=512):
    """img: (B, V, C, H, W); pt: (B, 3, N); flag: (B,); w_img: (C*H*W, F); w_pt: (3, F)."""
    B, V, C, H, W = img.shape
    Din = C * H * W
    img_flat = img.reshape(B * V, Din).astype(jnp.float32)   # no wrapper bf16 pass

    _, Cp, N = pt.shape
    assert Cp == 3
    # (B, 3, N) -> (B*N, 3): tiny (6 KiB) wrapper transpose; coord axis feeds the MXU K dim
    pt_flat = jnp.transpose(pt, (0, 2, 1)).reshape(B * N, 3).astype(jnp.float32)

    Fdim = w_img.shape[1]
    TF = min(f_tile, Fdim)
    assert Fdim % TF == 0 and TF % 128 == 0
    assert V % 8 == 0 and N % 8 == 0       # layout-preserving in-kernel reshapes

    flag2 = flag.astype(jnp.float32).reshape(B, 1)
    w_img_f = w_img.astype(jnp.float32)
    w_pt_f = w_pt.astype(jnp.float32)

    flops = 2 * (B * V) * Din * Fdim + 2 * (B * N) * 3 * Fdim
    bytes_accessed = (img_flat.size * 4 + pt_flat.size * 4 + flag2.size * 4 +
                      w_img_f.size * 4 + w_pt_f.size * 4 + B * 2 * Fdim * 4)

    kernel = functools.partial(_combine_kernel, n_batch=B, n_view=V, n_point=N)

    out = pl.pallas_call(
        kernel,
        out_shape=jax.ShapeDtypeStruct((B, 2, Fdim), jnp.float32),
        grid=(Fdim // TF,),
        in_specs=[
            pl.BlockSpec((B * V, Din), lambda j: (0, 0)),     # resident
            pl.BlockSpec((B * N, 3), lambda j: (0, 0)),       # resident
            pl.BlockSpec((B, 1), lambda j: (0, 0)),           # resident
            pl.BlockSpec((Din, TF), lambda j: (0, j)),        # streamed weight columns
            pl.BlockSpec((3, TF), lambda j: (0, j)),          # streamed weight columns
        ],
        out_specs=pl.BlockSpec((B, 2, TF), lambda j: (0, 0, j)),
        compiler_params=pltpu.CompilerParams(
            dimension_semantics=("parallel",)),               # F tiles shard across TCs
        cost_estimate=pl.CostEstimate(
            flops=flops, transcendentals=0, bytes_accessed=bytes_accessed),
    )(img_flat, pt_flat, flag2, w_img_f, w_pt_f)

    # (B, 2, F) -> (B, 2F) is a free contiguous reshape: [0.7692*ft_img | 0.2307*ft_pt*flag]
    return out.reshape(B, 2 * Fdim)


def _reference(img, pt, flag, w_img, w_pt):
    B, V, C, H, W = img.shape
    # emulate the kernel's in-kernel bf16 casts (f32 accumulation) for a tight comparison
    img_flat = img.reshape(B, V, C * H * W).astype(jnp.bfloat16).astype(jnp.float32)
    w_img_f = w_img.astype(jnp.bfloat16).astype(jnp.float32)
    ft_img = jnp.max(
        jnp.maximum(jnp.einsum("bvd,df->bvf", img_flat, w_img_f), 0.0), axis=1)
    pt_t = jnp.transpose(pt, (0, 2, 1)).astype(jnp.float32)
    ft_pt = jnp.max(
        jnp.maximum(jnp.einsum("bnc,cf->bnf", pt_t, w_pt.astype(jnp.float32)), 0.0),
        axis=1)
    ft_pt = ft_pt * flag.reshape(B, 1)
    return jnp.concatenate([W_IMG_SCALE * ft_img, W_PT_SCALE * ft_pt], axis=1)


if __name__ == "__main__":
    key = jax.random.PRNGKey(0)
    k1, k2, k3, k4, k5 = jax.random.split(key, 5)

    B, V, C, H, W = 2, 24, 3, 16, 16       # n_view=24 as in MVCNN(n_class, n_view=24)
    N = 256                                 # points per cloud
    Fdim = 1024                             # global feature dim (flag repeats to 1024)

    img = jax.random.normal(k1, (B, V, C, H, W), dtype=jnp.float32)
    pt = jax.random.normal(k2, (B, 3, N), dtype=jnp.float32)
    flag = (jax.random.uniform(k3, (B,)) > 0.5).astype(jnp.float32)

    w_img = 0.02 * jax.random.normal(k4, (C * H * W, Fdim), dtype=jnp.float32)
    w_pt = 0.02 * jax.random.normal(k5, (3, Fdim), dtype=jnp.float32)

    out = combine_forward(img, pt, flag, w_img, w_pt)
    out = jax.block_until_ready(out)

    ref = _reference(img, pt, flag, w_img, w_pt)
    assert out.shape == (B, 2 * Fdim)
    assert jnp.allclose(out, ref, atol=1e-2, rtol=1e-2)

    print("KERNEL_OK")
</pallas_src>

<mosaic_0001>
module attributes {stable_mosaic.version = 11 : i64} {
  func.func @_combine_kernel(%arg0: i32, %arg1: memref<48x768xf32, #tpu.memory_space<vmem>>, %arg2: memref<512x3xf32, #tpu.memory_space<vmem>>, %arg3: memref<2x1xf32, #tpu.memory_space<vmem>>, %arg4: memref<768x512xf32, #tpu.memory_space<vmem>>, %arg5: memref<3x512xf32, #tpu.memory_space<vmem>>, %arg6: memref<2x2x512xf32, #tpu.memory_space<vmem>>) attributes {dimension_semantics = [#tpu.dimension_semantics<parallel>], iteration_bounds = array<i64: 2>, scalar_prefetch = 0 : i64, scratch_operands = 0 : i64, tpu.core_type = #tpu.core_type<tc>, window_params = [{pipeline_mode = #tpu.pipeline_mode<synchronous>, transform_indices = @transform_0, window_bounds = array<i64: 48, 768>}, {pipeline_mode = #tpu.pipeline_mode<synchronous>, transform_indices = @transform_1, window_bounds = array<i64: 512, 3>}, {pipeline_mode = #tpu.pipeline_mode<synchronous>, transform_indices = @transform_2, window_bounds = array<i64: 2, 1>}, {transform_indices = @transform_3, window_bounds = array<i64: 768, 512>}, {transform_indices = @transform_4, window_bounds = array<i64: 3, 512>}, {transform_indices = @transform_5, window_bounds = array<i64: 2, 2, 512>}]} {
    %c0 = arith.constant 0 : index
    %c0_0 = arith.constant 0 : index
    %0 = vector.load %arg1[%c0, %c0_0] : memref<48x768xf32, #tpu.memory_space<vmem>>, vector<48x768xf32>
    %1 = arith.truncf %0 : vector<48x768xf32> to vector<48x768xbf16>
    %c0_1 = arith.constant 0 : index
    %c0_2 = arith.constant 0 : index
    %2 = vector.load %arg4[%c0_1, %c0_2] : memref<768x512xf32, #tpu.memory_space<vmem>>, vector<768x512xf32>
    %3 = arith.truncf %2 : vector<768x512xf32> to vector<768x512xbf16>
    %cst = arith.constant dense<0.000000e+00> : vector<48x512xf32>
    %4 = tpu.matmul %1, %3, %cst {dimension_numbers = #tpu.dot_dimension_numbers<[1], [0], [0], [1], [0, 0, 1, 1], [], []>} : vector<48x768xbf16>, vector<768x512xbf16>, vector<48x512xf32> -> vector<48x512xf32>
    %5 = vector.shape_cast %4 : vector<48x512xf32> to vector<2x24x512xf32>
    %cst_3 = arith.constant dense<0xFF800000> : vector<2x512xf32>
    %6 = vector.multi_reduction <maximumf>, %5, %cst_3 [1] : vector<2x24x512xf32> to vector<2x512xf32>
    %cst_4 = arith.constant 0.000000e+00 : f32
    %7 = vector.broadcast %cst_4 : f32 to vector<2x512xf32>
    %8 = arith.maximumf %6, %7 : vector<2x512xf32>
    %c0_5 = arith.constant 0 : index
    %c0_6 = arith.constant 0 : index
    %9 = vector.load %arg2[%c0_5, %c0_6] : memref<512x3xf32, #tpu.memory_space<vmem>>, vector<512x3xf32>
    %c0_7 = arith.constant 0 : index
    %c0_8 = arith.constant 0 : index
    %10 = vector.load %arg5[%c0_7, %c0_8] : memref<3x512xf32, #tpu.memory_space<vmem>>, vector<3x512xf32>
    %cst_9 = arith.constant dense<0.000000e+00> : vector<512x512xf32>
    %11 = tpu.matmul %9, %10, %cst_9 {dimension_numbers = #tpu.dot_dimension_numbers<[1], [0], [0], [1], [0, 0, 1, 1], [], []>} : vector<512x3xf32>, vector<3x512xf32>, vector<512x512xf32> -> vector<512x512xf32>
    %12 = vector.shape_cast %11 : vector<512x512xf32> to vector<2x256x512xf32>
    %cst_10 = arith.constant dense<0xFF800000> : vector<2x512xf32>
    %13 = vector.multi_reduction <maximumf>, %12, %cst_10 [1] : vector<2x256x512xf32> to vector<2x512xf32>
    %cst_11 = arith.constant 0.000000e+00 : f32
    %14 = vector.broadcast %cst_11 : f32 to vector<2x512xf32>
    %15 = arith.maximumf %13, %14 : vector<2x512xf32>
    %c0_12 = arith.constant 0 : index
    %c0_13 = arith.constant 0 : index
    %16 = vector.load %arg3[%c0_12, %c0_13] : memref<2x1xf32, #tpu.memory_space<vmem>>, vector<2x1xf32>
    %cst_14 = arith.constant 7.692000e-01 : f32
    %17 = vector.broadcast %cst_14 : f32 to vector<2x512xf32>
    %18 = arith.mulf %17, %8 : vector<2x512xf32>
    %c0_15 = arith.constant 0 : index
    %c0_16 = arith.constant 0 : index
    %c0_17 = arith.constant 0 : index
    %19 = vector.load %arg6[%c0_15, %c0_16, %c0_17] : memref<2x2x512xf32, #tpu.memory_space<vmem>>, vector<2x1x512xf32>
    %20 = vector.shape_cast %19 : vector<2x1x512xf32> to vector<2x512xf32>
    %21 = vector.shape_cast %18 : vector<2x512xf32> to vector<2x1x512xf32>
    tpu.vector_store %arg6[%c0_15, %c0_16, %c0_17], %21 {strides = array<i32>} : memref<2x2x512xf32, #tpu.memory_space<vmem>>, vector<2x1x512xf32>,
    %cst_18 = arith.constant 2.307000e-01 : f32
    %22 = vector.broadcast %cst_18 : f32 to vector<2x1xf32>
    %23 = arith.mulf %22, %16 : vector<2x1xf32>
    %24 = vector.broadcast %23 : vector<2x1xf32> to vector<2x512xf32>
    %25 = arith.mulf %24, %15 : vector<2x512xf32>
    %c0_19 = arith.constant 0 : index
    %c1 = arith.constant 1 : index
    %c0_20 = arith.constant 0 : index
    %26 = vector.load %arg6[%c0_19, %c1, %c0_20] : memref<2x2x512xf32, #tpu.memory_space<vmem>>, vector<2x1x512xf32>
    %27 = vector.shape_cast %26 : vector<2x1x512xf32> to vector<2x512xf32>
    %28 = vector.shape_cast %25 : vector<2x512xf32> to vector<2x1x512xf32>
    tpu.vector_store %arg6[%c0_19, %c1, %c0_20], %28 {strides = array<i32>} : memref<2x2x512xf32, #tpu.memory_space<vmem>>, vector<2x1x512xf32>,
    return
  }
  func.func @transform_0(%arg0: i32) -> (i32, i32) {
    %c0_i32 = arith.constant 0 : i32
    %c0_i32_0 = arith.constant 0 : i32
    %c0_i32_1 = arith.constant 0 : i32
    return %c0_i32, %c0_i32_0 : i32, i32
  }
  func.func @transform_1(%arg0: i32) -> (i32, i32) {
    %c0_i32 = arith.constant 0 : i32
    %c0_i32_0 = arith.constant 0 : i32
    %c0_i32_1 = arith.constant 0 : i32
    return %c0_i32, %c0_i32_0 : i32, i32
  }
  func.func @transform_2(%arg0: i32) -> (i32, i32) {
    %c0_i32 = arith.constant 0 : i32
    %c0_i32_0 = arith.constant 0 : i32
    %c0_i32_1 = arith.constant 0 : i32
    return %c0_i32, %c0_i32_0 : i32, i32
  }
  func.func @transform_3(%arg0: i32) -> (i32, i32) {
    %c0_i32 = arith.constant 0 : i32
    %c0_i32_0 = arith.constant 0 : i32
    return %c0_i32, %arg0 : i32, i32
  }
  func.func @transform_4(%arg0: i32) -> (i32, i32) {
    %c0_i32 = arith.constant 0 : i32
    %c0_i32_0 = arith.constant 0 : i32
    return %c0_i32, %arg0 : i32, i32
  }
  func.func @transform_5(%arg0: i32) -> (i32, i32, i32) {
    %c0_i32 = arith.constant 0 : i32
    %c0_i32_0 = arith.constant 0 : i32
    %c0_i32_1 = arith.constant 0 : i32
    return %c0_i32, %c0_i32_0, %arg0 : i32, i32, i32
  }
}

</mosaic_0001>

<bundles_post_ra>
// kernel: tpu_custom_call.1
= control target key start
LH: loop header
LB: loop body
LE: loop exit
PB: predicated region body
PF: predicated region fallthrough
CT: control target
= control target key end

     0   :  { %s4732_s0 = inlined_call_operand.hbm [shape: f32[48,768], index: 0, kind: input, shape index: {}]   ;;  %s4733_s1 = inlined_call_operand.vmem [shape: f32[512,3], index: 1, kind: input, shape index: {}]   ;;  %s4734_s2 = inlined_call_operand.vmem [shape: f32[2,1], index: 2, kind: input, shape index: {}]   ;;  %s4735_s3 = inlined_call_operand.hbm [shape: f32[768,1024], index: 3, kind: input, shape index: {}]   ;;  %s4736_s4 = inlined_call_operand.hbm [shape: f32[3,1024], index: 4, kind: input, shape index: {}]   ;;  %s4737_s5 = inlined_call_operand.hbm [shape: f32[2,2,1024], index: 5, kind: output, shape index: {}]  }
   0x1   :  { %4745 = sst [smem:[#allocation13_spill]] %s4735_s3 }
   0x2   :  { %10 = vsyncpa [#allocation3], 0 }
   0x3   :  { %11 = vsyncpa [#allocation6], 0 }
   0x4   :  { %13 = vsyncpa [#allocation6 + $0x1], 0 }
   0x5   :  { %14 = vsyncpa [#allocation4], 0 }
   0x6   :  { %16 = vsyncpa [#allocation4 + $0x1], 0  ;;  %s3599_s18 = smov 0   ;;  %s3601_s19 = smov 0  }
   0x7   :  { %s3603_s20 = smov 0   ;;  %s3605_s21 = smov 0  }
   0x8 LB: > { %s3620_s22 = sadd.s32 1, %s3552_s21   ;;  %s92_s23 = sadd.s32 1, %s3548_s20  ;;  %s3552_s21 = sphi %s3605_s21, %s4770_s21   ;;  %s3548_s20 = sphi %s3603_s20, %s4769_s20   ;;  %s3544_s19 = sphi %s3601_s19, %s4768_s19   ;;  %s3540_s18 = sphi %s3599_s18, %s4767_s18  }
   0x9   : > { %s89_s24 = ssub.s32 %s3552_s21, %s3620_s22  ;;  %p99_p0 = scmp.ne.s32.totalorder %s3548_s20, %s3544_s19 }
   0xa   : > { %p90_p1 = scmp.eq.s32.totalorder %s89_s24, 0  ;;  %p100_p2 = scmp.eq.s32.totalorder %s3552_s21, 0 }
   0xb   : > { %p3344_p4 = scmp.lt.s32.totalorder %s3552_s21, 2  ;;  %s200_s26 = sand.u32 1, %s3552_s21  }
   0xc   : > { %s3631_s25 = scalar_select %p90_p1, %s3548_s20, %s92_s23  }
   0xd   : > { %p101_p5 = por %p100_p2, %p99_p0  ;;  %s202_s27 = sand.u32 1, %s3548_s20  }
   0xe   : > { %4746 = sst [smem:[#allocation12_spill]] %s3631_s25  ;;  %s3316_s28 = smul.u32 3072, %s202_s27 }
   0xf   : > { %s3265_s29 = sshll.u32 %s3552_s21, 9  ;;  %s4747_s3 = sld [smem:[#allocation13_spill]] }
  0x10   : > { %p3646_p6 = pnand %p3344_p4, %p101_p5  ;;  %s204_s9 = scalar_lea.vmem [#allocation5], %s3316_s28 }
  0x11   : > { %s211_s10 = sshll.u32 %s204_s9, 4  ;;  %s3652_s11 = scalar_lea.sflag [#allocation6], %s200_s26  ;;  %s3650_s10 = int_to_ptr.vmem [resolvable:$true] %s211_s10 }
  0x12   : > { %s4748_s8 = scalar_select %p3646_p6, 1, 0 }
  0x13   : > { %p4739_p8 = pneg %p3646_p6 }
  0x15   : > { %s3644_s7 = scalar_lea.hbm %s4747_s3, %s3265_s29  ;;  %s3399_s15 = scalar_lea.hbm %s4747_s3, 98304 }
  0x16   : > { %s3394_s12 = scalar_lea.hbm %s3644_s7, 49152  ;;  %p3400_p11 = scmp.lt.u32.totalorder %s3644_s7, %s4747_s3 }
  0x17   : > { %p3395_p7 = scmp.ne.s32.totalorder %s3644_s7, %s3394_s12  ;;  %p3401_p12 = scmp.lt.u32.totalorder %s3399_s15, %s3394_s12 }
  0x18   : > { %p3403_p1 = scmp.lt.u32.totalorder %s3394_s12, %s3644_s7 }
  0x19   : > { %p3397_p9 = pnand %p4739_p8, %p3395_p7  ;;  %p3402_p13 = por %p3401_p12, %p3400_p11 }
  0x1b   : > { %p3398_p10 = pneg %p3397_p9  ;;  %p3404_p2 = por %p3403_p1, %p3402_p13 }
  0x1d   : > { %p3405_p4 = pnand %p3404_p2, %p3398_p10 }
  0x1f   : > { %3408 = shalt.err (!%p3405_p4)
}
  0x20   : > { %s3409_s23 = scalar_lea.vmem %s3650_s10, 49152  ;;  %s3554_s24 = smov [#allocation5]  }
  0x21   : > { %p3410_p5 = scmp.ne.s32.totalorder %s3650_s10, %s3409_s23  ;;  %s3414_s26 = sshll.u32 %s3554_s24, 4  ;;  %s3415_s26 = int_to_ptr.vmem [resolvable:$false] %s3414_s26 }
  0x22   : > { %s3416_s28 = scalar_lea.vmem %s3415_s26, 98304  ;;  %p3417_p3 = scmp.lt.s32.totalorder %s3650_s10, %s3415_s26 }
  0x23   : > { %p3412_p7 = pnand %p3410_p5, %p4739_p8  ;;  %p3418_p11 = scmp.lt.s32.totalorder %s3416_s28, %s3409_s23 }
  0x25   : > { %p3413_p9 = pneg %p3412_p7  ;;  %p3419_p12 = por %p3418_p11, %p3417_p3 }
  0x27   : > { %p3420_p13 = pnand %p3419_p12, %p3413_p9 }
  0x29   : > { %3423 = shalt.err (!%p3420_p13)
}
  0x2a   : > { %s3555_s29 = smov 1024   ;;  %s3556_s30 = smov 512  }
  0x2b   : > { %s3557_s6 = smov 32   ;;  %s3681_s9 = sadd.s32 4294967295, %s3552_s21  }
  0x2c   : > { %3335 = dma.hbm_to_vmem [thread:$0]  (!%p3646_p6), %s3644_s7, 49152, %s3650_s10, %s3652_s11, %s3555_s29, %s3556_s30, %s3557_s6  }
  0x2d   : > { %s3112_s12 = sadd.s32 4294967294, %s3552_s21   ;;  %p105_p3 = scmp.ne.s32.totalorder %s3544_s19, %s3540_s18 }
  0x2e   : > { %p4738_p10 = scmp.eq.s32.totalorder %s3681_s9, 0  ;;  %p155_p1 = scmp.eq.s32.totalorder %s3681_s9, 1 }
  0x2f   : > { %p161_p2 = scmp.eq.s32.totalorder %s3112_s12, 1  ;;  %p3113_p4 = scmp.ge.s32.totalorder %s3552_s21, 1 }
  0x30   : > { %p3691_p5 = por %p4738_p10, %p105_p3  ;;  %p3698_p7 = por %p155_p1, %p99_p0 }
  0x31   : > { %p3702_p9 = por %p161_p2, %p105_p3  ;;  %p168_p11 = scmp.lt.s32.totalorder %s3552_s21, 3 }
  0x32   : > { %s4749_s13 = scalar_select %p3691_p5, 1, 0 }
  0x33   : > { %s4750_s7 = scalar_select %p3698_p7, 1, 0 }
  0x34   : > { %s4751_s10 = scalar_select %p3702_p9, 1, 0 }
  0x35   : > { %p3707_p12 = pnand %p3113_p4, %p168_p11  ;;  %s3558_s15 = smov [#allocation2]  }
  0x36   : > { %s180_s16 = sshll.u32 %s3558_s15, 4  ;;  %s3118_s17 = sshll.u32 %s202_s27, 4  ;;  %s3711_s16 = int_to_ptr.vmem [resolvable:$true] %s180_s16 }
  0x37   : > { %s4752_s14 = scalar_select %p3707_p12, 1, 0 }
  0x38   : > { %p3328_p13 = pneg %p3707_p12  ;;  %s3266_s23 = sshll.u32 %s3552_s21, 8 }
  0x39   : > { %s3727_s29 = scalar_lea.hbm %s4736_s4, %s3266_s23  ;;  %s225_s30 = scalar_lea.vmem [#allocation7], %s3118_s17 }
  0x3a   : > { %p3720_p0 = pnand %p3328_p13, %p4738_p10  ;;  %s233_s6 = sshll.u32 %s225_s30, 4  ;;  %s3729_s6 = int_to_ptr.vmem [resolvable:$true] %s233_s6 }
  0x3b   : > { %s3424_s27 = scalar_lea.hbm %s4732_s0, 4608 }
  0x3c   : > { %p3425_p3 = scmp.ne.s32.totalorder %s4732_s0, %s3424_s27  ;;  %p3426_p1 = pneg %p3720_p0 }
  0x3d   : > { %p3431_p11 = scmp.lt.u32.totalorder %s3424_s27, %s4732_s0 }
  0x3e   : > { %p3427_p2 = pnand %p3426_p1, %p3425_p3 }
  0x40   : > { %p3428_p4 = pneg %p3427_p2 }
  0x42   : > { %p3433_p13 = pnand %p3431_p11, %p3428_p4 }
  0x44   : > { %3436 = shalt.err (!%p3433_p13)
}
  0x45   : > { %s3437_s17 = scalar_lea.vmem %s3711_s16, 4608  ;;  %p3445_p7 = scmp.lt.s32.totalorder %s3711_s16, %s3711_s16 }
  0x46   : > { %p3438_p10 = scmp.ne.s32.totalorder %s3711_s16, %s3437_s17  ;;  %p3446_p5 = scmp.lt.s32.totalorder %s3437_s17, %s3437_s17 }
  0x48   : > { %p3440_p8 = pnand %p3438_p10, %p3426_p1  ;;  %p3447_p12 = por %p3446_p5, %p3445_p7 }
  0x4a   : > { %p3441_p9 = pneg %p3440_p8 }
  0x4c   : > { %p3448_p6 = pnand %p3447_p12, %p3441_p9 }
  0x4e   : > { %3451 = shalt.err (!%p3448_p6)
}
  0x4f   : > { %s3559_s3 = smov 768   ;;  %s3560_s25 = smov 48  }
  0x50   : > { %3331 = dma.hbm_to_vmem [thread:$0]  (!%p3720_p0), %s4732_s0, 4608, %s3711_s16, [#allocation3], %s3559_s3, %s3559_s3, %s3560_s25  }
  0x51   : > { %s3452_s12 = scalar_lea.hbm %s3727_s29, 256  ;;  %p4754_p10 = scmp.ne.s32.totalorder %s4748_s8, 0 }
  0x52   : > { %p3453_p8 = scmp.ne.s32.totalorder %s3727_s29, %s3452_s12  ;;  %s3457_s26 = scalar_lea.hbm %s4736_s4, 512 }
  0x53   : > { %p4755_p5 = pneg %p4754_p10  ;;  %p3458_p9 = scmp.lt.u32.totalorder %s3727_s29, %s4736_s4 }
  0x54   : > { %p3459_p12 = scmp.lt.u32.totalorder %s3457_s26, %s3452_s12  ;;  %p3461_p1 = scmp.lt.u32.totalorder %s3452_s12, %s3727_s29 }
  0x55   : > { %p3455_p7 = pnand %p3453_p8, %p4755_p5 }
  0x56   : > { %p3460_p3 = por %p3459_p12, %p3458_p9 }
  0x57   : > { %p3456_p6 = pneg %p3455_p7 }
  0x58   : > { %p3462_p2 = por %p3461_p1, %p3460_p3 }
  0x5a   : > { %p3463_p4 = pnand %p3462_p2, %p3456_p6 }
  0x5c   : > { %3466 = shalt.err (!%p3463_p4)
}
  0x5d   : > { %s3467_s16 = scalar_lea.vmem %s3729_s6, 256  ;;  %p4756_p11 = pmov %p4755_p5 }
  0x5e   : > { %p3468_p0 = scmp.ne.s32.totalorder %s3729_s6, %s3467_s16  ;;  %s3561_s24 = smov [#allocation7]  }
  0x5f   : > { %s3472_s3 = sshll.u32 %s3561_s24, 4  ;;  %s3473_s3 = int_to_ptr.vmem [resolvable:$false] %s3472_s3 }
  0x60   : > { %p3470_p13 = pnand %p3468_p0, %p4756_p11  ;;  %s3474_s25 = scalar_lea.vmem %s3473_s3, 512 }
  0x61   : > { %p3475_p5 = scmp.lt.s32.totalorder %s3729_s6, %s3473_s3  ;;  %p3476_p7 = scmp.lt.s32.totalorder %s3474_s25, %s3467_s16 }
  0x62   : > { %p3471_p8 = pneg %p3470_p13 }
  0x63   : > { %p3477_p9 = por %p3476_p7, %p3475_p5 }
  0x65   : > { %p3478_p12 = pnand %p3477_p9, %p3471_p8 }
  0x67   : > { %3481 = shalt.err (!%p3478_p12)
}
  0x68   : > { %3338 = dma.hbm_to_vmem [thread:$0]  (!%p4754_p10), %s3727_s29, 256, %s3729_s6, %s3652_s11  }
  0x69   : > { %p4757_p6 = scmp.ne.s32.totalorder %s4752_s14, 0 }
  0x6a   : > { %p4758_p3 = scmp.eq.s32.totalorder (!%p4757_p6), %s3681_s9, 0 }
  0x6b   : > { %242 = sbr.rel (%p4757_p6) target bundleno = 849 (0x351), region = 40 }
  0x72   : > { %3527 = dma.done.wait (%p4758_p3), [#allocation3], 4608   ;;  %p4759_p1 = pmov %p4758_p3 }
  0x73   : > { %s248_s23 = sand.u32 1, %s3681_s9   ;;  %s3784_s30 = sand.u32 1, %s3544_s19  }
  0x74   : > { %3529 = vsyncadd (%p4759_p1), [#allocation3], 4294962688  ;;  %s3317_s8 = smul.u32 3072, %s3784_s30  ;;  %s249_s12 = scalar_lea.sflag [#allocation6], %s248_s23 }
  0x75   : > { %p4760_p10 = scmp.ne.s32.totalorder %s4749_s13, 0 }
  0x76   : > { %s3787_s15 = scalar_lea.vmem [#allocation5], %s3317_s8 }
  0x77   : > { %3531 = dma.done.wait (%p4760_p10), %s249_s12, 49408  }
  0x78   : > { %3533 = vsyncadd (%p4760_p10), %s249_s12, 4294917888  ;;  %v351_v0 = vld [vmem:[%s3787_s15 + $0x8] sm:$0xff]  ;;  %v353_v2 = vld [vmem:[%s3787_s15 + $0x18] sm:$0xff]  ;;  %s3123_s11 = sshll.u32 %s3784_s30, 4  ;;  %vm1639_vm0 = vcmask 1042432   ;;  %vm1446_vm1 = vcmask 23552  }
  0x79   : > { %v355_v1 = vld [vmem:[%s3787_s15 + $0x28] sm:$0xff]  ;;  %v357_v4 = vld [vmem:[%s3787_s15 + $0x38] sm:$0xff]  ;;  %v350_v5 = vld [vmem:[%s3787_s15] sm:$0xff]  ;;  %s261_s13 = scalar_lea.vmem [#allocation7], %s3123_s11  ;;  %s4590_s6 = scalar_lea.vmem [#allocation8], %s3123_s11  ;;  %vm2938_vm3 = vcmask 1041409  }
  0x7a   : > { %v735_v3 = vpack.c.bf16 %v355_v1, %v351_v0  ;;  %v354_v6 = vld [vmem:[%s3787_s15 + $0x20] sm:$0xff]  ;;  %v737_v7 = vpack.c.bf16 %v357_v4, %v353_v2  ;;  %v352_v9 = vld [vmem:[%s3787_s15 + $0x10] sm:$0xff]  ;;  %v359_v11 = vld [vmem:[%s3787_s15 + $0x48] sm:$0xff]  ;;  %s3007_s27 = sshll.u32 %s4590_s6, 4  ;;  %s3267_s26 = sshll.u32 %s3681_s9, 7  ;;  %s4675_s27 = int_to_ptr.vmem [resolvable:$true] %s3007_s27 }
  0x7b   : > { %v734_v8 = vpack.c.bf16 %v354_v6, %v350_v5  ;;  %v356_v10 = vld [vmem:[%s3787_s15 + $0x30] sm:$0xff]  ;;  %v363_v13 = vld [vmem:[%s3787_s15 + $0x68] sm:$0xff]  ;;  %v361_v14 = vld [vmem:[%s3787_s15 + $0x58] sm:$0xff]  ;;  %s4680_s17 = scalar_lea.hbm %s4737_s5, %s3267_s26  ;;  %s2994_s9 = scalar_lea.sflag [#allocation4], %s3784_s30 }
  0x7c   : > { %926 = vmatprep.subr.bf16.mxu0 %v735_v3  ;;  %v736_v12 = vpack.c.bf16 %v356_v10, %v352_v9  ;;  %v365_v15 = vld [vmem:[%s3787_s15 + $0x78] sm:$0xff]  ;;  %1115 = vmatprep.subr.bf16.mxu1 %v737_v7  ;;  %v739_v16 = vpack.c.bf16 %v363_v13, %v359_v11  ;;  %v358_v18 = vld [vmem:[%s3787_s15 + $0x40] sm:$0xff]  ;;  %v360_v20 = vld [vmem:[%s3787_s15 + $0x50] sm:$0xff]  ;;  %s3482_s16 = scalar_lea.vmem %s4675_s27, 256  ;;  %p4763_p4 = scmp.ne.s32.totalorder %s4750_s7, 0 }
  0x7d   : > { %927 = vmatpush1.bf16.msra.mxu0 %v734_v8  ;;  %v741_v17 = vpack.c.bf16 %v365_v15, %v361_v14  ;;  %v362_v19 = vld [vmem:[%s3787_s15 + $0x60] sm:$0xff]  ;;  %v364_v22 = vld [vmem:[%s3787_s15 + $0x70] sm:$0xff]  ;;  %v367_v23 = vld [vmem:[%s3787_s15 + $0x88] sm:$0xff]  ;;  %p3483_p2 = scmp.ne.s32.totalorder %s4675_s27, %s3482_s16  ;;  %s3565_s24 = smov [#allocation8]  }
  0x7e   : > { %1116 = vmatpush1.bf16.msra.mxu1 %v736_v12  ;;  %v738_v21 = vpack.c.bf16 %v362_v19, %v358_v18  ;;  %v371_v24 = vld [vmem:[%s3787_s15 + $0xa8] sm:$0xff]  ;;  %928 = vmatprep.subr.bf16.mxu0 %v739_v16  ;;  %v740_v25 = vpack.c.bf16 %v364_v22, %v360_v20  ;;  %v369_v27 = vld [vmem:[%s3787_s15 + $0x98] sm:$0xff]  ;;  %v366_v29 = vld [vmem:[%s3787_s15 + $0x80] sm:$0xff]  ;;  %s3486_s3 = sshll.u32 %s3565_s24, 4  ;;  %s3487_s3 = int_to_ptr.vmem [resolvable:$false] %s3486_s3 }
  0x7f   : > { %1117 = vmatprep.subr.bf16.mxu1 %v741_v17  ;;  %v743_v26 = vpack.c.bf16 %v371_v24, %v367_v23  ;;  %v373_v28 = vld [vmem:[%s3787_s15 + $0xb8] sm:$0xff]  ;;  %v370_v31 = vld [vmem:[%s3787_s15 + $0xa0] sm:$0xff]  ;;  %v368_v32 = vld [vmem:[%s3787_s15 + $0x90] sm:$0xff]  ;;  %p3484_p0 = pnand %p3483_p2, %p4763_p4  ;;  %s3488_s25 = scalar_lea.vmem %s3487_s3, 512 }
  0x80   : > { %v745_v30 = vpack.c.bf16 %v373_v28, %v369_v27  ;;  %v372_v33 = vld [vmem:[%s3787_s15 + $0xb0] sm:$0xff]  ;;  %v742_v34 = vpack.c.bf16 %v370_v31, %v366_v29  ;;  %v375_v35 = vld [vmem:[%s3787_s15 + $0xc8] sm:$0xff]  ;;  %v377_v37 = vld [vmem:[%s3787_s15 + $0xd8] sm:$0xff]  ;;  %p3489_p13 = scmp.lt.s32.totalorder %s4675_s27, %s3487_s3  ;;  %p3490_p8 = scmp.lt.s32.totalorder %s3488_s25, %s3482_s16 }
  0x81   : > { %929 = vmatpush1.bf16.msra.mxu0 %v738_v21  ;;  %v379_v36 = vld [vmem:[%s3787_s15 + $0xe8] sm:$0xff]  ;;  %v744_v38 = vpack.c.bf16 %v372_v33, %v368_v32  ;;  %v381_v40 = vld [vmem:[%s3787_s15 + $0xf8] sm:$0xff]  ;;  %v374_v41 = vld [vmem:[%s3787_s15 + $0xc0] sm:$0xff]  ;;  %p3485_p11 = pneg %p3484_p0 }
  0x82   : > { %1118 = vmatpush1.bf16.msra.mxu1 %v740_v25  ;;  %930 = vmatprep.subr.bf16.mxu0 %v743_v26  ;;  %v747_v39 = vpack.c.bf16 %v379_v36, %v375_v35  ;;  %v378_v42 = vld [vmem:[%s3787_s15 + $0xe0] sm:$0xff]  ;;  %v749_v43 = vpack.c.bf16 %v381_v40, %v377_v37  ;;  %v376_v44 = vld [vmem:[%s3787_s15 + $0xd0] sm:$0xff]  ;;  %v383_v46 = vld [vmem:[%s3787_s15 + $0x108] sm:$0xff]  ;;  %p3491_p5 = por %p3490_p8, %p3489_p13 }
  0x83   : > { %1119 = vmatprep.subr.bf16.mxu1 %v745_v30  ;;  %v380_v45 = vld [vmem:[%s3787_s15 + $0xf0] sm:$0xff]  ;;  %v387_v47 = vld [vmem:[%s3787_s15 + $0x128] sm:$0xff]  ;;  %v385_v48 = vld [vmem:[%s3787_s15 + $0x118] sm:$0xff]  ;;  %v746_v50 = vpack.c.bf16 %v378_v42, %v374_v41 }
  0x84   : > { %v389_v49 = vld [vmem:[%s3787_s15 + $0x138] sm:$0xff]  ;;  %v748_v51 = vpack.c.bf16 %v380_v45, %v376_v44  ;;  %v751_v52 = vpack.c.bf16 %v387_v47, %v383_v46  ;;  %v382_v53 = vld [vmem:[%s3787_s15 + $0x100] sm:$0xff]  ;;  %v384_v55 = vld [vmem:[%s3787_s15 + $0x110] sm:$0xff]  ;;  %p3492_p7 = pnand %p3491_p5, %p3485_p11 }
  0x85   : > { %931 = vmatpush1.bf16.msra.mxu0 %v742_v34  ;;  %v386_v54 = vld [vmem:[%s3787_s15 + $0x120] sm:$0xff]  ;;  %v753_v56 = vpack.c.bf16 %v389_v49, %v385_v48  ;;  %v388_v57 = vld [vmem:[%s3787_s15 + $0x130] sm:$0xff]  ;;  %v391_v58 = vld [vmem:[%s3787_s15 + $0x148] sm:$0xff] }
  0x86   : > { %1120 = vmatpush1.bf16.msra.mxu1 %v744_v38  ;;  %932 = vmatprep.subr.bf16.mxu0 %v747_v39  ;;  %v395_v59 = vld [vmem:[%s3787_s15 + $0x168] sm:$0xff]  ;;  %v393_v60 = vld [vmem:[%s3787_s15 + $0x158] sm:$0xff]  ;;  %v750_v62 = vpack.c.bf16 %v386_v54, %v382_v53  ;;  %v752_v63 = vpack.c.bf16 %v388_v57, %v384_v55  ;;  %v390_v1 = vld [vmem:[%s3787_s15 + $0x140] sm:$0xff] }
  0x87   : > { %1121 = vmatprep.subr.bf16.mxu1 %v749_v43  ;;  %v397_v61 = vld [vmem:[%s3787_s15 + $0x178] sm:$0xff]  ;;  %v755_v0 = vpack.c.bf16 %v395_v59, %v391_v58  ;;  %v394_v2 = vld [vmem:[%s3787_s15 + $0x160] sm:$0xff]  ;;  %v392_v3 = vld [vmem:[%s3787_s15 + $0x150] sm:$0xff] }
  0x88   : > { %v757_v4 = vpack.c.bf16 %v397_v61, %v393_v60  ;;  %v396_v5 = vld [vmem:[%s3787_s15 + $0x170] sm:$0xff]  ;;  %v399_v6 = vld [vmem:[%s3787_s15 + $0x188] sm:$0xff]  ;;  %v401_v8 = vld [vmem:[%s3787_s15 + $0x198] sm:$0xff]  ;;  %v754_v10 = vpack.c.bf16 %v394_v2, %v390_v1 }
  0x89   : > { %933 = vmatpush1.bf16.msra.mxu0 %v746_v50  ;;  %v403_v7 = vld [vmem:[%s3787_s15 + $0x1a8] sm:$0xff]  ;;  %v405_v9 = vld [vmem:[%s3787_s15 + $0x1b8] sm:$0xff]  ;;  %v756_v11 = vpack.c.bf16 %v396_v5, %v392_v3  ;;  %v398_v13 = vld [vmem:[%s3787_s15 + $0x180] sm:$0xff] }
  0x8a   : > { %1122 = vmatpush1.bf16.msra.mxu1 %v748_v51  ;;  %934 = vmatprep.subr.bf16.mxu0 %v751_v52  ;;  %v759_v12 = vpack.c.bf16 %v403_v7, %v399_v6  ;;  %v402_v14 = vld [vmem:[%s3787_s15 + $0x1a0] sm:$0xff]  ;;  %v400_v15 = vld [vmem:[%s3787_s15 + $0x190] sm:$0xff]  ;;  %v761_v16 = vpack.c.bf16 %v405_v9, %v401_v8  ;;  %v407_v18 = vld [vmem:[%s3787_s15 + $0x1c8] sm:$0xff] }
  0x8b   : > { %1123 = vmatprep.subr.bf16.mxu1 %v753_v56  ;;  %v404_v17 = vld [vmem:[%s3787_s15 + $0x1b0] sm:$0xff]  ;;  %v411_v19 = vld [vmem:[%s3787_s15 + $0x1e8] sm:$0xff]  ;;  %v409_v20 = vld [vmem:[%s3787_s15 + $0x1d8] sm:$0xff]  ;;  %v758_v22 = vpack.c.bf16 %v402_v14, %v398_v13 }
  0x8c   : > { %v413_v21 = vld [vmem:[%s3787_s15 + $0x1f8] sm:$0xff]  ;;  %v760_v23 = vpack.c.bf16 %v404_v17, %v400_v15  ;;  %v763_v24 = vpack.c.bf16 %v411_v19, %v407_v18  ;;  %v406_v25 = vld [vmem:[%s3787_s15 + $0x1c0] sm:$0xff]  ;;  %v408_v27 = vld [vmem:[%s3787_s15 + $0x1d0] sm:$0xff] }
  0x8d   : > { %935 = vmatpush1.bf16.msra.mxu0 %v750_v62  ;;  %v410_v26 = vld [vmem:[%s3787_s15 + $0x1e0] sm:$0xff]  ;;  %v765_v28 = vpack.c.bf16 %v413_v21, %v409_v20  ;;  %v412_v29 = vld [vmem:[%s3787_s15 + $0x1f0] sm:$0xff]  ;;  %v415_v30 = vld [vmem:[%s3787_s15 + $0x208] sm:$0xff] }
  0x8e   : > { %1124 = vmatpush1.bf16.msra.mxu1 %v752_v63  ;;  %936 = vmatprep.subr.bf16.mxu0 %v755_v0  ;;  %v419_v31 = vld [vmem:[%s3787_s15 + $0x228] sm:$0xff]  ;;  %v417_v32 = vld [vmem:[%s3787_s15 + $0x218] sm:$0xff]  ;;  %v762_v34 = vpack.c.bf16 %v410_v26, %v406_v25  ;;  %v764_v35 = vpack.c.bf16 %v412_v29, %v408_v27  ;;  %v414_v37 = vld [vmem:[%s3787_s15 + $0x200] sm:$0xff] }
  0x8f   : > { %1125 = vmatprep.subr.bf16.mxu1 %v757_v4  ;;  %v421_v33 = vld [vmem:[%s3787_s15 + $0x238] sm:$0xff]  ;;  %v767_v36 = vpack.c.bf16 %v419_v31, %v415_v30  ;;  %v418_v38 = vld [vmem:[%s3787_s15 + $0x220] sm:$0xff]  ;;  %v416_v39 = vld [vmem:[%s3787_s15 + $0x210] sm:$0xff] }
  0x90   : > { %v769_v40 = vpack.c.bf16 %v421_v33, %v417_v32  ;;  %v420_v41 = vld [vmem:[%s3787_s15 + $0x230] sm:$0xff]  ;;  %v423_v42 = vld [vmem:[%s3787_s15 + $0x248] sm:$0xff]  ;;  %v425_v44 = vld [vmem:[%s3787_s15 + $0x258] sm:$0xff]  ;;  %v766_v46 = vpack.c.bf16 %v418_v38, %v414_v37 }
  0x91   : > { %937 = vmatpush1.bf16.msra.mxu0 %v754_v10  ;;  %v427_v43 = vld [vmem:[%s3787_s15 + $0x268] sm:$0xff]  ;;  %v429_v45 = vld [vmem:[%s3787_s15 + $0x278] sm:$0xff]  ;;  %v768_v47 = vpack.c.bf16 %v420_v41, %v416_v39  ;;  %v422_v49 = vld [vmem:[%s3787_s15 + $0x240] sm:$0xff] }
  0x92   : > { %1126 = vmatpush1.bf16.msra.mxu1 %v756_v11  ;;  %938 = vmatprep.subr.bf16.mxu0 %v759_v12  ;;  %v771_v48 = vpack.c.bf16 %v427_v43, %v423_v42  ;;  %v426_v50 = vld [vmem:[%s3787_s15 + $0x260] sm:$0xff]  ;;  %v424_v51 = vld [vmem:[%s3787_s15 + $0x250] sm:$0xff]  ;;  %v773_v52 = vpack.c.bf16 %v429_v45, %v425_v44  ;;  %v431_v54 = vld [vmem:[%s3787_s15 + $0x288] sm:$0xff] }
  0x93   : > { %1127 = vmatprep.subr.bf16.mxu1 %v761_v16  ;;  %v428_v53 = vld [vmem:[%s3787_s15 + $0x270] sm:$0xff]  ;;  %v435_v55 = vld [vmem:[%s3787_s15 + $0x2a8] sm:$0xff]  ;;  %v433_v56 = vld [vmem:[%s3787_s15 + $0x298] sm:$0xff]  ;;  %v770_v58 = vpack.c.bf16 %v426_v50, %v422_v49 }
  0x94   : > { %v437_v57 = vld [vmem:[%s3787_s15 + $0x2b8] sm:$0xff]  ;;  %v772_v59 = vpack.c.bf16 %v428_v53, %v424_v51  ;;  %v775_v60 = vpack.c.bf16 %v435_v55, %v431_v54  ;;  %v430_v61 = vld [vmem:[%s3787_s15 + $0x280] sm:$0xff]  ;;  %v432_v63 = vld [vmem:[%s3787_s15 + $0x290] sm:$0xff] }
  0x95   : > { %939 = vmatpush1.bf16.msra.mxu0 %v758_v22  ;;  %v434_v62 = vld [vmem:[%s3787_s15 + $0x2a0] sm:$0xff]  ;;  %v777_v0 = vpack.c.bf16 %v437_v57, %v433_v56  ;;  %v436_v1 = vld [vmem:[%s3787_s15 + $0x2b0] sm:$0xff]  ;;  %v439_v2 = vld [vmem:[%s3787_s15 + $0x2c8] sm:$0xff] }
  0x96   : > { %1128 = vmatpush1.bf16.msra.mxu1 %v760_v23  ;;  %940 = vmatprep.subr.bf16.mxu0 %v763_v24  ;;  %v443_v3 = vld [vmem:[%s3787_s15 + $0x2e8] sm:$0xff]  ;;  %v441_v4 = vld [vmem:[%s3787_s15 + $0x2d8] sm:$0xff]  ;;  %v774_v6 = vpack.c.bf16 %v434_v62, %v430_v61  ;;  %v438_v7 = vld [vmem:[%s3787_s15 + $0x2c0] sm:$0xff]  ;;  %v776_v8 = vpack.c.bf16 %v436_v1, %v432_v63 }
  0x97   : > { %1129 = vmatprep.subr.bf16.mxu1 %v765_v28  ;;  %v445_v5 = vld [vmem:[%s3787_s15 + $0x2f8] sm:$0xff]  ;;  %v779_v9 = vpack.c.bf16 %v443_v3, %v439_v2  ;;  %v442_v10 = vld [vmem:[%s3787_s15 + $0x2e0] sm:$0xff]  ;;  %v440_v11 = vld [vmem:[%s3787_s15 + $0x2d0] sm:$0xff] }
  0x98   : > { %v444_v12 = vld [vmem:[%s3787_s15 + $0x2f0] sm:$0xff]  ;;  %v781_v13 = vpack.c.bf16 %v445_v5, %v441_v4  ;;  %v447_v14 = vld [vmem:[%s3787_s15 + $0x308] sm:$0xff]  ;;  %v449_v17 = vld [vmem:[%s3787_s15 + $0x318] sm:$0xff]  ;;  %v778_v20 = vpack.c.bf16 %v442_v10, %v438_v7 }
  0x99   : > { %941 = vmatpush1.bf16.msra.mxu0 %v762_v34  ;;  %v451_v15 = vld [vmem:[%s3787_s15 + $0x328] sm:$0xff]  ;;  %v453_v18 = vld [vmem:[%s3787_s15 + $0x338] sm:$0xff]  ;;  %v780_v22 = vpack.c.bf16 %v444_v12, %v440_v11  ;;  %v446_v24 = vld [vmem:[%s3787_s15 + $0x300] sm:$0xff] }
  0x9a   : > { %1130 = vmatpush1.bf16.msra.mxu1 %v764_v35  ;;  %942 = vmatprep.subr.bf16.mxu0 %v767_v36  ;;  %v297_v16 = vld [vmem:[#allocation2 + $0x8] sm:$0xff]  ;;  %v303_v19 = vld [vmem:[#allocation2 + $0x38] sm:$0xff]  ;;  %v783_v23 = vpack.c.bf16 %v451_v15, %v447_v14  ;;  %v450_v25 = vld [vmem:[%s3787_s15 + $0x320] sm:$0xff]  ;;  %v785_v27 = vpack.c.bf16 %v453_v18, %v449_v17 }
  0x9b   : > { %1131 = vmatprep.subr.bf16.mxu1 %v769_v40  ;;  %v333_v21 = vpack.c.bf16 %v303_v19, %v297_v16  ;;  %v448_v26 = vld [vmem:[%s3787_s15 + $0x310] sm:$0xff]  ;;  %v455_v29 = vld [vmem:[%s3787_s15 + $0x348] sm:$0xff]  ;;  %v457_v31 = vld [vmem:[%s3787_s15 + $0x358] sm:$0xff]  ;;  %v782_v33 = vpack.c.bf16 %v450_v25, %v446_v24 }
  0x9c   : > { %v452_v28 = vld [vmem:[%s3787_s15 + $0x330] sm:$0xff]  ;;  %v459_v30 = vld [vmem:[%s3787_s15 + $0x368] sm:$0xff]  ;;  %v461_v32 = vld [vmem:[%s3787_s15 + $0x378] sm:$0xff] }
  0x9d   : > { %943 = vmatpush1.bf16.msra.mxu0 %v766_v46  ;;  %958 = vmatprep.mubr.bf16.mxu0 %v333_v21  ;;  %v784_v34 = vpack.c.bf16 %v452_v28, %v448_v26  ;;  %v787_v35 = vpack.c.bf16 %v459_v30, %v455_v29  ;;  %v454_v36 = vld [vmem:[%s3787_s15 + $0x340] sm:$0xff]  ;;  %v456_v38 = vld [vmem:[%s3787_s15 + $0x350] sm:$0xff]  ;;  %v789_v39 = vpack.c.bf16 %v461_v32, %v457_v31  ;;  %v463_v41 = vld [vmem:[%s3787_s15 + $0x388] sm:$0xff] }
  0x9e   : > { %1132 = vmatpush1.bf16.msra.mxu1 %v768_v47  ;;  %944 = vmatprep.subr.bf16.mxu0 %v771_v48  ;;  %v458_v37 = vld [vmem:[%s3787_s15 + $0x360] sm:$0xff]  ;;  %v460_v40 = vld [vmem:[%s3787_s15 + $0x370] sm:$0xff]  ;;  %v467_v42 = vld [vmem:[%s3787_s15 + $0x3a8] sm:$0xff] }
  0x9f   : > { %1133 = vmatprep.subr.bf16.mxu1 %v773_v52  ;;  %1147 = vmatprep.mubr.bf16.mxu1 %v333_v21  ;;  %v465_v43 = vld [vmem:[%s3787_s15 + $0x398] sm:$0xff]  ;;  %v786_v45 = vpack.c.bf16 %v458_v37, %v454_v36  ;;  %v788_v46 = vpack.c.bf16 %v460_v40, %v456_v38  ;;  %v791_v47 = vpack.c.bf16 %v467_v42, %v463_v41  ;;  %v462_v48 = vld [vmem:[%s3787_s15 + $0x380] sm:$0xff]  ;;  %v464_v50 = vld [vmem:[%s3787_s15 + $0x390] sm:$0xff] }
  0xa0   : > { %v469_v44 = vld [vmem:[%s3787_s15 + $0x3b8] sm:$0xff]  ;;  %v466_v49 = vld [vmem:[%s3787_s15 + $0x3a0] sm:$0xff]  ;;  %v468_v52 = vld [vmem:[%s3787_s15 + $0x3b0] sm:$0xff] }
  0xa1   : > { %945 = vmatpush1.bf16.msra.mxu0 %v770_v58  ;;  %v793_v51 = vpack.c.bf16 %v469_v44, %v465_v43  ;;  %v471_v53 = vld [vmem:[%s3787_s15 + $0x3c8] sm:$0xff]  ;;  %v473_v55 = vld [vmem:[%s3787_s15 + $0x3d8] sm:$0xff]  ;;  %v790_v57 = vpack.c.bf16 %v466_v49, %v462_v48  ;;  %v792_v58 = vpack.c.bf16 %v468_v52, %v464_v50  ;;  %v474_v61 = vld [vmem:[%s3787_s15 + $0x3e0] sm:$0xff] }
  0xa2   : > { %1134 = vmatpush1.bf16.msra.mxu1 %v772_v59  ;;  %946 = vmatprep.subr.bf16.mxu0 %v775_v60  ;;  %v475_v54 = vld [vmem:[%s3787_s15 + $0x3e8] sm:$0xff]  ;;  %v477_v56 = vld [vmem:[%s3787_s15 + $0x3f8] sm:$0xff]  ;;  %v470_v60 = vld [vmem:[%s3787_s15 + $0x3c0] sm:$0xff] }
  0xa3   : > { %1135 = vmatprep.subr.bf16.mxu1 %v777_v0  ;;  %v795_v59 = vpack.c.bf16 %v475_v54, %v471_v53  ;;  %v472_v62 = vld [vmem:[%s3787_s15 + $0x3d0] sm:$0xff]  ;;  %v797_v63 = vpack.c.bf16 %v477_v56, %v473_v55  ;;  %v479_v1 = vld [vmem:[%s3787_s15 + $0x408] sm:$0xff]  ;;  %v481_v3 = vld [vmem:[%s3787_s15 + $0x418] sm:$0xff]  ;;  %v794_v5 = vpack.c.bf16 %v474_v61, %v470_v60 }
  0xa4   : > { %v476_v0 = vld [vmem:[%s3787_s15 + $0x3f0] sm:$0xff]  ;;  %v483_v2 = vld [vmem:[%s3787_s15 + $0x428] sm:$0xff]  ;;  %v485_v4 = vld [vmem:[%s3787_s15 + $0x438] sm:$0xff] }
  0xa5   : > { %947 = vmatpush1.bf16.msra.mxu0 %v774_v6  ;;  %v296_v6 = vld [vmem:[#allocation2] sm:$0xff]  ;;  %v302_v7 = vld [vmem:[#allocation2 + $0x30] sm:$0xff]  ;;  %v487_v15 = vld [vmem:[%s3787_s15 + $0x448] sm:$0xff] }
  0xa6   : > { %1136 = vmatpush1.bf16.msra.mxu1 %v776_v8  ;;  %948 = vmatprep.subr.bf16.mxu0 %v779_v9  ;;  %v796_v8 = vpack.c.bf16 %v476_v0, %v472_v62  ;;  %v799_v9 = vpack.c.bf16 %v483_v2, %v479_v1  ;;  %v478_v10 = vld [vmem:[%s3787_s15 + $0x400] sm:$0xff]  ;;  %v480_v12 = vld [vmem:[%s3787_s15 + $0x410] sm:$0xff]  ;;  %v491_v16 = vld [vmem:[%s3787_s15 + $0x468] sm:$0xff]  ;;  %v332_v17 = vpack.c.bf16 %v302_v7, %v296_v6 }
  0xa7   : > { %1137 = vmatprep.subr.bf16.mxu1 %v781_v13  ;;  %v482_v11 = vld [vmem:[%s3787_s15 + $0x420] sm:$0xff]  ;;  %v801_v13 = vpack.c.bf16 %v485_v4, %v481_v3  ;;  %v484_v14 = vld [vmem:[%s3787_s15 + $0x430] sm:$0xff]  ;;  %v489_v18 = vld [vmem:[%s3787_s15 + $0x458] sm:$0xff] }
  0xa8   : > { %v493_v19 = vld [vmem:[%s3787_s15 + $0x478] sm:$0xff]  ;;  %v800_v21 = vpack.c.bf16 %v484_v14, %v480_v12  ;;  %v490_v24 = vld [vmem:[%s3787_s15 + $0x460] sm:$0xff]  ;;  %v488_v25 = vld [vmem:[%s3787_s15 + $0x450] sm:$0xff] }
  0xa9   : > { %949 = vmatpush1.bf16.msra.mxu0 %v778_v20  ;;  %v798_v20 = vpack.c.bf16 %v482_v11, %v478_v10  ;;  %v805_v26 = vpack.c.bf16 %v493_v19, %v489_v18  ;;  %v495_v28 = vld [vmem:[%s3787_s15 + $0x488] sm:$0xff]  ;;  %v497_v30 = vld [vmem:[%s3787_s15 + $0x498] sm:$0xff]  ;;  %v498_v36 = vld [vmem:[%s3787_s15 + $0x4a0] sm:$0xff] }
  0xaa   : > { %1138 = vmatpush1.bf16.msra.mxu1 %v780_v22  ;;  %950 = vmatprep.subr.bf16.mxu0 %v783_v23  ;;  %v803_v22 = vpack.c.bf16 %v491_v16, %v487_v15  ;;  %v486_v23 = vld [vmem:[%s3787_s15 + $0x440] sm:$0xff]  ;;  %v499_v29 = vld [vmem:[%s3787_s15 + $0x4a8] sm:$0xff]  ;;  %v501_v31 = vld [vmem:[%s3787_s15 + $0x4b8] sm:$0xff] }
  0xab   : > { %1139 = vmatprep.subr.bf16.mxu1 %v785_v27  ;;  %v492_v27 = vld [vmem:[%s3787_s15 + $0x470] sm:$0xff]  ;;  %v802_v32 = vpack.c.bf16 %v490_v24, %v486_v23  ;;  %v809_v38 = vpack.c.bf16 %v501_v31, %v497_v30  ;;  %v503_v40 = vld [vmem:[%s3787_s15 + $0x4c8] sm:$0xff]  ;;  %v505_v42 = vld [vmem:[%s3787_s15 + $0x4d8] sm:$0xff] }
  0xac   : > { %v496_v37 = vld [vmem:[%s3787_s15 + $0x490] sm:$0xff]  ;;  %v507_v41 = vld [vmem:[%s3787_s15 + $0x4e8] sm:$0xff]  ;;  %v509_v43 = vld [vmem:[%s3787_s15 + $0x4f8] sm:$0xff] }
  0xad   : > { %951 = vmatpush1.bf16.msra.mxu0 %v782_v33  ;;  %v804_v33 = vpack.c.bf16 %v492_v27, %v488_v25  ;;  %v506_v48 = vld [vmem:[%s3787_s15 + $0x4e0] sm:$0xff]  ;;  %v504_v49 = vld [vmem:[%s3787_s15 + $0x4d0] sm:$0xff]  ;;  %v813_v50 = vpack.c.bf16 %v509_v43, %v505_v42  ;;  %v511_v52 = vld [vmem:[%s3787_s15 + $0x508] sm:$0xff] }
  0xae   : > { %1140 = vmatpush1.bf16.msra.mxu1 %v784_v34  ;;  %952 = vmatprep.subr.bf16.mxu0 %v787_v35  ;;  %v807_v34 = vpack.c.bf16 %v499_v29, %v495_v28  ;;  %v494_v35 = vld [vmem:[%s3787_s15 + $0x480] sm:$0xff]  ;;  %v515_v53 = vld [vmem:[%s3787_s15 + $0x528] sm:$0xff]  ;;  %v513_v54 = vld [vmem:[%s3787_s15 + $0x518] sm:$0xff] }
  0xaf   : > { %1141 = vmatprep.subr.bf16.mxu1 %v789_v39  ;;  %v500_v39 = vld [vmem:[%s3787_s15 + $0x4b0] sm:$0xff]  ;;  %v806_v44 = vpack.c.bf16 %v498_v36, %v494_v35  ;;  %v517_v55 = vld [vmem:[%s3787_s15 + $0x538] sm:$0xff]  ;;  %v510_v56 = vld [vmem:[%s3787_s15 + $0x500] sm:$0xff]  ;;  %v815_v62 = vpack.c.bf16 %v515_v53, %v511_v52 }
  0xb0   : > { %v315_v60 = vld [vmem:[#allocation2 + $0x98] sm:$0xff]  ;;  %v516_v0 = vld [vmem:[%s3787_s15 + $0x530] sm:$0xff]  ;;  %v519_v1 = vld [vmem:[%s3787_s15 + $0x548] sm:$0xff]  ;;  %v817_v3 = vpack.c.bf16 %v517_v55, %v513_v54 }
  0xb1   : > { %953 = vmatpush1.bf16.msra.mxu0 %v786_v45  ;;  %v808_v45 = vpack.c.bf16 %v500_v39, %v496_v37  ;;  %v523_v4 = vld [vmem:[%s3787_s15 + $0x568] sm:$0xff]  ;;  %v314_v6 = vld [vmem:[#allocation2 + $0x90] sm:$0xff]  ;;  %v521_v7 = vld [vmem:[%s3787_s15 + $0x558] sm:$0xff] }
  0xb2   : > { %1142 = vmatpush1.bf16.msra.mxu1 %v788_v46  ;;  %954 = vmatprep.subr.bf16.mxu0 %v791_v47  ;;  %v811_v46 = vpack.c.bf16 %v507_v41, %v503_v40  ;;  %v502_v47 = vld [vmem:[%s3787_s15 + $0x4c0] sm:$0xff]  ;;  %v520_v15 = vld [vmem:[%s3787_s15 + $0x550] sm:$0xff]  ;;  %v527_v18 = vld [vmem:[%s3787_s15 + $0x588] sm:$0xff] }
  0xb3   : > { %1143 = vmatprep.subr.bf16.mxu1 %v793_v51  ;;  %v508_v51 = vld [vmem:[%s3787_s15 + $0x4f0] sm:$0xff]  ;;  %v518_v11 = vld [vmem:[%s3787_s15 + $0x540] sm:$0xff]  ;;  %v531_v19 = vld [vmem:[%s3787_s15 + $0x5a8] sm:$0xff] }
  0xb4   : > { %v812_v61 = vpack.c.bf16 %v508_v51, %v504_v49  ;;  %v522_v14 = vld [vmem:[%s3787_s15 + $0x560] sm:$0xff]  ;;  %v524_v16 = vld [vmem:[%s3787_s15 + $0x570] sm:$0xff]  ;;  %v327_v23 = vld [vmem:[#allocation2 + $0xf8] sm:$0xff]  ;;  %v823_v29 = vpack.c.bf16 %v531_v19, %v527_v18 }
  0xb5   : > { %955 = vmatpush1.bf16.msra.mxu0 %v790_v57  ;;  %v810_v57 = vpack.c.bf16 %v506_v48, %v502_v47  ;;  %v818_v24 = vpack.c.bf16 %v522_v14, %v518_v11  ;;  %v526_v25 = vld [vmem:[%s3787_s15 + $0x580] sm:$0xff]  ;;  %v820_v28 = vpack.c.bf16 %v524_v16, %v520_v15  ;;  %v528_v31 = vld [vmem:[%s3787_s15 + $0x590] sm:$0xff]  ;;  %v535_v35 = vld [vmem:[%s3787_s15 + $0x5c8] sm:$0xff] }
  0xb6   : > { %1144 = vmatpush1.bf16.msra.mxu1 %v792_v58  ;;  %956 = vmatprep.subr.bf16.mxu0 %v795_v59  ;;  %v514_v58 = vld [vmem:[%s3787_s15 + $0x520] sm:$0xff]  ;;  %v309_v59 = vld [vmem:[#allocation2 + $0x68] sm:$0xff]  ;;  %v541_v39 = vld [vmem:[%s3787_s15 + $0x5f8] sm:$0xff] }
  0xb7   : > { %1145 = vmatprep.subr.bf16.mxu1 %v797_v63  ;;  %v512_v63 = vld [vmem:[%s3787_s15 + $0x510] sm:$0xff]  ;;  %v339_v2 = vpack.c.bf16 %v315_v60, %v309_v59  ;;  %v814_v10 = vpack.c.bf16 %v514_v58, %v510_v56  ;;  %v320_v27 = vld [vmem:[#allocation2 + $0xc0] sm:$0xff]  ;;  %v539_v36 = vld [vmem:[%s3787_s15 + $0x5e8] sm:$0xff] }
  0xb8   : > { %v816_v12 = vpack.c.bf16 %v516_v0, %v512_v63  ;;  %v530_v30 = vld [vmem:[%s3787_s15 + $0x5a0] sm:$0xff]  ;;  %v305_v47 = vld [vmem:[#allocation2 + $0x48] sm:$0xff]  ;;  %v540_v49 = vld [vmem:[%s3787_s15 + $0x5f0] sm:$0xff] }
  0xb9   : > { %957 = vmatpush1.bf16.msra.mxu0 %v794_v5  ;;  %v308_v5 = vld [vmem:[#allocation2 + $0x60] sm:$0xff]  ;;  %v822_v40 = vpack.c.bf16 %v530_v30, %v526_v25  ;;  %v547_v51 = vld [vmem:[%s3787_s15 + $0x628] sm:$0xff]  ;;  %v545_v53 = vld [vmem:[%s3787_s15 + $0x618] sm:$0xff] }
  0xba   : > { %1146 = vmatpush1.bf16.msra.mxu1 %v796_v8  ;;  %989 = vmatprep.subr.bf16.mxu0 %v799_v9  ;;  %v525_v8 = vld [vmem:[%s3787_s15 + $0x578] sm:$0xff]  ;;  %v338_v9 = vpack.c.bf16 %v314_v6, %v308_v5  ;;  %v534_v41 = vld [vmem:[%s3787_s15 + $0x5c0] sm:$0xff]  ;;  %v544_v60 = vld [vmem:[%s3787_s15 + $0x610] sm:$0xff] }
  0xbb   : > { %1178 = vmatprep.subr.bf16.mxu1 %v801_v13  ;;  %v819_v13 = vpack.c.bf16 %v523_v4, %v519_v1  ;;  %v538_v42 = vld [vmem:[%s3787_s15 + $0x5e0] sm:$0xff]  ;;  %v549_v54 = vld [vmem:[%s3787_s15 + $0x638] sm:$0xff]  ;;  %v551_v63 = vld [vmem:[%s3787_s15 + $0x648] sm:$0xff] }
  0xbc   : > { %959 = vmatmul.mubr.bf16.vlgmr.msra.gmra.mrb[0].mxu0 %v332_v17  ;;  %v826_v55 = vpack.c.bf16 %v538_v42, %v534_v41  ;;  %v542_v58 = vld [vmem:[%s3787_s15 + $0x600] sm:$0xff]  ;;  %v555_v0 = vld [vmem:[%s3787_s15 + $0x668] sm:$0xff]  ;;  %v553_v1 = vld [vmem:[%s3787_s15 + $0x658] sm:$0xff] }
  0xbd   : > { %990 = vmatpush1.bf16.msra.mxu0 %v798_v20  ;;  %1148 = vmatmul.mubr.bf16.vlgmr.msra.gmra.mrb[0].mxu1 %v332_v17  ;;  %v821_v17 = vpack.c.bf16 %v525_v8, %v521_v7  ;;  %v321_v20 = vld [vmem:[#allocation2 + $0xc8] sm:$0xff]  ;;  %v546_v59 = vld [vmem:[%s3787_s15 + $0x620] sm:$0xff]  ;;  %v835_v5 = vpack.c.bf16 %v555_v0, %v551_v63  ;;  %v552_v8 = vld [vmem:[%s3787_s15 + $0x650] sm:$0xff] }
  0xbe   : > { %1179 = vmatpush1.bf16.msra.mxu1 %v800_v21  ;;  %991 = vmatprep.subr.bf16.mxu0 %v803_v22  ;;  %v529_v21 = vld [vmem:[%s3787_s15 + $0x598] sm:$0xff]  ;;  %v550_v6 = vld [vmem:[%s3787_s15 + $0x640] sm:$0xff]  ;;  %v559_v11 = vld [vmem:[%s3787_s15 + $0x688] sm:$0xff] }
  0xbf   : > { %1180 = vmatprep.subr.bf16.mxu1 %v805_v26  ;;  %968 = vmatprep.mubr.bf16.mxu0 %v339_v2  ;;  %v533_v22 = vld [vmem:[%s3787_s15 + $0x5b8] sm:$0xff]  ;;  %v345_v26 = vpack.c.bf16 %v327_v23, %v321_v20  ;;  %v554_v7 = vld [vmem:[%s3787_s15 + $0x660] sm:$0xff]  ;;  %v560_v20 = vld [vmem:[%s3787_s15 + $0x690] sm:$0xff] }
  0xc0   : > { %1157 = vmatprep.mubr.bf16.mxu1 %v339_v2  ;;  %v557_v2 = vld [vmem:[%s3787_s15 + $0x678] sm:$0xff]  ;;  %v834_v15 = vpack.c.bf16 %v554_v7, %v550_v6  ;;  %v558_v18 = vld [vmem:[%s3787_s15 + $0x680] sm:$0xff]  ;;  %v567_v23 = vld [vmem:[%s3787_s15 + $0x6c8] sm:$0xff] }
  0xc1   : > { %992 = vmatpush1.bf16.msra.mxu0 %v802_v32  ;;  %v326_v32 = vld [vmem:[#allocation2 + $0xf0] sm:$0xff]  ;;  %v565_v14 = vld [vmem:[%s3787_s15 + $0x6b8] sm:$0xff]  ;;  %v562_v19 = vld [vmem:[%s3787_s15 + $0x6a0] sm:$0xff] }
  0xc2   : > { %1181 = vmatpush1.bf16.msra.mxu1 %v804_v33  ;;  %993 = vmatprep.subr.bf16.mxu0 %v807_v34  ;;  %v825_v33 = vpack.c.bf16 %v533_v22, %v529_v21  ;;  %v532_v34 = vld [vmem:[%s3787_s15 + $0x5b0] sm:$0xff]  ;;  %v344_v37 = vpack.c.bf16 %v326_v32, %v320_v27  ;;  %v569_v25 = vld [vmem:[%s3787_s15 + $0x6d8] sm:$0xff]  ;;  %v838_v27 = vpack.c.bf16 %v562_v19, %v558_v18  ;;  %v566_v30 = vld [vmem:[%s3787_s15 + $0x6c0] sm:$0xff] }
  0xc3   : > { %1182 = vmatprep.subr.bf16.mxu1 %v809_v38  ;;  %v537_v38 = vld [vmem:[%s3787_s15 + $0x5d8] sm:$0xff]  ;;  %v824_v43 = vpack.c.bf16 %v532_v34, %v528_v31  ;;  %v564_v22 = vld [vmem:[%s3787_s15 + $0x6b0] sm:$0xff]  ;;  %v570_v31 = vld [vmem:[%s3787_s15 + $0x6e0] sm:$0xff] }
  0xc4   : > { %969 = vmatmul.mubr.bf16.gmra.mrb[4].mxu0 %v338_v9  ;;  %v829_v48 = vpack.c.bf16 %v541_v39, %v537_v38  ;;  %v568_v32 = vld [vmem:[%s3787_s15 + $0x6d0] sm:$0xff]  ;;  %v581_v38 = vld [vmem:[%s3787_s15 + $0x738] sm:$0xff]  ;;  %v842_v39 = vpack.c.bf16 %v570_v31, %v566_v30  ;;  %v574_v42 = vld [vmem:[%s3787_s15 + $0x700] sm:$0xff] }
  0xc5   : > { %994 = vmatpush1.bf16.msra.mxu0 %v806_v44  ;;  %1158 = vmatmul.mubr.bf16.gmra.mrb[4].mxu1 %v338_v9  ;;  %v827_v44 = vpack.c.bf16 %v539_v36, %v535_v35  ;;  %v837_v9 = vpack.c.bf16 %v557_v2, %v553_v1  ;;  %v572_v34 = vld [vmem:[%s3787_s15 + $0x6f0] sm:$0xff]  ;;  %v575_v35 = vld [vmem:[%s3787_s15 + $0x708] sm:$0xff]  ;;  %v590_v2 = vld [vmem:[%s3787_s15 + $0x780] sm:$0xff] }
  0xc6   : > { %1183 = vmatpush1.bf16.msra.mxu1 %v808_v45  ;;  %995 = vmatprep.subr.bf16.mxu0 %v811_v46  ;;  %v536_v45 = vld [vmem:[%s3787_s15 + $0x5d0] sm:$0xff]  ;;  %v299_v46 = vld [vmem:[#allocation2 + $0x18] sm:$0xff]  ;;  %v579_v36 = vld [vmem:[%s3787_s15 + $0x728] sm:$0xff] }
  0xc7   : > { %1184 = vmatprep.subr.bf16.mxu1 %v813_v50  ;;  %978 = vmatprep.mubr.bf16.mxu0 %v345_v26  ;;  %v543_v50 = vld [vmem:[%s3787_s15 + $0x608] sm:$0xff]  ;;  %v335_v52 = vpack.c.bf16 %v305_v47, %v299_v46  ;;  %v828_v56 = vpack.c.bf16 %v540_v49, %v536_v45  ;;  %v847_v41 = vpack.c.bf16 %v579_v36, %v575_v35  ;;  %v580_v46 = vld [vmem:[%s3787_s15 + $0x730] sm:$0xff]  ;;  %v585_v49 = vld [vmem:[%s3787_s15 + $0x758] sm:$0xff] }
  0xc8   : > { %1167 = vmatprep.mubr.bf16.mxu1 %v345_v26  ;;  %v573_v26 = vld [vmem:[%s3787_s15 + $0x6f8] sm:$0xff]  ;;  %v583_v47 = vld [vmem:[%s3787_s15 + $0x748] sm:$0xff]  ;;  %v596_v6 = vld [vmem:[%s3787_s15 + $0x7b0] sm:$0xff] }
  0xc9   : > { %996 = vmatpush1.bf16.msra.mxu0 %v810_v57  ;;  %v831_v57 = vpack.c.bf16 %v547_v51, %v543_v50  ;;  %v589_v50 = vld [vmem:[%s3787_s15 + $0x778] sm:$0xff]  ;;  %v599_v7 = vld [vmem:[%s3787_s15 + $0x7c8] sm:$0xff]  ;;  %v604_v18 = vld [vmem:[%s3787_s15 + $0x7f0] sm:$0xff] }
  0xca   : > { %1185 = vmatpush1.bf16.msra.mxu1 %v812_v61  ;;  %997 = vmatprep.subr.bf16.mxu0 %v815_v62  ;;  %v833_v61 = vpack.c.bf16 %v549_v54, %v545_v53  ;;  %v548_v62 = vld [vmem:[%s3787_s15 + $0x630] sm:$0xff]  ;;  %v582_v54 = vld [vmem:[%s3787_s15 + $0x740] sm:$0xff]  ;;  %v607_v19 = vld [vmem:[%s3787_s15 + $0x808] sm:$0xff] }
  0xcb   : > { %1186 = vmatprep.subr.bf16.mxu1 %v817_v3  ;;  %v830_v3 = vpack.c.bf16 %v546_v59, %v542_v58  ;;  %v832_v4 = vpack.c.bf16 %v548_v62, %v544_v60  ;;  %v588_v58 = vld [vmem:[%s3787_s15 + $0x770] sm:$0xff]  ;;  %v591_v59 = vld [vmem:[%s3787_s15 + $0x788] sm:$0xff]  ;;  %v597_v62 = vld [vmem:[%s3787_s15 + $0x7b8] sm:$0xff] }
  0xcc   : > { %979 = vmatmul.mubr.bf16.gmra.mrb[8].mxu0 %v344_v37  ;;  %v595_v60 = vld [vmem:[%s3787_s15 + $0x7a8] sm:$0xff]  ;;  %v608_v30 = vld [vmem:[%s3787_s15 + $0x810] sm:$0xff]  ;;  %v617_v35 = vld [vmem:[%s3787_s15 + $0x858] sm:$0xff] }
  0xcd   : > { %998 = vmatpush1.bf16.msra.mxu0 %v814_v10  ;;  %1168 = vmatmul.mubr.bf16.gmra.mrb[8].mxu1 %v344_v37  ;;  %v556_v10 = vld [vmem:[%s3787_s15 + $0x670] sm:$0xff]  ;;  %v577_v37 = vld [vmem:[%s3787_s15 + $0x718] sm:$0xff]  ;;  %v855_v1 = vpack.c.bf16 %v595_v60, %v591_v59  ;;  %v626_v59 = vld [vmem:[%s3787_s15 + $0x8a0] sm:$0xff] }
  0xce   : > { %1187 = vmatpush1.bf16.msra.mxu1 %v816_v12  ;;  %999 = vmatprep.subr.bf16.mxu0 %v819_v13  ;;  %v563_v12 = vld [vmem:[%s3787_s15 + $0x6a8] sm:$0xff]  ;;  %v561_v13 = vld [vmem:[%s3787_s15 + $0x698] sm:$0xff]  ;;  %v836_v16 = vpack.c.bf16 %v556_v10, %v552_v8  ;;  %v849_v45 = vpack.c.bf16 %v581_v38, %v577_v37  ;;  %v612_v31 = vld [vmem:[%s3787_s15 + $0x830] sm:$0xff] }
  0xcf   : > { %1188 = vmatprep.subr.bf16.mxu1 %v821_v17  ;;  %1021 = vmatprep.mubr.bf16.mxu0 %v335_v52  ;;  %v839_v17 = vpack.c.bf16 %v563_v12, %v559_v11  ;;  %v841_v21 = vpack.c.bf16 %v565_v14, %v561_v13  ;;  %v603_v8 = vld [vmem:[%s3787_s15 + $0x7e8] sm:$0xff]  ;;  %v605_v10 = vld [vmem:[%s3787_s15 + $0x7f8] sm:$0xff]  ;;  %v598_v14 = vld [vmem:[%s3787_s15 + $0x7c0] sm:$0xff] }
  0xd0   : > { %1210 = vmatprep.mubr.bf16.mxu1 %v335_v52  ;;  %v859_v13 = vpack.c.bf16 %v603_v8, %v599_v7  ;;  %v621_v37 = vld [vmem:[%s3787_s15 + $0x878] sm:$0xff]  ;;  %v624_v60 = vld [vmem:[%s3787_s15 + $0x890] sm:$0xff] }
  0xd1   : > { %1000 = vmatpush1.bf16.msra.mxu0 %v818_v24  ;;  %v571_v24 = vld [vmem:[%s3787_s15 + $0x6e8] sm:$0xff]  ;;  %v311_v38 = vld [vmem:[#allocation2 + $0x78] sm:$0xff] }
  0xd2   : > { %1189 = vmatpush1.bf16.msra.mxu1 %v820_v28  ;;  %1001 = vmatprep.subr.bf16.mxu0 %v823_v29  ;;  %v840_v28 = vpack.c.bf16 %v564_v22, %v560_v20  ;;  %v843_v29 = vpack.c.bf16 %v571_v24, %v567_v23  ;;  %v611_v20 = vld [vmem:[%s3787_s15 + $0x828] sm:$0xff]  ;;  %v613_v22 = vld [vmem:[%s3787_s15 + $0x838] sm:$0xff]  ;;  %v298_v24 = vld [vmem:[#allocation2 + $0x10] sm:$0xff] }
  0xd3   : > { %1190 = vmatprep.subr.bf16.mxu1 %v825_v33  ;;  %v845_v33 = vpack.c.bf16 %v573_v26, %v569_v25  ;;  %v304_v25 = vld [vmem:[#allocation2 + $0x40] sm:$0xff] }
  0xd4   : > { %v606_v26 = vld [vmem:[%s3787_s15 + $0x800] sm:$0xff]  ;;  %v334_v36 = vpack.c.bf16 %v304_v25, %v298_v24 }
  0xd5   : > { %1002 = vmatpush1.bf16.msra.mxu0 %v822_v40  ;;  %v844_v40 = vpack.c.bf16 %v572_v34, %v568_v32  ;;  %v619_v34 = vld [vmem:[%s3787_s15 + $0x868] sm:$0xff]  ;;  %v642_v25 = vld [vmem:[%s3787_s15 + $0x920] sm:$0xff] }
  0xd6   : > { %1191 = vmatpush1.bf16.msra.mxu1 %v824_v43  ;;  %1003 = vmatprep.subr.bf16.mxu0 %v827_v44  ;;  %v578_v43 = vld [vmem:[%s3787_s15 + $0x720] sm:$0xff]  ;;  %v576_v44 = vld [vmem:[%s3787_s15 + $0x710] sm:$0xff] }
  0xd7   : > { %1192 = vmatprep.subr.bf16.mxu1 %v829_v48  ;;  %v587_v48 = vld [vmem:[%s3787_s15 + $0x768] sm:$0xff]  ;;  %v846_v51 = vpack.c.bf16 %v578_v43, %v574_v42  ;;  %v848_v52 = vpack.c.bf16 %v580_v46, %v576_v44  ;;  %v614_v43 = vld [vmem:[%s3787_s15 + $0x840] sm:$0xff]  ;;  %v869_v46 = vpack.c.bf16 %v621_v37, %v617_v35  ;;  %v307_v35 = vld [vmem:[#allocation2 + $0x58] sm:$0xff] }
  0xd8   : > { %v851_v53 = vpack.c.bf16 %v587_v48, %v583_v47  ;;  %v618_v44 = vld [vmem:[%s3787_s15 + $0x860] sm:$0xff]  ;;  %v620_v47 = vld [vmem:[%s3787_s15 + $0x870] sm:$0xff]  ;;  %v623_v48 = vld [vmem:[%s3787_s15 + $0x888] sm:$0xff] }
  0xd9   : > { %1004 = vmatpush1.bf16.msra.mxu0 %v826_v55  ;;  %v586_v55 = vld [vmem:[%s3787_s15 + $0x760] sm:$0xff] }
  0xda   : > { %1193 = vmatpush1.bf16.msra.mxu1 %v828_v56  ;;  %1005 = vmatprep.subr.bf16.mxu0 %v831_v57  ;;  %v584_v56 = vld [vmem:[%s3787_s15 + $0x750] sm:$0xff]  ;;  %v853_v57 = vpack.c.bf16 %v589_v50, %v585_v49  ;;  %v850_v63 = vpack.c.bf16 %v586_v55, %v582_v54  ;;  %v627_v49 = vld [vmem:[%s3787_s15 + $0x8a8] sm:$0xff]  ;;  %v622_v54 = vld [vmem:[%s3787_s15 + $0x880] sm:$0xff] }
  0xdb   : > { %1194 = vmatprep.subr.bf16.mxu1 %v833_v61  ;;  %v593_v61 = vld [vmem:[%s3787_s15 + $0x798] sm:$0xff]  ;;  %v852_v0 = vpack.c.bf16 %v588_v58, %v584_v56  ;;  %v310_v55 = vld [vmem:[#allocation2 + $0x70] sm:$0xff]  ;;  %v316_v56 = vld [vmem:[#allocation2 + $0xa0] sm:$0xff]  ;;  %v871_v58 = vpack.c.bf16 %v627_v49, %v623_v48 }
  0xdc   : > { %v661_v48 = vld [vmem:[%s3787_s15 + $0x9b8] sm:$0xff] }
  0xdd   : > { %1006 = vmatpush1.bf16.msra.mxu0 %v830_v3  ;;  %v594_v3 = vld [vmem:[%s3787_s15 + $0x7a0] sm:$0xff] }
  0xde   : > { %1195 = vmatpush1.bf16.msra.mxu1 %v832_v4  ;;  %1007 = vmatprep.subr.bf16.mxu0 %v835_v5  ;;  %v592_v4 = vld [vmem:[%s3787_s15 + $0x790] sm:$0xff]  ;;  %v857_v5 = vpack.c.bf16 %v597_v62, %v593_v61  ;;  %v854_v11 = vpack.c.bf16 %v594_v3, %v590_v2  ;;  %v637_v2 = vld [vmem:[%s3787_s15 + $0x8f8] sm:$0xff]  ;;  %v340_v3 = vpack.c.bf16 %v316_v56, %v310_v55 }
  0xdf   : > { %1196 = vmatprep.subr.bf16.mxu1 %v837_v9  ;;  %v601_v9 = vld [vmem:[%s3787_s15 + $0x7d8] sm:$0xff]  ;;  %v856_v12 = vpack.c.bf16 %v596_v6, %v592_v4  ;;  %v628_v61 = vld [vmem:[%s3787_s15 + $0x8b0] sm:$0xff]  ;;  %v870_v6 = vpack.c.bf16 %v626_v59, %v622_v54 }
  0xe0   : > { %v323_v4 = vld [vmem:[#allocation2 + $0xd8] sm:$0xff]  ;;  %v872_v7 = vpack.c.bf16 %v628_v61, %v624_v60  ;;  %v656_v54 = vld [vmem:[%s3787_s15 + $0x990] sm:$0xff] }
  0xe1   : > { %1008 = vmatpush1.bf16.msra.mxu0 %v834_v15  ;;  %v602_v15 = vld [vmem:[%s3787_s15 + $0x7e0] sm:$0xff]  ;;  %v660_v56 = vld [vmem:[%s3787_s15 + $0x9b0] sm:$0xff]  ;;  %v665_v59 = vld [vmem:[%s3787_s15 + $0x9d8] sm:$0xff] }
  0xe2   : > { %1197 = vmatpush1.bf16.msra.mxu1 %v836_v16  ;;  %1009 = vmatprep.subr.bf16.mxu0 %v839_v17  ;;  %v600_v16 = vld [vmem:[%s3787_s15 + $0x7d0] sm:$0xff]  ;;  %v861_v17 = vpack.c.bf16 %v605_v10, %v601_v9  ;;  %v858_v23 = vpack.c.bf16 %v602_v15, %v598_v14  ;;  %v630_v9 = vld [vmem:[%s3787_s15 + $0x8c0] sm:$0xff]  ;;  %v639_v14 = vld [vmem:[%s3787_s15 + $0x908] sm:$0xff] }
  0xe3   : > { %1198 = vmatprep.subr.bf16.mxu1 %v841_v21  ;;  %v609_v21 = vld [vmem:[%s3787_s15 + $0x818] sm:$0xff]  ;;  %v634_v10 = vld [vmem:[%s3787_s15 + $0x8e0] sm:$0xff]  ;;  %v643_v15 = vld [vmem:[%s3787_s15 + $0x928] sm:$0xff] }
  0xe4   : > { %v865_v32 = vpack.c.bf16 %v613_v22, %v609_v21  ;;  %v322_v21 = vld [vmem:[#allocation2 + $0xd0] sm:$0xff]  ;;  %v328_v22 = vld [vmem:[#allocation2 + $0x100] sm:$0xff]  ;;  %v879_v24 = vpack.c.bf16 %v643_v15, %v639_v14  ;;  %v669_v60 = vld [vmem:[%s3787_s15 + $0x9f8] sm:$0xff] }
  0xe5   : > { %1010 = vmatpush1.bf16.msra.mxu0 %v838_v27  ;;  %v860_v27 = vpack.c.bf16 %v604_v18, %v600_v16  ;;  %v645_v18 = vld [vmem:[%s3787_s15 + $0x938] sm:$0xff]  ;;  %v672_v14 = vld [vmem:[%s3787_s15 + $0xa10] sm:$0xff] }
  0xe6   : > { %1199 = vmatpush1.bf16.msra.mxu1 %v840_v28  ;;  %1011 = vmatprep.subr.bf16.mxu0 %v843_v29  ;;  %v863_v28 = vpack.c.bf16 %v611_v20, %v607_v19  ;;  %v610_v29 = vld [vmem:[%s3787_s15 + $0x820] sm:$0xff]  ;;  %v874_v19 = vpack.c.bf16 %v634_v10, %v630_v9 }
  0xe7   : > { %1200 = vmatprep.subr.bf16.mxu1 %v845_v33  ;;  %v615_v33 = vld [vmem:[%s3787_s15 + $0x848] sm:$0xff]  ;;  %v638_v20 = vld [vmem:[%s3787_s15 + $0x900] sm:$0xff] }
  0xe8   : > { %v867_v42 = vpack.c.bf16 %v619_v34, %v615_v33  ;;  %v346_v33 = vpack.c.bf16 %v328_v22, %v322_v21  ;;  %v301_v34 = vld [vmem:[#allocation2 + $0x28] sm:$0xff] }
  0xe9   : > { %1012 = vmatpush1.bf16.msra.mxu0 %v842_v39  ;;  %v317_v39 = vld [vmem:[#allocation2 + $0xa8] sm:$0xff] }
  0xea   : > { %1201 = vmatpush1.bf16.msra.mxu1 %v844_v40  ;;  %1013 = vmatprep.subr.bf16.mxu0 %v847_v41  ;;  %v862_v40 = vpack.c.bf16 %v610_v29, %v606_v26  ;;  %v864_v41 = vpack.c.bf16 %v612_v31, %v608_v30  ;;  %v341_v50 = vpack.c.bf16 %v317_v39, %v311_v38  ;;  %v640_v26 = vld [vmem:[%s3787_s15 + $0x910] sm:$0xff]  ;;  %v647_v29 = vld [vmem:[%s3787_s15 + $0x948] sm:$0xff]  ;;  %v649_v31 = vld [vmem:[%s3787_s15 + $0x958] sm:$0xff] }
  0xeb   : > { %1202 = vmatprep.subr.bf16.mxu1 %v849_v45  ;;  %v616_v45 = vld [vmem:[%s3787_s15 + $0x850] sm:$0xff]  ;;  %v651_v30 = vld [vmem:[%s3787_s15 + $0x968] sm:$0xff]  ;;  %v646_v39 = vld [vmem:[%s3787_s15 + $0x940] sm:$0xff] }
  0xec   : > { %v883_v38 = vpack.c.bf16 %v651_v30, %v647_v29  ;;  %v687_v29 = vld [vmem:[%s3787_s15 + $0xa88] sm:$0xff] }
  0xed   : > { %1014 = vmatpush1.bf16.msra.mxu0 %v846_v51  ;;  %v625_v51 = vld [vmem:[%s3787_s15 + $0x898] sm:$0xff]  ;;  %v691_v30 = vld [vmem:[%s3787_s15 + $0xaa8] sm:$0xff] }
  0xee   : > { %1203 = vmatpush1.bf16.msra.mxu1 %v848_v52  ;;  %1015 = vmatprep.subr.bf16.mxu0 %v851_v53  ;;  %v629_v52 = vld [vmem:[%s3787_s15 + $0x8b8] sm:$0xff]  ;;  %v866_v53 = vpack.c.bf16 %v618_v44, %v614_v43  ;;  %v652_v43 = vld [vmem:[%s3787_s15 + $0x970] sm:$0xff]  ;;  %v655_v44 = vld [vmem:[%s3787_s15 + $0x988] sm:$0xff] }
  0xef   : > { %1204 = vmatprep.subr.bf16.mxu1 %v853_v57  ;;  %v868_v57 = vpack.c.bf16 %v620_v47, %v616_v45  ;;  %v873_v62 = vpack.c.bf16 %v629_v52, %v625_v51  ;;  %v659_v45 = vld [vmem:[%s3787_s15 + $0x9a8] sm:$0xff]  ;;  %v657_v47 = vld [vmem:[%s3787_s15 + $0x998] sm:$0xff]  ;;  %v654_v52 = vld [vmem:[%s3787_s15 + $0x980] sm:$0xff] }
  0xf0   : > { %v887_v51 = vpack.c.bf16 %v659_v45, %v655_v44  ;;  %v889_v55 = vpack.c.bf16 %v661_v48, %v657_v47  ;;  %v701_v44 = vld [vmem:[%s3787_s15 + $0xaf8] sm:$0xff]  ;;  %v694_v48 = vld [vmem:[%s3787_s15 + $0xac0] sm:$0xff] }
  0xf1   : > { %1016 = vmatpush1.bf16.msra.mxu0 %v850_v63  ;;  %v631_v63 = vld [vmem:[%s3787_s15 + $0x8c8] sm:$0xff] }
  0xf2   : > { %1205 = vmatpush1.bf16.msra.mxu1 %v852_v0  ;;  %1017 = vmatprep.subr.bf16.mxu0 %v855_v1  ;;  %v635_v0 = vld [vmem:[%s3787_s15 + $0x8e8] sm:$0xff]  ;;  %v633_v1 = vld [vmem:[%s3787_s15 + $0x8d8] sm:$0xff] }
  0xf3   : > { %1206 = vmatprep.subr.bf16.mxu1 %v857_v5  ;;  %v329_v5 = vld [vmem:[#allocation2 + $0x108] sm:$0xff]  ;;  %v875_v8 = vpack.c.bf16 %v635_v0, %v631_v63  ;;  %v662_v0 = vld [vmem:[%s3787_s15 + $0x9c0] sm:$0xff] }
  0xf4   : > { %v347_v16 = vpack.c.bf16 %v329_v5, %v323_v4  ;;  %v668_v4 = vld [vmem:[%s3787_s15 + $0x9f0] sm:$0xff]  ;;  %v671_v5 = vld [vmem:[%s3787_s15 + $0xa08] sm:$0xff] }
  0xf5   : > { %1018 = vmatpush1.bf16.msra.mxu0 %v854_v11  ;;  %v632_v11 = vld [vmem:[%s3787_s15 + $0x8d0] sm:$0xff] }
  0xf6   : > { %1207 = vmatpush1.bf16.msra.mxu1 %v856_v12  ;;  %1019 = vmatprep.subr.bf16.mxu0 %v859_v13  ;;  %v877_v12 = vpack.c.bf16 %v637_v2, %v633_v1  ;;  %v636_v13 = vld [vmem:[%s3787_s15 + $0x8f0] sm:$0xff]  ;;  %v666_v1 = vld [vmem:[%s3787_s15 + $0x9e0] sm:$0xff] }
  0xf7   : > { %1208 = vmatprep.subr.bf16.mxu1 %v861_v17  ;;  %v641_v17 = vld [vmem:[%s3787_s15 + $0x918] sm:$0xff]  ;;  %v664_v2 = vld [vmem:[%s3787_s15 + $0x9d0] sm:$0xff]  ;;  %v890_v9 = vpack.c.bf16 %v666_v1, %v662_v0  ;;  %v711_v1 = vld [vmem:[%s3787_s15 + $0xb48] sm:$0xff] }
  0xf8   : > { %v892_v10 = vpack.c.bf16 %v668_v4, %v664_v2  ;;  %v708_v0 = vld [vmem:[%s3787_s15 + $0xb30] sm:$0xff]  ;;  %v715_v2 = vld [vmem:[%s3787_s15 + $0xb68] sm:$0xff]  ;;  %v717_v4 = vld [vmem:[%s3787_s15 + $0xb78] sm:$0xff] }
  0xf9   : > { %1020 = vmatpush1.bf16.msra.mxu0 %v858_v23  ;;  %v876_v23 = vpack.c.bf16 %v636_v13, %v632_v11  ;;  %v674_v13 = vld [vmem:[%s3787_s15 + $0xa20] sm:$0xff] }
  0xfa   : > { %1209 = vmatpush1.bf16.msra.mxu1 %v860_v27  ;;  %1052 = vmatprep.subr.bf16.mxu0 %v863_v28  ;;  %v644_v27 = vld [vmem:[%s3787_s15 + $0x930] sm:$0xff]  ;;  %v881_v28 = vpack.c.bf16 %v645_v18, %v641_v17  ;;  %v679_v17 = vld [vmem:[%s3787_s15 + $0xa48] sm:$0xff] }
  0xfb   : > { %1241 = vmatprep.subr.bf16.mxu1 %v865_v32  ;;  %v653_v32 = vld [vmem:[%s3787_s15 + $0x978] sm:$0xff]  ;;  %v880_v37 = vpack.c.bf16 %v644_v27, %v640_v26  ;;  %v683_v18 = vld [vmem:[%s3787_s15 + $0xa68] sm:$0xff]  ;;  %v680_v26 = vld [vmem:[%s3787_s15 + $0xa50] sm:$0xff] }
  0xfc   : > { %1022 = vmatmul.mubr.bf16.vlgmr.msra.gmra.mrb[0].mxu0 %v334_v36 }
  0xfd   : > { %1053 = vmatpush1.bf16.msra.mxu0 %v862_v40  ;;  %1211 = vmatmul.mubr.bf16.vlgmr.msra.gmra.mrb[0].mxu1 %v334_v36  ;;  %v878_v36 = vpack.c.bf16 %v642_v25, %v638_v20  ;;  %v650_v40 = vld [vmem:[%s3787_s15 + $0x960] sm:$0xff]  ;;  %v685_v20 = vld [vmem:[%s3787_s15 + $0xa78] sm:$0xff] }
  0xfe   : > { %1242 = vmatpush1.bf16.msra.mxu1 %v864_v41  ;;  %1054 = vmatprep.subr.bf16.mxu0 %v867_v42  ;;  %v648_v41 = vld [vmem:[%s3787_s15 + $0x950] sm:$0xff]  ;;  %v885_v42 = vpack.c.bf16 %v653_v32, %v649_v31  ;;  %v882_v49 = vpack.c.bf16 %v650_v40, %v646_v39  ;;  %v682_v25 = vld [vmem:[%s3787_s15 + $0xa60] sm:$0xff]  ;;  %v689_v31 = vld [vmem:[%s3787_s15 + $0xa98] sm:$0xff] }
  0xff   : > { %1243 = vmatprep.subr.bf16.mxu1 %v869_v46  ;;  %1031 = vmatprep.mubr.bf16.mxu0 %v341_v50  ;;  %v337_v46 = vpack.c.bf16 %v307_v35, %v301_v34  ;;  %v693_v32 = vld [vmem:[%s3787_s15 + $0xab8] sm:$0xff]  ;;  %v903_v35 = vpack.c.bf16 %v691_v30, %v687_v29  ;;  %v692_v40 = vld [vmem:[%s3787_s15 + $0xab0] sm:$0xff] }
 0x100   : > { %1220 = vmatprep.mubr.bf16.mxu1 %v341_v50  ;;  %v884_v50 = vpack.c.bf16 %v652_v43, %v648_v41  ;;  %v905_v39 = vpack.c.bf16 %v693_v32, %v689_v31  ;;  %v695_v41 = vld [vmem:[%s3787_s15 + $0xac8] sm:$0xff]  ;;  %v697_v43 = vld [vmem:[%s3787_s15 + $0xad8] sm:$0xff]  ;;  %v726_v32 = vld [vmem:[%s3787_s15 + $0xbc0] sm:$0xff] }
 0x101   : > { %1055 = vmatpush1.bf16.msra.mxu0 %v866_v53  ;;  %v658_v53 = vld [vmem:[%s3787_s15 + $0x9a0] sm:$0xff] }
 0x102   : > { %1244 = vmatpush1.bf16.msra.mxu1 %v868_v57  ;;  %1056 = vmatprep.subr.bf16.mxu0 %v871_v58  ;;  %v663_v57 = vld [vmem:[%s3787_s15 + $0x9c8] sm:$0xff]  ;;  %v886_v61 = vpack.c.bf16 %v658_v53, %v654_v52  ;;  %v700_v52 = vld [vmem:[%s3787_s15 + $0xaf0] sm:$0xff] }
 0x103   : > { %1245 = vmatprep.subr.bf16.mxu1 %v873_v62  ;;  %v667_v58 = vld [vmem:[%s3787_s15 + $0x9e8] sm:$0xff]  ;;  %v888_v62 = vpack.c.bf16 %v660_v56, %v656_v54  ;;  %v709_v56 = vld [vmem:[%s3787_s15 + $0xb38] sm:$0xff] }
 0x104   : > { %1032 = vmatmul.mubr.bf16.gmra.mrb[4].mxu0 %v340_v3  ;;  %v891_v63 = vpack.c.bf16 %v667_v58, %v663_v57  ;;  %v703_v53 = vld [vmem:[%s3787_s15 + $0xb08] sm:$0xff] }
 0x105   : > { %1057 = vmatpush1.bf16.msra.mxu0 %v870_v6  ;;  %1221 = vmatmul.mubr.bf16.gmra.mrb[4].mxu1 %v340_v3  ;;  %v893_v3 = vpack.c.bf16 %v669_v60, %v665_v59  ;;  %v675_v6 = vld [vmem:[%s3787_s15 + $0xa28] sm:$0xff]  ;;  %v702_v60 = vld [vmem:[%s3787_s15 + $0xb00] sm:$0xff] }
 0x106   : > { %1246 = vmatpush1.bf16.msra.mxu1 %v872_v7  ;;  %1058 = vmatprep.subr.bf16.mxu0 %v875_v8  ;;  %v673_v7 = vld [vmem:[%s3787_s15 + $0xa18] sm:$0xff]  ;;  %v895_v11 = vpack.c.bf16 %v675_v6, %v671_v5  ;;  %v707_v54 = vld [vmem:[%s3787_s15 + $0xb28] sm:$0xff] }
 0x107   : > { %1247 = vmatprep.subr.bf16.mxu1 %v877_v12  ;;  %1041 = vmatprep.mubr.bf16.mxu0 %v347_v16  ;;  %v677_v8 = vld [vmem:[%s3787_s15 + $0xa38] sm:$0xff]  ;;  %v670_v12 = vld [vmem:[%s3787_s15 + $0xa00] sm:$0xff]  ;;  %v911_v59 = vpack.c.bf16 %v707_v54, %v703_v53 }
 0x108   : > { %1230 = vmatprep.mubr.bf16.mxu1 %v347_v16  ;;  %v897_v15 = vpack.c.bf16 %v677_v8, %v673_v7  ;;  %v676_v16 = vld [vmem:[%s3787_s15 + $0xa30] sm:$0xff]  ;;  %v894_v21 = vpack.c.bf16 %v674_v13, %v670_v12  ;;  %v915_v7 = vpack.c.bf16 %v715_v2, %v711_v1  ;;  %v710_v8 = vld [vmem:[%s3787_s15 + $0xb40] sm:$0xff]  ;;  %v719_v13 = vld [vmem:[%s3787_s15 + $0xb88] sm:$0xff] }
 0x109   : > { %1059 = vmatpush1.bf16.msra.mxu0 %v874_v19  ;;  %v681_v19 = vld [vmem:[%s3787_s15 + $0xa58] sm:$0xff]  ;;  %v896_v22 = vpack.c.bf16 %v676_v16, %v672_v14  ;;  %v716_v12 = vld [vmem:[%s3787_s15 + $0xb70] sm:$0xff]  ;;  %v723_v14 = vld [vmem:[%s3787_s15 + $0xba8] sm:$0xff] }
 0x10a   : > { %1248 = vmatpush1.bf16.msra.mxu1 %v876_v23  ;;  %1060 = vmatprep.subr.bf16.mxu0 %v879_v24  ;;  %v899_v23 = vpack.c.bf16 %v683_v18, %v679_v17  ;;  %v678_v24 = vld [vmem:[%s3787_s15 + $0xa40] sm:$0xff]  ;;  %v901_v27 = vpack.c.bf16 %v685_v20, %v681_v19  ;;  %v725_v16 = vld [vmem:[%s3787_s15 + $0xbb8] sm:$0xff]  ;;  %v919_v19 = vpack.c.bf16 %v723_v14, %v719_v13  ;;  %v1382_v1 = vld [vmem:[%s4733_s1 + $0x30] sm:$0xff] }
 0x10b   : > { %1249 = vmatprep.subr.bf16.mxu1 %v881_v28  ;;  %v684_v28 = vld [vmem:[%s3787_s15 + $0xa70] sm:$0xff]  ;;  %v718_v20 = vld [vmem:[%s3787_s15 + $0xb80] sm:$0xff]  ;;  %v1383_v2 = vld [vmem:[%s4733_s1 + $0x38] sm:$0xff] }
 0x10c   : > { %1042 = vmatmul.mubr.bf16.gmra.mrb[8].mxu0 %v346_v33  ;;  %v900_v34 = vpack.c.bf16 %v684_v28, %v680_v26  ;;  %v731_v26 = vld [vmem:[%s3787_s15 + $0xbe8] sm:$0xff]  ;;  %v733_v28 = vld [vmem:[%s3787_s15 + $0xbf8] sm:$0xff]  ;;  %v1394_v13 = vld [vmem:[%s4733_s1 + $0x90] sm:$0xff] }
 0x10d   : > { %1061 = vmatpush1.bf16.msra.mxu0 %v878_v36  ;;  %1231 = vmatmul.mubr.bf16.gmra.mrb[8].mxu1 %v346_v33  ;;  %v898_v33 = vpack.c.bf16 %v682_v25, %v678_v24  ;;  %v686_v36 = vld [vmem:[%s3787_s15 + $0xa80] sm:$0xff]  ;;  %v724_v24 = vld [vmem:[%s3787_s15 + $0xbb0] sm:$0xff]  ;;  %v727_v25 = vld [vmem:[%s3787_s15 + $0xbc8] sm:$0xff] }
 0x10e   : > { %1250 = vmatpush1.bf16.msra.mxu1 %v880_v37  ;;  %1062 = vmatprep.subr.bf16.mxu0 %v883_v38  ;;  %v690_v37 = vld [vmem:[%s3787_s15 + $0xaa0] sm:$0xff]  ;;  %v688_v38 = vld [vmem:[%s3787_s15 + $0xa90] sm:$0xff]  ;;  %v923_v31 = vpack.c.bf16 %v731_v26, %v727_v25  ;;  %v1395_v14 = vld [vmem:[%s4733_s1 + $0x98] sm:$0xff] }
 0x10f   : > { %1251 = vmatprep.subr.bf16.mxu1 %v885_v42  ;;  %1084 = vmatprep.mubr.bf16.mxu0 %v337_v46  ;;  %v699_v42 = vld [vmem:[%s3787_s15 + $0xae8] sm:$0xff]  ;;  %v902_v45 = vpack.c.bf16 %v690_v37, %v686_v36  ;;  %v732_v36 = vld [vmem:[%s3787_s15 + $0xbf0] sm:$0xff]  ;;  %v1407_v26 = vld [vmem:[%s4733_s1 + $0xf8] sm:$0xff] }
 0x110   : > { %1273 = vmatprep.mubr.bf16.mxu1 %v337_v46  ;;  %v904_v46 = vpack.c.bf16 %v692_v40, %v688_v38  ;;  %v907_v47 = vpack.c.bf16 %v699_v42, %v695_v41  ;;  %v1440_v37 = vld [vmem:[%s261_s13] sm:$0x77]  ;;  %v1441_v38 = vld [vmem:[%s261_s13 + $0x8] sm:$0x77] }
 0x111   : > { %1063 = vmatpush1.bf16.msra.mxu0 %v882_v49  ;;  %v698_v49 = vld [vmem:[%s3787_s15 + $0xae0] sm:$0xff]  ;;  %v306_v41 = vld [vmem:[#allocation2 + $0x50] sm:$0xff] }
 0x112   : > { %1252 = vmatpush1.bf16.msra.mxu1 %v884_v50  ;;  %1064 = vmatprep.subr.bf16.mxu0 %v887_v51  ;;  %v696_v50 = vld [vmem:[%s3787_s15 + $0xad0] sm:$0xff]  ;;  %v909_v51 = vpack.c.bf16 %v701_v44, %v697_v43  ;;  %v906_v57 = vpack.c.bf16 %v698_v49, %v694_v48  ;;  %v300_v40 = vld [vmem:[#allocation2 + $0x20] sm:$0xff]  ;;  %v1444_v43 = vcombine.high %v1440_v37, %v1440_v37 }
 0x113   : > { %1253 = vmatprep.subr.bf16.mxu1 %v889_v55  ;;  %v705_v55 = vld [vmem:[%s3787_s15 + $0xb18] sm:$0xff]  ;;  %v908_v58 = vpack.c.bf16 %v700_v52, %v696_v50  ;;  %v1445_v44 = vcombine.high %v1441_v38, %v1441_v38  ;;  %v312_v49 = vld [vmem:[#allocation2 + $0x80] sm:$0xff]  ;;  %v318_v50 = vld [vmem:[#allocation2 + $0xb0] sm:$0xff] }
 0x114   : > { %v331_v52 = vld [vmem:[#allocation2 + $0x118] sm:$0xff]  ;;  %v342_v53 = vpack.c.bf16 %v318_v50, %v312_v49  ;;  %v1406_v25 = vld [vmem:[%s4733_s1 + $0xf0] sm:$0xff] }
 0x115   : > { %1065 = vmatpush1.bf16.msra.mxu0 %v886_v61  ;;  %v706_v61 = vld [vmem:[%s3787_s15 + $0xb20] sm:$0xff] }
 0x116   : > { %1254 = vmatpush1.bf16.msra.mxu1 %v888_v62  ;;  %1066 = vmatprep.subr.bf16.mxu0 %v891_v63  ;;  %v704_v62 = vld [vmem:[%s3787_s15 + $0xb10] sm:$0xff]  ;;  %v913_v63 = vpack.c.bf16 %v709_v56, %v705_v55  ;;  %v910_v5 = vpack.c.bf16 %v706_v61, %v702_v60  ;;  %v324_v55 = vld [vmem:[#allocation2 + $0xe0] sm:$0xff]  ;;  %v1377_v60 = vld [vmem:[%s4733_s1 + $0x8] sm:$0xff] }
 0x117   : > { %1255 = vmatprep.subr.bf16.mxu1 %v893_v3  ;;  %v713_v3 = vld [vmem:[%s3787_s15 + $0xb58] sm:$0xff]  ;;  %v912_v6 = vpack.c.bf16 %v708_v0, %v704_v62  ;;  %v330_v56 = vld [vmem:[#allocation2 + $0x110] sm:$0xff]  ;;  %v1381_v0 = vld [vmem:[%s4733_s1 + $0x28] sm:$0xff] }
 0x118   : > { %v1378_v61 = vld [vmem:[%s4733_s1 + $0x10] sm:$0xff]  ;;  %v1379_v62 = vld [vmem:[%s4733_s1 + $0x18] sm:$0xff] }
 0x119   : > { %1067 = vmatpush1.bf16.msra.mxu0 %v890_v9  ;;  %v714_v9 = vld [vmem:[%s3787_s15 + $0xb60] sm:$0xff] }
 0x11a   : > { %1256 = vmatpush1.bf16.msra.mxu1 %v892_v10  ;;  %1068 = vmatprep.subr.bf16.mxu0 %v895_v11  ;;  %v712_v10 = vld [vmem:[%s3787_s15 + $0xb50] sm:$0xff]  ;;  %v917_v11 = vpack.c.bf16 %v717_v4, %v713_v3  ;;  %v914_v17 = vpack.c.bf16 %v714_v9, %v710_v8  ;;  %v1384_v3 = vld [vmem:[%s4733_s1 + $0x40] sm:$0xff]  ;;  %v1385_v4 = vld [vmem:[%s4733_s1 + $0x48] sm:$0xff] }
 0x11b   : > { %1257 = vmatprep.subr.bf16.mxu1 %v897_v15  ;;  %v721_v15 = vld [vmem:[%s3787_s15 + $0xb98] sm:$0xff]  ;;  %v916_v18 = vpack.c.bf16 %v716_v12, %v712_v10  ;;  %v1389_v8 = vld [vmem:[%s4733_s1 + $0x68] sm:$0xff]  ;;  %v1390_v9 = vld [vmem:[%s4733_s1 + $0x70] sm:$0xff] }
 0x11c   : > { %v1391_v10 = vld [vmem:[%s4733_s1 + $0x78] sm:$0xff]  ;;  %v1393_v12 = vld [vmem:[%s4733_s1 + $0x88] sm:$0xff] }
 0x11d   : > { %1069 = vmatpush1.bf16.msra.mxu0 %v894_v21  ;;  %v722_v21 = vld [vmem:[%s3787_s15 + $0xba0] sm:$0xff] }
 0x11e   : > { %1258 = vmatpush1.bf16.msra.mxu1 %v896_v22  ;;  %1070 = vmatprep.subr.bf16.mxu0 %v899_v23  ;;  %v720_v22 = vld [vmem:[%s3787_s15 + $0xb90] sm:$0xff]  ;;  %v921_v23 = vpack.c.bf16 %v725_v16, %v721_v15  ;;  %v918_v29 = vpack.c.bf16 %v722_v21, %v718_v20  ;;  %v1396_v15 = vld [vmem:[%s4733_s1 + $0xa0] sm:$0xff]  ;;  %v1397_v16 = vld [vmem:[%s4733_s1 + $0xa8] sm:$0xff] }
 0x11f   : > { %1259 = vmatprep.subr.bf16.mxu1 %v901_v27  ;;  %v729_v27 = vld [vmem:[%s3787_s15 + $0xbd8] sm:$0xff]  ;;  %v920_v30 = vpack.c.bf16 %v724_v24, %v720_v22  ;;  %v1401_v20 = vld [vmem:[%s4733_s1 + $0xc8] sm:$0xff]  ;;  %v1402_v21 = vld [vmem:[%s4733_s1 + $0xd0] sm:$0xff] }
 0x120   : > { %v1403_v22 = vld [vmem:[%s4733_s1 + $0xd8] sm:$0xff]  ;;  %v1405_v24 = vld [vmem:[%s4733_s1 + $0xe8] sm:$0xff] }
 0x121   : > { %1071 = vmatpush1.bf16.msra.mxu0 %v898_v33  ;;  %v730_v33 = vld [vmem:[%s3787_s15 + $0xbe0] sm:$0xff] }
 0x122   : > { %1260 = vmatpush1.bf16.msra.mxu1 %v900_v34  ;;  %1072 = vmatprep.subr.bf16.mxu0 %v903_v35  ;;  %v925_v34 = vpack.c.bf16 %v733_v28, %v729_v27  ;;  %v728_v35 = vld [vmem:[%s3787_s15 + $0xbd0] sm:$0xff]  ;;  %v1408_v27 = vld [vmem:[%s4733_s1 + $0x100] sm:$0xff]  ;;  %v1409_v28 = vld [vmem:[%s4733_s1 + $0x108] sm:$0xff] }
 0x123   : > { %1261 = vmatprep.subr.bf16.mxu1 %v905_v39  ;;  %v922_v39 = vpack.c.bf16 %v730_v33, %v726_v32  ;;  %v924_v42 = vpack.c.bf16 %v732_v36, %v728_v35  ;;  %v1413_v32 = vld [vmem:[%s4733_s1 + $0x128] sm:$0xff]  ;;  %v1414_v33 = vld [vmem:[%s4733_s1 + $0x130] sm:$0xff]  ;;  %v1416_v35 = vld [vmem:[%s4733_s1 + $0x140] sm:$0xff] }
 0x124   : > { %v1417_v36 = vld [vmem:[%s4733_s1 + $0x148] sm:$0xff] }
 0x125   : > { %1073 = vmatpush1.bf16.msra.mxu0 %v902_v45  ;;  %v313_v45 = vld [vmem:[#allocation2 + $0x88] sm:$0xff] }
 0x126   : > { %1262 = vmatpush1.bf16.msra.mxu1 %v904_v46  ;;  %1074 = vmatprep.subr.bf16.mxu0 %v907_v47  ;;  %v319_v46 = vld [vmem:[#allocation2 + $0xb8] sm:$0xff]  ;;  %v336_v47 = vpack.c.bf16 %v306_v41, %v300_v40  ;;  %v1421_v40 = vld [vmem:[%s4733_s1 + $0x168] sm:$0xff]  ;;  %v1422_v41 = vld [vmem:[%s4733_s1 + $0x170] sm:$0xff] }
 0x127   : > { %1263 = vmatprep.subr.bf16.mxu1 %v909_v51  ;;  %v343_v48 = vpack.c.bf16 %v319_v46, %v313_v45  ;;  %v325_v51 = vld [vmem:[#allocation2 + $0xe8] sm:$0xff] }
 0x128   : > { %v349_v54 = vpack.c.bf16 %v331_v52, %v325_v51 }
 0x129   : > { %1075 = vmatpush1.bf16.msra.mxu0 %v906_v57  ;;  %v348_v57 = vpack.c.bf16 %v330_v56, %v324_v55  ;;  %v1425_v56 = vld [vmem:[%s4733_s1 + $0x188] sm:$0xff] }
 0x12a   : > { %1264 = vmatpush1.bf16.msra.mxu1 %v908_v58  ;;  %1076 = vmatprep.subr.bf16.mxu0 %v911_v59  ;;  %v3562_v58 = vmov 0.0   ;;  %v1376_v59 = vld [vmem:[%s4733_s1] sm:$0xff] }
 0x12b   : > { %1265 = vmatprep.subr.bf16.mxu1 %v913_v63  ;;  %v1380_v63 = vld [vmem:[%s4733_s1 + $0x20] sm:$0xff] }
 0x12d   : > { %1077 = vmatpush1.bf16.msra.mxu0 %v910_v5  ;;  %v1386_v5 = vld [vmem:[%s4733_s1 + $0x50] sm:$0xff] }
 0x12e   : > { %1266 = vmatpush1.bf16.msra.mxu1 %v912_v6  ;;  %1078 = vmatprep.subr.bf16.mxu0 %v915_v7  ;;  %v1387_v6 = vld [vmem:[%s4733_s1 + $0x58] sm:$0xff]  ;;  %v1388_v7 = vld [vmem:[%s4733_s1 + $0x60] sm:$0xff] }
 0x12f   : > { %1267 = vmatprep.subr.bf16.mxu1 %v917_v11  ;;  %v1392_v11 = vld [vmem:[%s4733_s1 + $0x80] sm:$0xff] }
 0x131   : > { %1079 = vmatpush1.bf16.msra.mxu0 %v914_v17  ;;  %v1398_v17 = vld [vmem:[%s4733_s1 + $0xb0] sm:$0xff] }
 0x132   : > { %1268 = vmatpush1.bf16.msra.mxu1 %v916_v18  ;;  %1080 = vmatprep.subr.bf16.mxu0 %v919_v19  ;;  %v1399_v18 = vld [vmem:[%s4733_s1 + $0xb8] sm:$0xff]  ;;  %v1400_v19 = vld [vmem:[%s4733_s1 + $0xc0] sm:$0xff] }
 0x133   : > { %1269 = vmatprep.subr.bf16.mxu1 %v921_v23  ;;  %v1404_v23 = vld [vmem:[%s4733_s1 + $0xe0] sm:$0xff] }
 0x135   : > { %1081 = vmatpush1.bf16.msra.mxu0 %v918_v29  ;;  %v1410_v29 = vld [vmem:[%s4733_s1 + $0x110] sm:$0xff] }
 0x136   : > { %1270 = vmatpush1.bf16.msra.mxu1 %v920_v30  ;;  %1082 = vmatprep.subr.bf16.mxu0 %v923_v31  ;;  %v1411_v30 = vld [vmem:[%s4733_s1 + $0x118] sm:$0xff]  ;;  %v1412_v31 = vld [vmem:[%s4733_s1 + $0x120] sm:$0xff] }
 0x137   : > { %1271 = vmatprep.subr.bf16.mxu1 %v925_v34  ;;  %v1415_v34 = vld [vmem:[%s4733_s1 + $0x138] sm:$0xff] }
 0x139   : > { %1083 = vmatpush1.bf16.msra.mxu0 %v922_v39  ;;  %v1420_v39 = vld [vmem:[%s4733_s1 + $0x160] sm:$0xff] }
 0x13a   : > { %1272 = vmatpush1.bf16.msra.mxu1 %v924_v42  ;;  %3125 = vmatprep.subr.msk.mxu0 %vm1639_vm0, %v1444_v43  ;;  %v1423_v42 = vld [vmem:[%s4733_s1 + $0x178] sm:$0xff] }
 0x13b   : > { %3191 = vmatprep.subr.msk.mxu1 %vm1639_vm0, %v1445_v44 }
 0x13c   : > { %1085 = vmatmul.mubr.bf16.vlgmr.msra.gmra.mrb[0].mxu0 %v336_v47 }
 0x13d   : > { %1274 = vmatmul.mubr.bf16.vlgmr.msra.gmra.mrb[0].mxu1 %v336_v47  ;;  %3126 = vmatpush1.msk.msra.mxu0 %vm1639_vm0, %v1440_v37  ;;  %v1418_v37 = vld [vmem:[%s4733_s1 + $0x150] sm:$0xff] }
 0x13e   : > { %3192 = vmatpush1.msk.msra.mxu1 %vm1639_vm0, %v1441_v38  ;;  %1094 = vmatprep.mubr.bf16.mxu0 %v343_v48  ;;  %v1419_v38 = vld [vmem:[%s4733_s1 + $0x158] sm:$0xff] }
 0x13f   : > { %1283 = vmatprep.mubr.bf16.mxu1 %v343_v48  ;;  %v1424_v48 = vld [vmem:[%s4733_s1 + $0x180] sm:$0xff] }
 0x144   : > { %1095 = vmatmul.mubr.bf16.gmra.mrb[4].mxu0 %v342_v53 }
 0x145   : > { %1284 = vmatmul.mubr.bf16.gmra.mrb[4].mxu1 %v342_v53  ;;  %1104 = vmatprep.mubr.bf16.mxu0 %v349_v54 }
 0x146   : > { %1293 = vmatprep.mubr.bf16.mxu1 %v349_v54 }
 0x14c   : > { %1105 = vmatmul.mubr.bf16.gmra.mrb[8].mxu0 %v348_v57 }
 0x14d   : > { %1294 = vmatmul.mubr.bf16.gmra.mrb[8].mxu1 %v348_v57  ;;  %1712 = vmatprep.mubr.f32.mxu0 %v3562_v58 }
 0x14e   : > { %2161 = vmatprep.mubr.f32.mxu1 %v3562_v58 }
 0x154   : > { %3127 = vmatmul.mubr.msk.f32.vlgmr.msra.gmra.mrb[12].mxu0 %vm1446_vm1, %v1376_v59 }
 0x155   : > { %3193 = vmatmul.mubr.msk.f32.vlgmr.msra.gmra.mrb[12].mxu1 %vm1446_vm1, %v1376_v59  ;;  %1718 = vmatprep.mubr.f32.mxu0 %v3562_v58 }
 0x156   : > { %2167 = vmatprep.mubr.f32.mxu1 %v3562_v58 }
 0x158   : > { %3128 = vmatmul.mubr.msk.f32.gmra.mrb[14].mxu0 %vm1446_vm1, %v1377_v60 }
 0x159   : > { %3194 = vmatmul.mubr.msk.f32.gmra.mrb[14].mxu1 %vm1446_vm1, %v1377_v60  ;;  %1724 = vmatprep.mubr.f32.mxu0 %v3562_v58 }
 0x15a   : > { %2173 = vmatprep.mubr.f32.mxu1 %v3562_v58 }
 0x15c   : > { %3129 = vmatmul.mubr.msk.f32.gmra.mrb[16].mxu0 %vm1446_vm1, %v1378_v61 }
 0x15d   : > { %3195 = vmatmul.mubr.msk.f32.gmra.mrb[16].mxu1 %vm1446_vm1, %v1378_v61  ;;  %1730 = vmatprep.mubr.f32.mxu0 %v3562_v58 }
 0x15e   : > { %2179 = vmatprep.mubr.f32.mxu1 %v3562_v58 }
 0x160   : > { %3130 = vmatmul.mubr.msk.f32.gmra.mrb[18].mxu0 %vm1446_vm1, %v1379_v62 }
 0x161   : > { %3196 = vmatmul.mubr.msk.f32.gmra.mrb[18].mxu1 %vm1446_vm1, %v1379_v62  ;;  %1736 = vmatprep.mubr.f32.mxu0 %v3562_v58  ;;  %v3563_v62 = vmov 1966171168  }
 0x162   : > { %2185 = vmatprep.mubr.f32.mxu1 %v3562_v58 }
 0x164   : > { %3131 = vmatmul.mubr.msk.f32.gmra.mrb[20].mxu0 %vm1446_vm1, %v1380_v63 }
 0x165   : > { %3197 = vmatmul.mubr.msk.f32.gmra.mrb[20].mxu1 %vm1446_vm1, %v1380_v63  ;;  %1742 = vmatprep.mubr.f32.mxu0 %v3562_v58  ;;  %v2870_v63 = vunpack.c.l.s4 %v3563_v62 }
 0x166   : > { %2191 = vmatprep.mubr.f32.mxu1 %v3562_v58 }
 0x168   : > { %3132 = vmatmul.mubr.msk.f32.gmra.mrb[22].mxu0 %vm1446_vm1, %v1381_v0 }
 0x169   : > { %3198 = vmatmul.mubr.msk.f32.gmra.mrb[22].mxu1 %vm1446_vm1, %v1381_v0  ;;  %1748 = vmatprep.mubr.f32.mxu0 %v3562_v58  ;;  %v2872_v0 = vlaneseq }
 0x16a   : > { %2197 = vmatprep.mubr.f32.mxu1 %v3562_v58 }
 0x16b   : > { %vm4576_vm2 = vcmp.lt.s32.totalorder %v2872_v0, 512 }
 0x16c   : > { %3133 = vmatmul.mubr.msk.f32.gmra.mrb[24].mxu0 %vm1446_vm1, %v1382_v1 }
 0x16d   : > { %3199 = vmatmul.mubr.msk.f32.gmra.mrb[24].mxu1 %vm1446_vm1, %v1382_v1  ;;  %1754 = vmatprep.mubr.f32.mxu0 %v3562_v58 }
 0x16e   : > { %2203 = vmatprep.mubr.f32.mxu1 %v3562_v58 }
 0x170   : > { %3134 = vmatmul.mubr.msk.f32.gmra.mrb[26].mxu0 %vm1446_vm1, %v1383_v2 }
 0x171   : > { %3200 = vmatmul.mubr.msk.f32.gmra.mrb[26].mxu1 %vm1446_vm1, %v1383_v2  ;;  %1760 = vmatprep.mubr.f32.mxu0 %v3562_v58 }
 0x172   : > { %2209 = vmatprep.mubr.f32.mxu1 %v3562_v58 }
 0x174   : > { %3135 = vmatmul.mubr.msk.f32.gmra.mrb[28].mxu0 %vm1446_vm1, %v1384_v3 }
 0x175   : > { %3201 = vmatmul.mubr.msk.f32.gmra.mrb[28].mxu1 %vm1446_vm1, %v1384_v3  ;;  %1766 = vmatprep.mubr.f32.mxu0 %v3562_v58 }
 0x176   : > { %2215 = vmatprep.mubr.f32.mxu1 %v3562_v58 }
 0x178   : > { %3136 = vmatmul.mubr.msk.f32.gmra.mrb[30].mxu0 %vm1446_vm1, %v1385_v4 }
 0x179   : > { %3202 = vmatmul.mubr.msk.f32.gmra.mrb[30].mxu1 %vm1446_vm1, %v1385_v4  ;;  %1772 = vmatprep.mubr.f32.mxu0 %v3562_v58 }
 0x17a   : > { %2221 = vmatprep.mubr.f32.mxu1 %v3562_v58 }
 0x17c   : > { %3137 = vmatmul.mubr.msk.f32.gmra.mrb[32].mxu0 %vm1446_vm1, %v1386_v5 }
 0x17d   : > { %3203 = vmatmul.mubr.msk.f32.gmra.mrb[32].mxu1 %vm1446_vm1, %v1386_v5  ;;  %1778 = vmatprep.mubr.f32.mxu0 %v3562_v58  ;;  %v1426_v5 = vld [vmem:[%s4733_s1 + $0x190] sm:$0xff] }
 0x17e   : > { %2227 = vmatprep.mubr.f32.mxu1 %v3562_v58 }
 0x180   : > { %3138 = vmatmul.mubr.msk.f32.gmra.mrb[34].mxu0 %vm1446_vm1, %v1387_v6 }
 0x181   : > { %3204 = vmatmul.mubr.msk.f32.gmra.mrb[34].mxu1 %vm1446_vm1, %v1387_v6  ;;  %1784 = vmatprep.mubr.f32.mxu0 %v3562_v58 }
 0x182   : > { %2233 = vmatprep.mubr.f32.mxu1 %v3562_v58 }
 0x184   : > { %3139 = vmatmul.mubr.msk.f32.gmra.mrb[36].mxu0 %vm1446_vm1, %v1388_v7 }
 0x185   : > { %3205 = vmatmul.mubr.msk.f32.gmra.mrb[36].mxu1 %vm1446_vm1, %v1388_v7  ;;  %1790 = vmatprep.mubr.f32.mxu0 %v3562_v58 }
 0x186   : > { %2239 = vmatprep.mubr.f32.mxu1 %v3562_v58 }
 0x188   : > { %3140 = vmatmul.mubr.msk.f32.gmra.mrb[38].mxu0 %vm1446_vm1, %v1389_v8 }
 0x189   : > { %3206 = vmatmul.mubr.msk.f32.gmra.mrb[38].mxu1 %vm1446_vm1, %v1389_v8  ;;  %1796 = vmatprep.mubr.f32.mxu0 %v3562_v58 }
 0x18a   : > { %2245 = vmatprep.mubr.f32.mxu1 %v3562_v58 }
 0x18c   : > { %3141 = vmatmul.mubr.msk.f32.gmra.mrb[40].mxu0 %vm1446_vm1, %v1390_v9 }
 0x18d   : > { %3207 = vmatmul.mubr.msk.f32.gmra.mrb[40].mxu1 %vm1446_vm1, %v1390_v9  ;;  %1802 = vmatprep.mubr.f32.mxu0 %v3562_v58 }
 0x18e   : > { %2251 = vmatprep.mubr.f32.mxu1 %v3562_v58 }
 0x190   : > { %3142 = vmatmul.mubr.msk.f32.gmra.mrb[42].mxu0 %vm1446_vm1, %v1391_v10 }
 0x191   : > { %3208 = vmatmul.mubr.msk.f32.gmra.mrb[42].mxu1 %vm1446_vm1, %v1391_v10  ;;  %1808 = vmatprep.mubr.f32.mxu0 %v3562_v58 }
 0x192   : > { %2257 = vmatprep.mubr.f32.mxu1 %v3562_v58 }
 0x194   : > { %3143 = vmatmul.mubr.msk.f32.gmra.mrb[44].mxu0 %vm1446_vm1, %v1392_v11 }
 0x195   : > { %3209 = vmatmul.mubr.msk.f32.gmra.mrb[44].mxu1 %vm1446_vm1, %v1392_v11  ;;  %1814 = vmatprep.mubr.f32.mxu0 %v3562_v58 }
 0x196   : > { %2263 = vmatprep.mubr.f32.mxu1 %v3562_v58 }
 0x198   : > { %3144 = vmatmul.mubr.msk.f32.gmra.mrb[46].mxu0 %vm1446_vm1, %v1393_v12 }
 0x199   : > { %3210 = vmatmul.mubr.msk.f32.gmra.mrb[46].mxu1 %vm1446_vm1, %v1393_v12  ;;  %1820 = vmatprep.mubr.f32.mxu0 %v3562_v58 }
 0x19a   : > { %2269 = vmatprep.mubr.f32.mxu1 %v3562_v58 }
 0x19c   : > { %3145 = vmatmul.mubr.msk.f32.gmra.mrb[48].mxu0 %vm1446_vm1, %v1394_v13 }
 0x19d   : > { %3211 = vmatmul.mubr.msk.f32.gmra.mrb[48].mxu1 %vm1446_vm1, %v1394_v13  ;;  %1826 = vmatprep.mubr.f32.mxu0 %v3562_v58 }
 0x19e   : > { %2275 = vmatprep.mubr.f32.mxu1 %v3562_v58 }
 0x1a0   : > { %3146 = vmatmul.mubr.msk.f32.gmra.mrb[50].mxu0 %vm1446_vm1, %v1395_v14 }
 0x1a1   : > { %3212 = vmatmul.mubr.msk.f32.gmra.mrb[50].mxu1 %vm1446_vm1, %v1395_v14  ;;  %1832 = vmatprep.mubr.f32.mxu0 %v3562_v58  ;;  %v2871_v14 = vunpack.c.0.s8 %v2870_v63 }
 0x1a2   : > { %2281 = vmatprep.mubr.f32.mxu1 %v3562_v58 }
 0x1a4   : > { %3147 = vmatmul.mubr.msk.f32.gmra.mrb[52].mxu0 %vm1446_vm1, %v1396_v15 }
 0x1a5   : > { %3213 = vmatmul.mubr.msk.f32.gmra.mrb[52].mxu1 %vm1446_vm1, %v1396_v15  ;;  %1838 = vmatprep.mubr.f32.mxu0 %v3562_v58  ;;  %v2873_v15 = vshrl.u32 %v2872_v0, 7 }
 0x1a6   : > { %2287 = vmatprep.mubr.f32.mxu1 %v3562_v58 }
 0x1a8   : > { %3148 = vmatmul.mubr.msk.f32.gmra.mrb[54].mxu0 %vm1446_vm1, %v1397_v16 }
 0x1a9   : > { %3214 = vmatmul.mubr.msk.f32.gmra.mrb[54].mxu1 %vm1446_vm1, %v1397_v16  ;;  %1844 = vmatprep.mubr.f32.mxu0 %v3562_v58 }
 0x1aa   : > { %2293 = vmatprep.mubr.f32.mxu1 %v3562_v58 }
 0x1ac   : > { %3149 = vmatmul.mubr.msk.f32.gmra.mrb[56].mxu0 %vm1446_vm1, %v1398_v17 }
 0x1ad   : > { %3215 = vmatmul.mubr.msk.f32.gmra.mrb[56].mxu1 %vm1446_vm1, %v1398_v17  ;;  %1850 = vmatprep.mubr.f32.mxu0 %v3562_v58 }
 0x1ae   : > { %2299 = vmatprep.mubr.f32.mxu1 %v3562_v58 }
 0x1b0   : > { %3150 = vmatmul.mubr.msk.f32.gmra.mrb[58].mxu0 %vm1446_vm1, %v1399_v18 }
 0x1b1   : > { %3216 = vmatmul.mubr.msk.f32.gmra.mrb[58].mxu1 %vm1446_vm1, %v1399_v18  ;;  %1856 = vmatprep.mubr.f32.mxu0 %v3562_v58 }
 0x1b2   : > { %2305 = vmatprep.mubr.f32.mxu1 %v3562_v58 }
 0x1b4   : > { %3151 = vmatmul.mubr.msk.f32.gmra.mrb[60].mxu0 %vm1446_vm1, %v1400_v19 }
 0x1b5   : > { %3217 = vmatmul.mubr.msk.f32.gmra.mrb[60].mxu1 %vm1446_vm1, %v1400_v19  ;;  %1862 = vmatprep.mubr.f32.mxu0 %v3562_v58  ;;  %v1427_v19 = vld [vmem:[%s4733_s1 + $0x198] sm:$0xff] }
 0x1b6   : > { %2311 = vmatprep.mubr.f32.mxu1 %v3562_v58 }
 0x1b8   : > { %3152 = vmatmul.mubr.msk.f32.gmra.mrb[62].mxu0 %vm1446_vm1, %v1401_v20 }
 0x1b9   : > { %3218 = vmatmul.mubr.msk.f32.gmra.mrb[62].mxu1 %vm1446_vm1, %v1401_v20  ;;  %1868 = vmatprep.mubr.f32.mxu0 %v3562_v58 }
 0x1ba   : > { %2317 = vmatprep.mubr.f32.mxu1 %v3562_v58 }
 0x1bc   : > { %3153 = vmatmul.mubr.msk.f32.gmra.mrb[64].mxu0 %vm1446_vm1, %v1402_v21 }
 0x1bd   : > { %3219 = vmatmul.mubr.msk.f32.gmra.mrb[64].mxu1 %vm1446_vm1, %v1402_v21  ;;  %1874 = vmatprep.mubr.f32.mxu0 %v3562_v58 }
 0x1be   : > { %2323 = vmatprep.mubr.f32.mxu1 %v3562_v58 }
 0x1c0   : > { %3154 = vmatmul.mubr.msk.f32.gmra.mrb[66].mxu0 %vm1446_vm1, %v1403_v22 }
 0x1c1   : > { %3220 = vmatmul.mubr.msk.f32.gmra.mrb[66].mxu1 %vm1446_vm1, %v1403_v22  ;;  %1880 = vmatprep.mubr.f32.mxu0 %v3562_v58 }
 0x1c2   : > { %2329 = vmatprep.mubr.f32.mxu1 %v3562_v58 }
 0x1c4   : > { %3155 = vmatmul.mubr.msk.f32.gmra.mrb[68].mxu0 %vm1446_vm1, %v1404_v23 }
 0x1c5   : > { %3221 = vmatmul.mubr.msk.f32.gmra.mrb[68].mxu1 %vm1446_vm1, %v1404_v23  ;;  %1886 = vmatprep.mubr.f32.mxu0 %v3562_v58 }
 0x1c6   : > { %2335 = vmatprep.mubr.f32.mxu1 %v3562_v58 }
 0x1c8   : > { %3156 = vmatmul.mubr.msk.f32.gmra.mrb[70].mxu0 %vm1446_vm1, %v1405_v24 }
 0x1c9   : > { %3222 = vmatmul.mubr.msk.f32.gmra.mrb[70].mxu1 %vm1446_vm1, %v1405_v24  ;;  %1892 = vmatprep.mubr.f32.mxu0 %v3562_v58 }
 0x1ca   : > { %2341 = vmatprep.mubr.f32.mxu1 %v3562_v58 }
 0x1cc   : > { %3157 = vmatmul.mubr.msk.f32.gmra.mrb[72].mxu0 %vm1446_vm1, %v1406_v25 }
 0x1cd   : > { %3223 = vmatmul.mubr.msk.f32.gmra.mrb[72].mxu1 %vm1446_vm1, %v1406_v25  ;;  %1898 = vmatprep.mubr.f32.mxu0 %v3562_v58 }
 0x1ce   : > { %2347 = vmatprep.mubr.f32.mxu1 %v3562_v58 }
 0x1d0   : > { %3158 = vmatmul.mubr.msk.f32.gmra.mrb[74].mxu0 %vm1446_vm1, %v1407_v26 }
 0x1d1   : > { %3224 = vmatmul.mubr.msk.f32.gmra.mrb[74].mxu1 %vm1446_vm1, %v1407_v26  ;;  %1904 = vmatprep.mubr.f32.mxu0 %v3562_v58  ;;  %v4543_v26 = vsub.s32 %v2871_v14, %v2873_v15 }
 0x1d2   : > { %2353 = vmatprep.mubr.f32.mxu1 %v3562_v58 }
 0x1d4   : > { %3159 = vmatmul.mubr.msk.f32.gmra.mrb[76].mxu0 %vm1446_vm1, %v1408_v27 }
 0x1d5   : > { %3225 = vmatmul.mubr.msk.f32.gmra.mrb[76].mxu1 %vm1446_vm1, %v1408_v27  ;;  %1910 = vmatprep.mubr.f32.mxu0 %v3562_v58 }
 0x1d6   : > { %2359 = vmatprep.mubr.f32.mxu1 %v3562_v58 }
 0x1d8   : > { %3160 = vmatmul.mubr.msk.f32.gmra.mrb[78].mxu0 %vm1446_vm1, %v1409_v28 }
 0x1d9   : > { %3226 = vmatmul.mubr.msk.f32.gmra.mrb[78].mxu1 %vm1446_vm1, %v1409_v28  ;;  %1916 = vmatprep.mubr.f32.mxu0 %v3562_v58 }
 0x1da   : > { %2365 = vmatprep.mubr.f32.mxu1 %v3562_v58 }
 0x1dc   : > { %3161 = vmatmul.mubr.msk.f32.gmra.mrb[80].mxu0 %vm1446_vm1, %v1410_v29 }
 0x1dd   : > { %3227 = vmatmul.mubr.msk.f32.gmra.mrb[80].mxu1 %vm1446_vm1, %v1410_v29  ;;  %1922 = vmatprep.mubr.f32.mxu0 %v3562_v58 }
 0x1de   : > { %2371 = vmatprep.mubr.f32.mxu1 %v3562_v58 }
 0x1e0   : > { %3162 = vmatmul.mubr.msk.f32.gmra.mrb[82].mxu0 %vm1446_vm1, %v1411_v30 }
 0x1e1   : > { %3228 = vmatmul.mubr.msk.f32.gmra.mrb[82].mxu1 %vm1446_vm1, %v1411_v30  ;;  %1928 = vmatprep.mubr.f32.mxu0 %v3562_v58 }
 0x1e2   : > { %2377 = vmatprep.mubr.f32.mxu1 %v3562_v58 }
 0x1e4   : > { %3163 = vmatmul.mubr.msk.f32.gmra.mrb[84].mxu0 %vm1446_vm1, %v1412_v31 }
 0x1e5   : > { %3229 = vmatmul.mubr.msk.f32.gmra.mrb[84].mxu1 %vm1446_vm1, %v1412_v31  ;;  %1934 = vmatprep.mubr.f32.mxu0 %v3562_v58 }
 0x1e6   : > { %2383 = vmatprep.mubr.f32.mxu1 %v3562_v58 }
 0x1e8   : > { %3164 = vmatmul.mubr.msk.f32.gmra.mrb[86].mxu0 %vm1446_vm1, %v1413_v32 }
 0x1e9   : > { %3230 = vmatmul.mubr.msk.f32.gmra.mrb[86].mxu1 %vm1446_vm1, %v1413_v32  ;;  %1940 = vmatprep.mubr.f32.mxu0 %v3562_v58 }
 0x1ea   : > { %2389 = vmatprep.mubr.f32.mxu1 %v3562_v58 }
 0x1ec   : > { %3165 = vmatmul.mubr.msk.f32.gmra.mrb[88].mxu0 %vm1446_vm1, %v1414_v33 }
 0x1ed   : > { %3231 = vmatmul.mubr.msk.f32.gmra.mrb[88].mxu1 %vm1446_vm1, %v1414_v33  ;;  %1946 = vmatprep.mubr.f32.mxu0 %v3562_v58 }
 0x1ee   : > { %2395 = vmatprep.mubr.f32.mxu1 %v3562_v58 }
 0x1f0   : > { %3166 = vmatmul.mubr.msk.f32.gmra.mrb[90].mxu0 %vm1446_vm1, %v1415_v34 }
 0x1f1   : > { %3232 = vmatmul.mubr.msk.f32.gmra.mrb[90].mxu1 %vm1446_vm1, %v1415_v34  ;;  %1952 = vmatprep.mubr.f32.mxu0 %v3562_v58 }
 0x1f2   : > { %2401 = vmatprep.mubr.f32.mxu1 %v3562_v58 }
 0x1f4   : > { %3167 = vmatmul.mubr.msk.f32.gmra.mrb[92].mxu0 %vm1446_vm1, %v1416_v35 }
 0x1f5   : > { %3233 = vmatmul.mubr.msk.f32.gmra.mrb[92].mxu1 %vm1446_vm1, %v1416_v35  ;;  %1958 = vmatprep.mubr.f32.mxu0 %v3562_v58 }
 0x1f6   : > { %2407 = vmatprep.mubr.f32.mxu1 %v3562_v58 }
 0x1f8   : > { %3168 = vmatmul.mubr.msk.f32.gmra.mrb[94].mxu0 %vm1446_vm1, %v1417_v36 }
 0x1f9   : > { %3234 = vmatmul.mubr.msk.f32.gmra.mrb[94].mxu1 %vm1446_vm1, %v1417_v36  ;;  %1964 = vmatprep.mubr.f32.mxu0 %v3562_v58 }
 0x1fa   : > { %2413 = vmatprep.mubr.f32.mxu1 %v3562_v58 }
 0x1fc   : > { %3169 = vmatmul.mubr.msk.f32.gmra.mrb[96].mxu0 %vm1446_vm1, %v1418_v37 }
 0x1fd   : > { %3235 = vmatmul.mubr.msk.f32.gmra.mrb[96].mxu1 %vm1446_vm1, %v1418_v37  ;;  %1970 = vmatprep.mubr.f32.mxu0 %v3562_v58  ;;  %v1428_v37 = vld [vmem:[%s4733_s1 + $0x1a0] sm:$0xff] }
 0x1fe   : > { %2419 = vmatprep.mubr.f32.mxu1 %v3562_v58 }
 0x200   : > { %3170 = vmatmul.mubr.msk.f32.gmra.mrb[98].mxu0 %vm1446_vm1, %v1419_v38 }
 0x201   : > { %3236 = vmatmul.mubr.msk.f32.gmra.mrb[98].mxu1 %vm1446_vm1, %v1419_v38  ;;  %1976 = vmatprep.mubr.f32.mxu0 %v3562_v58 }
 0x202   : > { %2425 = vmatprep.mubr.f32.mxu1 %v3562_v58 }
 0x204   : > { %3171 = vmatmul.mubr.msk.f32.gmra.mrb[100].mxu0 %vm1446_vm1, %v1420_v39 }
 0x205   : > { %3237 = vmatmul.mubr.msk.f32.gmra.mrb[100].mxu1 %vm1446_vm1, %v1420_v39  ;;  %1982 = vmatprep.mubr.f32.mxu0 %v3562_v58 }
 0x206   : > { %2431 = vmatprep.mubr.f32.mxu1 %v3562_v58 }
 0x208   : > { %3172 = vmatmul.mubr.msk.f32.gmra.mrb[102].mxu0 %vm1446_vm1, %v1421_v40 }
 0x209   : > { %3238 = vmatmul.mubr.msk.f32.gmra.mrb[102].mxu1 %vm1446_vm1, %v1421_v40  ;;  %1988 = vmatprep.mubr.f32.mxu0 %v3562_v58 }
 0x20a   : > { %2437 = vmatprep.mubr.f32.mxu1 %v3562_v58 }
 0x20c   : > { %3173 = vmatmul.mubr.msk.f32.gmra.mrb[104].mxu0 %vm1446_vm1, %v1422_v41 }
 0x20d   : > { %3239 = vmatmul.mubr.msk.f32.gmra.mrb[104].mxu1 %vm1446_vm1, %v1422_v41  ;;  %1994 = vmatprep.mubr.f32.mxu0 %v3562_v58 }
 0x20e   : > { %2443 = vmatprep.mubr.f32.mxu1 %v3562_v58 }
 0x20f   : > { %v1086_v43 = vpop.f32.mrb[0].mxu0 }
 0x210   : > { %v1275_v44 = vpop.f32.mrb[0].mxu1  ;;  %v1088_v45 = vpop.f32.mrb[1].mxu0  ;;  %3174 = vmatmul.mubr.msk.f32.gmra.mrb[106].mxu0 %vm1446_vm1, %v1423_v42 }
 0x211   : > { %v1277_v46 = vpop.f32.mrb[1].mxu1  ;;  %3240 = vmatmul.mubr.msk.f32.gmra.mrb[106].mxu1 %vm1446_vm1, %v1423_v42  ;;  %v1090_v47 = vpop.f32.mrb[2].mxu0  ;;  %2000 = vmatprep.mubr.f32.mxu0 %v3562_v58 }
 0x212   : > { %v1304_v49 = vmax.f32 %v1086_v43, %v1090_v47  ;;  %v1279_v50 = vpop.f32.mrb[2].mxu1  ;;  %v1092_v51 = vpop.f32.mrb[3].mxu0  ;;  %2449 = vmatprep.mubr.f32.mxu1 %v3562_v58 }
 0x213   : > { %v1320_v52 = vmax.f32 %v1275_v44, %v1279_v50  ;;  %v1312_v53 = vmax.f32 %v1088_v45, %v1092_v51  ;;  %v1281_v54 = vpop.f32.mrb[3].mxu1 }
 0x214   : > { %v1328_v55 = vmax.f32 %v1277_v46, %v1281_v54  ;;  %3175 = vmatmul.mubr.msk.f32.gmra.mrb[108].mxu0 %vm1446_vm1, %v1424_v48 }
 0x215   : > { %3241 = vmatmul.mubr.msk.f32.gmra.mrb[108].mxu1 %vm1446_vm1, %v1424_v48  ;;  %2006 = vmatprep.mubr.f32.mxu0 %v3562_v58 }
 0x216   : > { %2455 = vmatprep.mubr.f32.mxu1 %v3562_v58 }
 0x217   : > { %v1096_v57 = vpop.f32.mrb[4].mxu0 }
 0x218   : > { %v1305_v59 = vmax.f32 %v1304_v49, %v1096_v57  ;;  %v1285_v60 = vpop.f32.mrb[4].mxu1  ;;  %v1098_v61 = vpop.f32.mrb[5].mxu0  ;;  %3176 = vmatmul.mubr.msk.f32.gmra.mrb[110].mxu0 %vm1446_vm1, %v1425_v56  ;;  %v1429_v57 = vld [vmem:[%s4733_s1 + $0x1a8] sm:$0xff] }
 0x219   : > { %v1321_v1 = vmax.f32 %v1320_v52, %v1285_v60  ;;  %v1313_v2 = vmax.f32 %v1312_v53, %v1098_v61  ;;  %v1287_v3 = vpop.f32.mrb[5].mxu1  ;;  %3242 = vmatmul.mubr.msk.f32.gmra.mrb[110].mxu1 %vm1446_vm1, %v1425_v56  ;;  %v1100_v4 = vpop.f32.mrb[6].mxu0  ;;  %2012 = vmatprep.mubr.f32.mxu0 %v3562_v58 }
 0x21a   : > { %v1306_v6 = vrot.slane %v1305_v59, 4  ;;  %v1329_v7 = vmax.f32 %v1328_v55, %v1287_v3  ;;  %v1289_v8 = vpop.f32.mrb[6].mxu1  ;;  %v1102_v9 = vpop.f32.mrb[7].mxu0  ;;  %2461 = vmatprep.mubr.f32.mxu1 %v3562_v58 }
 0x21b   : > { %v1322_v10 = vrot.slane %v1321_v1, 4  ;;  %v1314_v11 = vrot.slane %v1313_v2, 4  ;;  %v1291_v12 = vpop.f32.mrb[7].mxu1 }
 0x21c   : > { %v1307_v13 = vmax.f32 %v1305_v59, %v1306_v6  ;;  %v1330_v16 = vrot.slane %v1329_v7, 4  ;;  %3177 = vmatmul.mubr.msk.f32.gmra.mrb[112].mxu0 %vm1446_vm1, %v1426_v5 }
 0x21d   : > { %v1323_v17 = vmax.f32 %v1321_v1, %v1322_v10  ;;  %v1315_v18 = vmax.f32 %v1313_v2, %v1314_v11  ;;  %3243 = vmatmul.mubr.msk.f32.gmra.mrb[112].mxu1 %vm1446_vm1, %v1426_v5  ;;  %2018 = vmatprep.mubr.f32.mxu0 %v3562_v58  ;;  %v1430_v5 = vld [vmem:[%s4733_s1 + $0x1b0] sm:$0xff] }
 0x21e   : > { %v1308_v20 = vrot.slane %v1307_v13, 2  ;;  %v1331_v21 = vmax.f32 %v1329_v7, %v1330_v16  ;;  %2467 = vmatprep.mubr.f32.mxu1 %v3562_v58 }
 0x21f   : > { %v1324_v22 = vrot.slane %v1323_v17, 2  ;;  %v1316_v23 = vrot.slane %v1315_v18, 2  ;;  %v1106_v24 = vpop.f32.mrb[8].mxu0 }
 0x220   : > { %v1309_v25 = vmax.f32 %v1307_v13, %v1308_v20  ;;  %v1332_v27 = vrot.slane %v1331_v21, 2  ;;  %v1336_v28 = vmax.f32 %v1100_v4, %v1106_v24  ;;  %v1295_v29 = vpop.f32.mrb[8].mxu1  ;;  %v1108_v30 = vpop.f32.mrb[9].mxu0  ;;  %3178 = vmatmul.mubr.msk.f32.gmra.mrb[114].mxu0 %vm1446_vm1, %v1427_v19 }
 0x221   : > { %v1325_v31 = vmax.f32 %v1323_v17, %v1324_v22  ;;  %v1317_v32 = vmax.f32 %v1315_v18, %v1316_v23  ;;  %v1352_v33 = vmax.f32 %v1289_v8, %v1295_v29  ;;  %v1344_v34 = vmax.f32 %v1102_v9, %v1108_v30  ;;  %v1297_v35 = vpop.f32.mrb[9].mxu1  ;;  %3244 = vmatmul.mubr.msk.f32.gmra.mrb[114].mxu1 %vm1446_vm1, %v1427_v19  ;;  %v1110_v36 = vpop.f32.mrb[10].mxu0 }
 0x222   : > { %v1310_v38 = vrot.slane %v1309_v25, 1  ;;  %v1333_v39 = vmax.f32 %v1331_v21, %v1332_v27  ;;  %v1360_v40 = vmax.f32 %v1291_v12, %v1297_v35  ;;  %v1337_v41 = vmax.f32 %v1336_v28, %v1110_v36  ;;  %v1299_v42 = vpop.f32.mrb[10].mxu1  ;;  %v1112_v43 = vpop.f32.mrb[11].mxu0  ;;  %2024 = vmatprep.mubr.f32.mxu0 %v3562_v58  ;;  %2473 = vmatprep.mubr.f32.mxu1 %v3562_v58  ;;  %v1431_v36 = vld [vmem:[%s4733_s1 + $0x1b8] sm:$0xff] }
 0x223   : > { %v1326_v44 = vrot.slane %v1325_v31, 1  ;;  %v1318_v45 = vrot.slane %v1317_v32, 1  ;;  %v1353_v46 = vmax.f32 %v1352_v33, %v1299_v42  ;;  %v1345_v47 = vmax.f32 %v1344_v34, %v1112_v43  ;;  %v1301_v48 = vpop.f32.mrb[11].mxu1 }
 0x224   : > { %v1311_v49 = vmax.f32 %v1309_v25, %v1310_v38  ;;  %v1334_v50 = vrot.slane %v1333_v39, 1  ;;  %v1338_v51 = vrot.slane %v1337_v41, 4  ;;  %v1361_v52 = vmax.f32 %v1360_v40, %v1301_v48  ;;  %3179 = vmatmul.mubr.msk.f32.gmra.mrb[116].mxu0 %vm1446_vm1, %v1428_v37 }
 0x225   : > { %v1327_v53 = vmax.f32 %v1325_v31, %v1326_v44  ;;  %v1319_v54 = vmax.f32 %v1317_v32, %v1318_v45  ;;  %v1354_v55 = vrot.slane %v1353_v46, 4  ;;  %v1346_v56 = vrot.slane %v1345_v47, 4  ;;  %3245 = vmatmul.mubr.msk.f32.gmra.mrb[116].mxu1 %vm1446_vm1, %v1428_v37  ;;  %2030 = vmatprep.mubr.f32.mxu0 %v3562_v58 }
 0x226   : > { %v1368_v59 = vmax.f32 %v1311_v49, 0.0  ;;  %v1335_v60 = vmax.f32 %v1333_v39, %v1334_v50  ;;  %v1339_v61 = vmax.f32 %v1337_v41, %v1338_v51  ;;  %v1362_v62 = vrot.slane %v1361_v52, 4  ;;  %2479 = vmatprep.mubr.f32.mxu1 %v3562_v58 }
 0x227   : > { %v1370_v63 = vmax.f32 %v1327_v53, 0.0  ;;  %v1369_v1 = vmax.f32 %v1319_v54, 0.0  ;;  %v1355_v2 = vmax.f32 %v1353_v46, %v1354_v55  ;;  %v1347_v3 = vmax.f32 %v1345_v47, %v1346_v56  ;;  %v1714_v4 = vpop.f32.mrb[12].mxu0  ;;  %v1432_v56 = vld [vmem:[%s4733_s1 + $0x1c0] sm:$0xff] }
 0x228   : > { %v2851_v6 = vmul.f32 0.7692, %v1368_v59  ;;  %v1371_v7 = vmax.f32 %v1335_v60, 0.0  ;;  %v1340_v8 = vrot.slane %v1339_v61, 2  ;;  %v1363_v9 = vmax.f32 %v1361_v52, %v1362_v62  ;;  %v2163_v10 = vpop.f32.mrb[12].mxu1  ;;  %v1716_v11 = vpop.f32.mrb[13].mxu0  ;;  %3180 = vmatmul.mubr.msk.f32.gmra.mrb[118].mxu0 %vm1446_vm1, %v1429_v57 }
 0x229   : > { %v2853_v12 = vmul.f32 0.7692, %v1370_v63  ;;  %v2852_v13 = vmul.f32 0.7692, %v1369_v1  ;;  %v1356_v14 = vrot.slane %v1355_v2, 2  ;;  %v1348_v15 = vrot.slane %v1347_v3, 2  ;;  %3246 = vmatmul.mubr.msk.f32.gmra.mrb[118].mxu1 %vm1446_vm1, %v1429_v57  ;;  %2036 = vmatprep.mubr.f32.mxu0 %v3562_v58 }
 0x22a   : > { %v2854_v16 = vmul.f32 0.7692, %v1371_v7  ;;  %v1341_v17 = vmax.f32 %v1339_v61, %v1340_v8  ;;  %v1364_v18 = vrot.slane %v1363_v9, 2  ;;  %v2165_v19 = vpop.f32.mrb[13].mxu1  ;;  %2485 = vmatprep.mubr.f32.mxu1 %v3562_v58 }
 0x22b   : > { %v2867_v20 = vcombine.low %v2851_v6, %v2852_v13  ;;  %v1357_v21 = vmax.f32 %v1355_v2, %v1356_v14  ;;  %v1349_v22 = vmax.f32 %v1347_v3, %v1348_v15  ;;  %v1720_v23 = vpop.f32.mrb[14].mxu0  ;;  %v2850_v6 = vld [vmem:[%s4734_s2] sm:$0x3]  ;;  %v3564_v14 = vmov 0  }
 0x22c   : > { %v2868_v24 = vcombine.low %v2853_v12, %v2854_v16  ;;  %v1342_v25 = vrot.slane %v1341_v17, 1  ;;  %v1365_v27 = vmax.f32 %v1363_v9, %v1364_v18  ;;  %v2546_v28 = vmax.f32 %v1714_v4, %v1720_v23  ;;  %v2169_v29 = vpop.f32.mrb[14].mxu1  ;;  %v1722_v30 = vpop.f32.mrb[15].mxu0  ;;  %3181 = vmatmul.mubr.msk.f32.gmra.mrb[120].mxu0 %vm1446_vm1, %v1430_v5  ;;  %3391 = vset.pattern.permute.xlu0 %v3564_v14 }
 0x22d   : > { %v2875_v31 = vrot.slane %v2867_v20, %v4543_v26  ;;  %v1358_v32 = vrot.slane %v1357_v21, 1  ;;  %v1350_v33 = vrot.slane %v1349_v22, 1  ;;  %v2620_v34 = vmax.f32 %v2163_v10, %v2169_v29  ;;  %v2171_v35 = vpop.f32.mrb[15].mxu1  ;;  %3247 = vmatmul.mubr.msk.f32.gmra.mrb[120].mxu1 %vm1446_vm1, %v1430_v5  ;;  %2042 = vmatprep.mubr.f32.mxu0 %v3562_v58 }
 0x22e   : > { %v2882_v37 = vrot.slane %v2868_v24, %v4543_v26  ;;  %v1343_v38 = vmax.f32 %v1341_v17, %v1342_v25  ;;  %v1366_v39 = vrot.slane %v1365_v27, 1  ;;  %v2583_v40 = vmax.f32 %v1716_v11, %v1722_v30  ;;  %2491 = vmatprep.mubr.f32.mxu1 %v3562_v58  ;;  %v1433_v11 = vld [vmem:[%s4733_s1 + $0x1c8] sm:$0xff]  ;;  %v1434_v25 = vld [vmem:[%s4733_s1 + $0x1d0] sm:$0xff] }
 0x22f   : > { %v1359_v42 = vmax.f32 %v1357_v21, %v1358_v32  ;;  %v1351_v43 = vmax.f32 %v1349_v22, %v1350_v33  ;;  %v2657_v44 = vmax.f32 %v2165_v19, %v2171_v35  ;;  %v1726_v45 = vpop.f32.mrb[16].mxu0  ;;  %v2924_v15 = vmul.f32 0.2307, %v2850_v6 }
 0x230   : > { %v2883_v46 = vcombine.low %v2875_v31, %v2882_v37  ;;  %v1372_v47 = vmax.f32 %v1343_v38, 0.0  ;;  %v1367_v48 = vmax.f32 %v1365_v27, %v1366_v39  ;;  %v2547_v49 = vmax.f32 %v2546_v28, %v1726_v45  ;;  %v2175_v50 = vpop.f32.mrb[16].mxu1  ;;  %v1728_v51 = vpop.f32.mrb[17].mxu0  ;;  %3182 = vmatmul.mubr.msk.f32.gmra.mrb[122].mxu0 %vm1446_vm1, %v1431_v36  ;;  %v1435_v37 = vld [vmem:[%s4733_s1 + $0x1d8] sm:$0xff] }
 0x231   : > { %v1374_v52 = vmax.f32 %v1359_v42, 0.0  ;;  %v1373_v53 = vmax.f32 %v1351_v43, 0.0  ;;  %v2621_v54 = vmax.f32 %v2620_v34, %v2175_v50  ;;  %v2584_v0 = vmax.f32 %v2583_v40, %v1728_v51  ;;  %v2177_v55 = vpop.f32.mrb[17].mxu1  ;;  %3248 = vmatmul.mubr.msk.f32.gmra.mrb[122].mxu1 %vm1446_vm1, %v1431_v36  ;;  %2048 = vmatprep.mubr.f32.mxu0 %v3562_v58 }
 0x232   : > { %v2890_v57 = vrot.slane %v2883_v46, %v4543_v26  ;;  %v2855_v59 = vmul.f32 0.7692, %v1372_v47  ;;  %v1375_v60 = vmax.f32 %v1367_v48, 0.0  ;;  %v2658_v61 = vmax.f32 %v2657_v44, %v2177_v55  ;;  %2497 = vmatprep.mubr.f32.mxu1 %v3562_v58  ;;  %2927 = vperm.xlu0 %3391, %v2924_v15   ;;  %v1436_v47 = vld [vmem:[%s4733_s1 + $0x1e0] sm:$0xff]  ;;  %v1437_v55 = vld [vmem:[%s4733_s1 + $0x1e8] sm:$0xff] }
 0x233   : > { %v2857_v62 = vmul.f32 0.7692, %v1374_v52  ;;  %v2856_v63 = vmul.f32 0.7692, %v1373_v53  ;;  %v1732_v1 = vpop.f32.mrb[18].mxu0 }
 0x234   : > { %2921 = vst.msk [vmem:[%s4590_s6] ss:$2 sm:$0xf] %vm4576_vm2, %v2890_v57  ;;  %v2858_v2 = vmul.f32 0.7692, %v1375_v60  ;;  %v2548_v3 = vmax.f32 %v2547_v49, %v1732_v1  ;;  %v2181_v4 = vpop.f32.mrb[18].mxu1  ;;  %3183 = vmatmul.mubr.msk.f32.gmra.mrb[124].mxu0 %vm1446_vm1, %v1432_v56 }
 0x235   : > { %v1734_v5 = vpop.f32.mrb[19].mxu0  ;;  %v2891_v7 = vcombine.low %v2855_v59, %v2856_v63  ;;  %v2622_v8 = vmax.f32 %v2621_v54, %v2181_v4  ;;  %v2183_v10 = vpop.f32.mrb[19].mxu1  ;;  %3249 = vmatmul.mubr.msk.f32.gmra.mrb[124].mxu1 %vm1446_vm1, %v1432_v56  ;;  %2054 = vmatprep.mubr.f32.mxu0 %v3562_v58 }
 0x236   : > { %v2585_v9 = vmax.f32 %v2584_v0, %v1734_v5  ;;  %v2892_v12 = vcombine.low %v2857_v62, %v2858_v2  ;;  %v2659_v13 = vmax.f32 %v2658_v61, %v2183_v10  ;;  %2503 = vmatprep.mubr.f32.mxu1 %v3562_v58  ;;  %v1438_v2 = vld [vmem:[%s4733_s1 + $0x1f0] sm:$0xff] }
 0x237   : > { %v2899_v16 = vrot.slane %v2891_v7, %v4543_v26  ;;  %v1738_v17 = vpop.f32.mrb[20].mxu0 }
 0x238   : > { %v2906_v18 = vrot.slane %v2892_v12, %v4543_v26  ;;  %v2549_v19 = vmax.f32 %v2548_v3, %v1738_v17  ;;  %v2187_v20 = vpop.f32.mrb[20].mxu1  ;;  %v1740_v21 = vpop.f32.mrb[21].mxu0  ;;  %3184 = vmatmul.mubr.msk.f32.gmra.mrb[126].mxu0 %vm1446_vm1, %v1433_v11 }
 0x239   : > { %v2623_v22 = vmax.f32 %v2622_v8, %v2187_v20  ;;  %v2586_v23 = vmax.f32 %v2585_v9, %v1740_v21  ;;  %v2189_v24 = vpop.f32.mrb[21].mxu1  ;;  %3250 = vmatmul.mubr.msk.f32.gmra.mrb[126].mxu1 %vm1446_vm1, %v1433_v11  ;;  %2060 = vmatprep.mubr.f32.mxu0 %v3562_v58  ;;  %v1439_v11 = vld [vmem:[%s4733_s1 + $0x1f8] sm:$0xff] }
 0x23a   : > { %v2907_v27 = vcombine.low %v2899_v16, %v2906_v18  ;;  %v2660_v28 = vmax.f32 %v2659_v13, %v2189_v24  ;;  %2509 = vmatprep.mubr.f32.mxu1 %v3562_v58 }
 0x23b   : > { %v1744_v29 = vpop.f32.mrb[22].mxu0 }
 0x23c   : > { %v2914_v30 = vrot.slane %v2907_v27, %v4543_v26  ;;  %v2550_v31 = vmax.f32 %v2549_v19, %v1744_v29  ;;  %v2193_v32 = vpop.f32.mrb[22].mxu1  ;;  %v1746_v33 = vpop.f32.mrb[23].mxu0  ;;  %3185 = vmatmul.mubr.msk.f32.gmra.mrb[128].mxu0 %vm1446_vm1, %v1434_v25 }
 0x23d   : > { %v2624_v34 = vmax.f32 %v2623_v22, %v2193_v32  ;;  %v2587_v35 = vmax.f32 %v2586_v23, %v1746_v33  ;;  %v2195_v36 = vpop.f32.mrb[23].mxu1  ;;  %3251 = vmatmul.mubr.msk.f32.gmra.mrb[128].mxu1 %vm1446_vm1, %v1434_v25  ;;  %2066 = vmatprep.mubr.f32.mxu0 %v3562_v58 }
 0x23e   : > { %3257 = vst.msk [vmem:[%s4590_s6 + $0x8] ss:$2 sm:$0xf] %vm4576_vm2, %v2914_v30  ;;  %v2661_v38 = vmax.f32 %v2660_v28, %v2195_v36  ;;  %2515 = vmatprep.mubr.f32.mxu1 %v3562_v58 }
 0x23f   : > { %v1750_v39 = vpop.f32.mrb[24].mxu0 }
 0x240   : > { %v2551_v40 = vmax.f32 %v2550_v31, %v1750_v39  ;;  %v2199_v42 = vpop.f32.mrb[24].mxu1  ;;  %v1752_v43 = vpop.f32.mrb[25].mxu0  ;;  %3186 = vmatmul.mubr.msk.f32.gmra.mrb[130].mxu0 %vm1446_vm1, %v1435_v37 }
 0x241   : > { %v2625_v44 = vmax.f32 %v2624_v34, %v2199_v42  ;;  %v2588_v45 = vmax.f32 %v2587_v35, %v1752_v43  ;;  %v2201_v46 = vpop.f32.mrb[25].mxu1  ;;  %3252 = vmatmul.mubr.msk.f32.gmra.mrb[130].mxu1 %vm1446_vm1, %v1435_v37  ;;  %2072 = vmatprep.mubr.f32.mxu0 %v3562_v58 }
 0x242   : > { %v2662_v48 = vmax.f32 %v2661_v38, %v2201_v46  ;;  %2521 = vmatprep.mubr.f32.mxu1 %v3562_v58 }
 0x243   : > { %v1756_v49 = vpop.f32.mrb[26].mxu0 }
 0x244   : > { %v2552_v50 = vmax.f32 %v2551_v40, %v1756_v49  ;;  %v2205_v51 = vpop.f32.mrb[26].mxu1  ;;  %v1758_v52 = vpop.f32.mrb[27].mxu0  ;;  %3187 = vmatmul.mubr.msk.f32.gmra.mrb[132].mxu0 %vm1446_vm1, %v1436_v47 }
 0x245   : > { %v2626_v53 = vmax.f32 %v2625_v44, %v2205_v51  ;;  %v2589_v54 = vmax.f32 %v2588_v45, %v1758_v52  ;;  %v2207_v0 = vpop.f32.mrb[27].mxu1  ;;  %3253 = vmatmul.mubr.msk.f32.gmra.mrb[132].mxu1 %vm1446_vm1, %v1436_v47  ;;  %2078 = vmatprep.mubr.f32.mxu0 %v3562_v58 }
 0x246   : > { %v2663_v56 = vmax.f32 %v2662_v48, %v2207_v0  ;;  %2527 = vmatprep.mubr.f32.mxu1 %v3562_v58 }
 0x247   : > { %v1762_v57 = vpop.f32.mrb[28].mxu0 }
 0x248   : > { %v2553_v59 = vmax.f32 %v2552_v50, %v1762_v57  ;;  %v2211_v60 = vpop.f32.mrb[28].mxu1  ;;  %v1764_v61 = vpop.f32.mrb[29].mxu0  ;;  %3188 = vmatmul.mubr.msk.f32.gmra.mrb[134].mxu0 %vm1446_vm1, %v1437_v55 }
 0x249   : > { %v2627_v62 = vmax.f32 %v2626_v53, %v2211_v60  ;;  %v2590_v63 = vmax.f32 %v2589_v54, %v1764_v61  ;;  %v2213_v1 = vpop.f32.mrb[29].mxu1  ;;  %3254 = vmatmul.mubr.msk.f32.gmra.mrb[134].mxu1 %vm1446_vm1, %v1437_v55  ;;  %2084 = vmatprep.mubr.f32.mxu0 %v3562_v58 }
 0x24a   : > { %v2664_v3 = vmax.f32 %v2663_v56, %v2213_v1  ;;  %2533 = vmatprep.mubr.f32.mxu1 %v3562_v58 }
 0x24b   : > { %v1768_v4 = vpop.f32.mrb[30].mxu0 }
 0x24c   : > { %v2554_v5 = vmax.f32 %v2553_v59, %v1768_v4  ;;  %v2217_v6 = vpop.f32.mrb[30].mxu1  ;;  %v1770_v7 = vpop.f32.mrb[31].mxu0  ;;  %3189 = vmatmul.mubr.msk.f32.gmra.mrb[136].mxu0 %vm1446_vm1, %v1438_v2 }
 0x24d   : > { %v2628_v8 = vmax.f32 %v2627_v62, %v2217_v6  ;;  %v2591_v9 = vmax.f32 %v2590_v63, %v1770_v7  ;;  %v2219_v10 = vpop.f32.mrb[31].mxu1  ;;  %3255 = vmatmul.mubr.msk.f32.gmra.mrb[136].mxu1 %vm1446_vm1, %v1438_v2  ;;  %2090 = vmatprep.mubr.f32.mxu0 %v3562_v58 }
 0x24e   : > { %v2665_v12 = vmax.f32 %v2664_v3, %v2219_v10  ;;  %2539 = vmatprep.mubr.f32.mxu1 %v3562_v58 }
 0x24f   : > { %v1774_v13 = vpop.f32.mrb[32].mxu0 }
 0x250   : > { %v2555_v14 = vmax.f32 %v2554_v5, %v1774_v13  ;;  %v2223_v15 = vpop.f32.mrb[32].mxu1  ;;  %v1776_v16 = vpop.f32.mrb[33].mxu0  ;;  %3190 = vmatmul.mubr.msk.f32.gmra.mrb[138].mxu0 %vm1446_vm1, %v1439_v11 }
 0x251   : > { %v2629_v17 = vmax.f32 %v2628_v8, %v2223_v15  ;;  %v2592_v18 = vmax.f32 %v2591_v9, %v1776_v16  ;;  %v2225_v19 = vpop.f32.mrb[33].mxu1  ;;  %3256 = vmatmul.mubr.msk.f32.gmra.mrb[138].mxu1 %vm1446_vm1, %v1439_v11 }
 0x252   : > { %v2666_v20 = vmax.f32 %v2665_v12, %v2225_v19 }
 0x253   : > { %v1780_v21 = vpop.f32.mrb[34].mxu0 }
 0x254   : > { %v2556_v22 = vmax.f32 %v2555_v14, %v1780_v21  ;;  %v2229_v23 = vpop.f32.mrb[34].mxu1  ;;  %v1782_v24 = vpop.f32.mrb[35].mxu0 }
 0x255   : > { %v2630_v25 = vmax.f32 %v2629_v17, %v2229_v23  ;;  %v2593_v27 = vmax.f32 %v2592_v18, %v1782_v24  ;;  %v2231_v28 = vpop.f32.mrb[35].mxu1 }
 0x256   : > { %v2667_v58 = vmax.f32 %v2666_v20, %v2231_v28 }
 0x257   : > { %v1786_v29 = vpop.f32.mrb[36].mxu0 }
 0x258   : > { %v2557_v30 = vmax.f32 %v2556_v22, %v1786_v29  ;;  %v2235_v31 = vpop.f32.mrb[36].mxu1  ;;  %v1788_v32 = vpop.f32.mrb[37].mxu0 }
 0x259   : > { %v2631_v33 = vmax.f32 %v2630_v25, %v2235_v31  ;;  %v2594_v34 = vmax.f32 %v2593_v27, %v1788_v32  ;;  %v2237_v35 = vpop.f32.mrb[37].mxu1 }
 0x25a   : > { %v2668_v36 = vmax.f32 %v2667_v58, %v2237_v35 }
 0x25b   : > { %v1792_v37 = vpop.f32.mrb[38].mxu0 }
 0x25c   : > { %v2558_v38 = vmax.f32 %v2557_v30, %v1792_v37  ;;  %v2241_v39 = vpop.f32.mrb[38].mxu1  ;;  %v1794_v40 = vpop.f32.mrb[39].mxu0 }
 0x25d   : > { %v2632_v42 = vmax.f32 %v2631_v33, %v2241_v39  ;;  %v2595_v43 = vmax.f32 %v2594_v34, %v1794_v40  ;;  %v2243_v44 = vpop.f32.mrb[39].mxu1 }
 0x25e   : > { %v2669_v45 = vmax.f32 %v2668_v36, %v2243_v44 }
 0x25f   : > { %v1798_v46 = vpop.f32.mrb[40].mxu0 }
 0x260   : > { %v2559_v47 = vmax.f32 %v2558_v38, %v1798_v46  ;;  %v2247_v48 = vpop.f32.mrb[40].mxu1  ;;  %v1800_v49 = vpop.f32.mrb[41].mxu0 }
 0x261   : > { %v2633_v50 = vmax.f32 %v2632_v42, %v2247_v48  ;;  %v2596_v51 = vmax.f32 %v2595_v43, %v1800_v49  ;;  %v2249_v52 = vpop.f32.mrb[41].mxu1 }
 0x262   : > { %v2670_v53 = vmax.f32 %v2669_v45, %v2249_v52 }
 0x263   : > { %v1804_v54 = vpop.f32.mrb[42].mxu0 }
 0x264   : > { %v2560_v0 = vmax.f32 %v2559_v47, %v1804_v54  ;;  %v2253_v55 = vpop.f32.mrb[42].mxu1  ;;  %v1806_v56 = vpop.f32.mrb[43].mxu0 }
 0x265   : > { %v2634_v57 = vmax.f32 %v2633_v50, %v2253_v55  ;;  %v2597_v59 = vmax.f32 %v2596_v51, %v1806_v56  ;;  %v2255_v60 = vpop.f32.mrb[43].mxu1 }
 0x266   : > { %v2671_v61 = vmax.f32 %v2670_v53, %v2255_v60 }
 0x267   : > { %v1810_v62 = vpop.f32.mrb[44].mxu0 }
 0x268   : > { %v2561_v63 = vmax.f32 %v2560_v0, %v1810_v62  ;;  %v2259_v1 = vpop.f32.mrb[44].mxu1  ;;  %v1812_v2 = vpop.f32.mrb[45].mxu0 }
 0x269   : > { %v2635_v3 = vmax.f32 %v2634_v57, %v2259_v1  ;;  %v2598_v4 = vmax.f32 %v2597_v59, %v1812_v2  ;;  %v2261_v5 = vpop.f32.mrb[45].mxu1 }
 0x26a   : > { %v2672_v6 = vmax.f32 %v2671_v61, %v2261_v5 }
 0x26b   : > { %v1816_v7 = vpop.f32.mrb[46].mxu0 }
 0x26c   : > { %v2562_v8 = vmax.f32 %v2561_v63, %v1816_v7  ;;  %v2265_v9 = vpop.f32.mrb[46].mxu1  ;;  %v1818_v10 = vpop.f32.mrb[47].mxu0 }
 0x26d   : > { %v2636_v11 = vmax.f32 %v2635_v3, %v2265_v9  ;;  %v2599_v12 = vmax.f32 %v2598_v4, %v1818_v10  ;;  %v2267_v13 = vpop.f32.mrb[47].mxu1 }
 0x26e   : > { %v2673_v14 = vmax.f32 %v2672_v6, %v2267_v13 }
 0x26f   : > { %v1822_v15 = vpop.f32.mrb[48].mxu0 }
 0x270   : > { %v2563_v16 = vmax.f32 %v2562_v8, %v1822_v15  ;;  %v2271_v17 = vpop.f32.mrb[48].mxu1  ;;  %v1824_v18 = vpop.f32.mrb[49].mxu0 }
 0x271   : > { %v2637_v19 = vmax.f32 %v2636_v11, %v2271_v17  ;;  %v2600_v20 = vmax.f32 %v2599_v12, %v1824_v18  ;;  %v2273_v21 = vpop.f32.mrb[49].mxu1 }
 0x272   : > { %v2674_v22 = vmax.f32 %v2673_v14, %v2273_v21 }
 0x273   : > { %v1828_v23 = vpop.f32.mrb[50].mxu0 }
 0x274   : > { %v2564_v24 = vmax.f32 %v2563_v16, %v1828_v23  ;;  %v2277_v25 = vpop.f32.mrb[50].mxu1  ;;  %v1830_v27 = vpop.f32.mrb[51].mxu0 }
 0x275   : > { %v2638_v28 = vmax.f32 %v2637_v19, %v2277_v25  ;;  %v2601_v58 = vmax.f32 %v2600_v20, %v1830_v27  ;;  %v2279_v29 = vpop.f32.mrb[51].mxu1 }
 0x276   : > { %v2675_v30 = vmax.f32 %v2674_v22, %v2279_v29 }
 0x277   : > { %v1834_v31 = vpop.f32.mrb[52].mxu0 }
 0x278   : > { %v2565_v32 = vmax.f32 %v2564_v24, %v1834_v31  ;;  %v2283_v33 = vpop.f32.mrb[52].mxu1  ;;  %v1836_v34 = vpop.f32.mrb[53].mxu0 }
 0x279   : > { %v2639_v35 = vmax.f32 %v2638_v28, %v2283_v33  ;;  %v2602_v36 = vmax.f32 %v2601_v58, %v1836_v34  ;;  %v2285_v37 = vpop.f32.mrb[53].mxu1 }
 0x27a   : > { %v2676_v38 = vmax.f32 %v2675_v30, %v2285_v37 }
 0x27b   : > { %v1840_v39 = vpop.f32.mrb[54].mxu0 }
 0x27c   : > { %v2566_v40 = vmax.f32 %v2565_v32, %v1840_v39  ;;  %v2289_v42 = vpop.f32.mrb[54].mxu1  ;;  %v1842_v43 = vpop.f32.mrb[55].mxu0 }
 0x27d   : > { %v2640_v44 = vmax.f32 %v2639_v35, %v2289_v42  ;;  %v2603_v45 = vmax.f32 %v2602_v36, %v1842_v43  ;;  %v2291_v46 = vpop.f32.mrb[55].mxu1 }
 0x27e   : > { %v2677_v47 = vmax.f32 %v2676_v38, %v2291_v46 }
 0x27f   : > { %v1846_v48 = vpop.f32.mrb[56].mxu0 }
 0x280   : > { %v2567_v49 = vmax.f32 %v2566_v40, %v1846_v48  ;;  %v2295_v50 = vpop.f32.mrb[56].mxu1  ;;  %v1848_v51 = vpop.f32.mrb[57].mxu0 }
 0x281   : > { %v2641_v52 = vmax.f32 %v2640_v44, %v2295_v50  ;;  %v2604_v53 = vmax.f32 %v2603_v45, %v1848_v51  ;;  %v2297_v54 = vpop.f32.mrb[57].mxu1 }
 0x282   : > { %v2678_v0 = vmax.f32 %v2677_v47, %v2297_v54 }
 0x283   : > { %v1852_v55 = vpop.f32.mrb[58].mxu0 }
 0x284   : > { %v2568_v56 = vmax.f32 %v2567_v49, %v1852_v55  ;;  %v2301_v57 = vpop.f32.mrb[58].mxu1  ;;  %v1854_v59 = vpop.f32.mrb[59].mxu0 }
 0x285   : > { %v2642_v60 = vmax.f32 %v2641_v52, %v2301_v57  ;;  %v2605_v61 = vmax.f32 %v2604_v53, %v1854_v59  ;;  %v2303_v62 = vpop.f32.mrb[59].mxu1 }
 0x286   : > { %v2679_v63 = vmax.f32 %v2678_v0, %v2303_v62 }
 0x287   : > { %v1858_v1 = vpop.f32.mrb[60].mxu0 }
 0x288   : > { %v2569_v2 = vmax.f32 %v2568_v56, %v1858_v1  ;;  %v2307_v3 = vpop.f32.mrb[60].mxu1  ;;  %v1860_v4 = vpop.f32.mrb[61].mxu0 }
 0x289   : > { %v2643_v5 = vmax.f32 %v2642_v60, %v2307_v3  ;;  %v2606_v6 = vmax.f32 %v2605_v61, %v1860_v4  ;;  %v2309_v7 = vpop.f32.mrb[61].mxu1 }
 0x28a   : > { %v2680_v8 = vmax.f32 %v2679_v63, %v2309_v7 }
 0x28b   : > { %v1864_v9 = vpop.f32.mrb[62].mxu0 }
 0x28c   : > { %v2570_v10 = vmax.f32 %v2569_v2, %v1864_v9  ;;  %v2313_v11 = vpop.f32.mrb[62].mxu1  ;;  %v1866_v12 = vpop.f32.mrb[63].mxu0 }
 0x28d   : > { %v2644_v13 = vmax.f32 %v2643_v5, %v2313_v11  ;;  %v2607_v14 = vmax.f32 %v2606_v6, %v1866_v12  ;;  %v2315_v15 = vpop.f32.mrb[63].mxu1 }
 0x28e   : > { %v2681_v16 = vmax.f32 %v2680_v8, %v2315_v15 }
 0x28f   : > { %v1870_v17 = vpop.f32.mrb[64].mxu0 }
 0x290   : > { %v2571_v18 = vmax.f32 %v2570_v10, %v1870_v17  ;;  %v2319_v19 = vpop.f32.mrb[64].mxu1  ;;  %v1872_v20 = vpop.f32.mrb[65].mxu0 }
 0x291   : > { %v2645_v21 = vmax.f32 %v2644_v13, %v2319_v19  ;;  %v2608_v22 = vmax.f32 %v2607_v14, %v1872_v20  ;;  %v2321_v23 = vpop.f32.mrb[65].mxu1 }
 0x292   : > { %v2682_v24 = vmax.f32 %v2681_v16, %v2321_v23 }
 0x293   : > { %v1876_v25 = vpop.f32.mrb[66].mxu0 }
 0x294   : > { %v2572_v27 = vmax.f32 %v2571_v18, %v1876_v25  ;;  %v2325_v28 = vpop.f32.mrb[66].mxu1  ;;  %v1878_v58 = vpop.f32.mrb[67].mxu0 }
 0x295   : > { %v2646_v29 = vmax.f32 %v2645_v21, %v2325_v28  ;;  %v2609_v30 = vmax.f32 %v2608_v22, %v1878_v58  ;;  %v2327_v31 = vpop.f32.mrb[67].mxu1 }
 0x296   : > { %v2683_v32 = vmax.f32 %v2682_v24, %v2327_v31 }
 0x297   : > { %v1882_v33 = vpop.f32.mrb[68].mxu0 }
 0x298   : > { %v2573_v34 = vmax.f32 %v2572_v27, %v1882_v33  ;;  %v2331_v35 = vpop.f32.mrb[68].mxu1  ;;  %v1884_v36 = vpop.f32.mrb[69].mxu0 }
 0x299   : > { %v2647_v37 = vmax.f32 %v2646_v29, %v2331_v35  ;;  %v2610_v38 = vmax.f32 %v2609_v30, %v1884_v36  ;;  %v2333_v39 = vpop.f32.mrb[69].mxu1 }
 0x29a   : > { %v2684_v40 = vmax.f32 %v2683_v32, %v2333_v39 }
 0x29b   : > { %v1888_v42 = vpop.f32.mrb[70].mxu0 }
 0x29c   : > { %v2574_v43 = vmax.f32 %v2573_v34, %v1888_v42  ;;  %v2337_v44 = vpop.f32.mrb[70].mxu1  ;;  %v1890_v45 = vpop.f32.mrb[71].mxu0 }
 0x29d   : > { %v2648_v46 = vmax.f32 %v2647_v37, %v2337_v44  ;;  %v2611_v47 = vmax.f32 %v2610_v38, %v1890_v45  ;;  %v2339_v48 = vpop.f32.mrb[71].mxu1 }
 0x29e   : > { %v2685_v49 = vmax.f32 %v2684_v40, %v2339_v48 }
 0x29f   : > { %v1894_v50 = vpop.f32.mrb[72].mxu0 }
 0x2a0   : > { %v2575_v51 = vmax.f32 %v2574_v43, %v1894_v50  ;;  %v2343_v52 = vpop.f32.mrb[72].mxu1  ;;  %v1896_v53 = vpop.f32.mrb[73].mxu0 }
 0x2a1   : > { %v2649_v54 = vmax.f32 %v2648_v46, %v2343_v52  ;;  %v2612_v0 = vmax.f32 %v2611_v47, %v1896_v53  ;;  %v2345_v55 = vpop.f32.mrb[73].mxu1 }
 0x2a2   : > { %v2686_v56 = vmax.f32 %v2685_v49, %v2345_v55 }
 0x2a3   : > { %v1900_v57 = vpop.f32.mrb[74].mxu0 }
 0x2a4   : > { %v4655_v59 = vmax.f32 %v2575_v51, %v1900_v57  ;;  %v2349_v60 = vpop.f32.mrb[74].mxu1  ;;  %v1902_v61 = vpop.f32.mrb[75].mxu0 }
 0x2a5   : > { %v4657_v62 = vmax.f32 %v2649_v54, %v2349_v60  ;;  %v4659_v63 = vmax.f32 %v2612_v0, %v1902_v61  ;;  %v2351_v1 = vpop.f32.mrb[75].mxu1 }
 0x2a6   : > { %v4661_v2 = vmax.f32 %v2686_v56, %v2351_v1 }
 0x2a7   : > { %v1906_v3 = vpop.f32.mrb[76].mxu0 }
 0x2a8   : > { %v2355_v4 = vpop.f32.mrb[76].mxu1  ;;  %v1908_v5 = vpop.f32.mrb[77].mxu0 }
 0x2a9   : > { %v2357_v6 = vpop.f32.mrb[77].mxu1 }
 0x2ab   : > { %v1912_v7 = vpop.f32.mrb[78].mxu0 }
 0x2ac   : > { %v2694_v8 = vmax.f32 %v1906_v3, %v1912_v7  ;;  %v2361_v9 = vpop.f32.mrb[78].mxu1  ;;  %v1914_v10 = vpop.f32.mrb[79].mxu0 }
 0x2ad   : > { %v2768_v11 = vmax.f32 %v2355_v4, %v2361_v9  ;;  %v2731_v12 = vmax.f32 %v1908_v5, %v1914_v10  ;;  %v2363_v13 = vpop.f32.mrb[79].mxu1 }
 0x2ae   : > { %v2805_v14 = vmax.f32 %v2357_v6, %v2363_v13 }
 0x2af   : > { %v1918_v15 = vpop.f32.mrb[80].mxu0 }
 0x2b0   : > { %v2695_v16 = vmax.f32 %v2694_v8, %v1918_v15  ;;  %v2367_v17 = vpop.f32.mrb[80].mxu1  ;;  %v1920_v18 = vpop.f32.mrb[81].mxu0 }
 0x2b1   : > { %v2769_v19 = vmax.f32 %v2768_v11, %v2367_v17  ;;  %v2732_v20 = vmax.f32 %v2731_v12, %v1920_v18  ;;  %v2369_v21 = vpop.f32.mrb[81].mxu1 }
 0x2b2   : > { %v2806_v22 = vmax.f32 %v2805_v14, %v2369_v21 }
 0x2b3   : > { %v1924_v23 = vpop.f32.mrb[82].mxu0 }
 0x2b4   : > { %v2696_v24 = vmax.f32 %v2695_v16, %v1924_v23  ;;  %v2373_v25 = vpop.f32.mrb[82].mxu1  ;;  %v1926_v27 = vpop.f32.mrb[83].mxu0 }
 0x2b5   : > { %v2770_v28 = vmax.f32 %v2769_v19, %v2373_v25  ;;  %v2733_v58 = vmax.f32 %v2732_v20, %v1926_v27  ;;  %v2375_v29 = vpop.f32.mrb[83].mxu1 }
 0x2b6   : > { %v2807_v30 = vmax.f32 %v2806_v22, %v2375_v29 }
 0x2b7   : > { %v1930_v31 = vpop.f32.mrb[84].mxu0 }
 0x2b8   : > { %v2697_v32 = vmax.f32 %v2696_v24, %v1930_v31  ;;  %v2379_v33 = vpop.f32.mrb[84].mxu1  ;;  %v1932_v34 = vpop.f32.mrb[85].mxu0 }
 0x2b9   : > { %v2771_v35 = vmax.f32 %v2770_v28, %v2379_v33  ;;  %v2734_v36 = vmax.f32 %v2733_v58, %v1932_v34  ;;  %v2381_v37 = vpop.f32.mrb[85].mxu1 }
 0x2ba   : > { %v2808_v38 = vmax.f32 %v2807_v30, %v2381_v37 }
 0x2bb   : > { %v1936_v39 = vpop.f32.mrb[86].mxu0 }
 0x2bc   : > { %v2698_v40 = vmax.f32 %v2697_v32, %v1936_v39  ;;  %v2385_v42 = vpop.f32.mrb[86].mxu1  ;;  %v1938_v43 = vpop.f32.mrb[87].mxu0 }
 0x2bd   : > { %v2772_v44 = vmax.f32 %v2771_v35, %v2385_v42  ;;  %v2735_v45 = vmax.f32 %v2734_v36, %v1938_v43  ;;  %v2387_v46 = vpop.f32.mrb[87].mxu1 }
 0x2be   : > { %v2809_v47 = vmax.f32 %v2808_v38, %v2387_v46 }
 0x2bf   : > { %v1942_v48 = vpop.f32.mrb[88].mxu0 }
 0x2c0   : > { %v2699_v49 = vmax.f32 %v2698_v40, %v1942_v48  ;;  %v2391_v50 = vpop.f32.mrb[88].mxu1  ;;  %v1944_v51 = vpop.f32.mrb[89].mxu0 }
 0x2c1   : > { %v2773_v52 = vmax.f32 %v2772_v44, %v2391_v50  ;;  %v2736_v53 = vmax.f32 %v2735_v45, %v1944_v51  ;;  %v2393_v54 = vpop.f32.mrb[89].mxu1 }
 0x2c2   : > { %v2810_v0 = vmax.f32 %v2809_v47, %v2393_v54 }
 0x2c3   : > { %v1948_v55 = vpop.f32.mrb[90].mxu0 }
 0x2c4   : > { %v2700_v56 = vmax.f32 %v2699_v49, %v1948_v55  ;;  %v2397_v57 = vpop.f32.mrb[90].mxu1  ;;  %v1950_v60 = vpop.f32.mrb[91].mxu0 }
 0x2c5   : > { %v2774_v61 = vmax.f32 %v2773_v52, %v2397_v57  ;;  %v2737_v1 = vmax.f32 %v2736_v53, %v1950_v60  ;;  %v2399_v3 = vpop.f32.mrb[91].mxu1 }
 0x2c6   : > { %v2811_v4 = vmax.f32 %v2810_v0, %v2399_v3 }
 0x2c7   : > { %v1954_v5 = vpop.f32.mrb[92].mxu0 }
 0x2c8   : > { %v2701_v6 = vmax.f32 %v2700_v56, %v1954_v5  ;;  %v2403_v7 = vpop.f32.mrb[92].mxu1  ;;  %v1956_v8 = vpop.f32.mrb[93].mxu0 }
 0x2c9   : > { %v2775_v9 = vmax.f32 %v2774_v61, %v2403_v7  ;;  %v2738_v10 = vmax.f32 %v2737_v1, %v1956_v8  ;;  %v2405_v11 = vpop.f32.mrb[93].mxu1 }
 0x2ca   : > { %v2812_v12 = vmax.f32 %v2811_v4, %v2405_v11 }
 0x2cb   : > { %v1960_v13 = vpop.f32.mrb[94].mxu0 }
 0x2cc   : > { %v2702_v14 = vmax.f32 %v2701_v6, %v1960_v13  ;;  %v2409_v15 = vpop.f32.mrb[94].mxu1  ;;  %v1962_v16 = vpop.f32.mrb[95].mxu0 }
 0x2cd   : > { %v2776_v17 = vmax.f32 %v2775_v9, %v2409_v15  ;;  %v2739_v18 = vmax.f32 %v2738_v10, %v1962_v16  ;;  %v2411_v19 = vpop.f32.mrb[95].mxu1 }
 0x2ce   : > { %v2813_v20 = vmax.f32 %v2812_v12, %v2411_v19 }
 0x2cf   : > { %v1966_v21 = vpop.f32.mrb[96].mxu0 }
 0x2d0   : > { %v2703_v22 = vmax.f32 %v2702_v14, %v1966_v21  ;;  %v2415_v23 = vpop.f32.mrb[96].mxu1  ;;  %v1968_v24 = vpop.f32.mrb[97].mxu0 }
 0x2d1   : > { %v2777_v25 = vmax.f32 %v2776_v17, %v2415_v23  ;;  %v2740_v27 = vmax.f32 %v2739_v18, %v1968_v24  ;;  %v2417_v28 = vpop.f32.mrb[97].mxu1 }
 0x2d2   : > { %v2814_v58 = vmax.f32 %v2813_v20, %v2417_v28 }
 0x2d3   : > { %v1972_v29 = vpop.f32.mrb[98].mxu0 }
 0x2d4   : > { %v2704_v30 = vmax.f32 %v2703_v22, %v1972_v29  ;;  %v2421_v31 = vpop.f32.mrb[98].mxu1  ;;  %v1974_v32 = vpop.f32.mrb[99].mxu0 }
 0x2d5   : > { %v2778_v33 = vmax.f32 %v2777_v25, %v2421_v31  ;;  %v2741_v34 = vmax.f32 %v2740_v27, %v1974_v32  ;;  %v2423_v35 = vpop.f32.mrb[99].mxu1 }
 0x2d6   : > { %v2815_v36 = vmax.f32 %v2814_v58, %v2423_v35 }
 0x2d7   : > { %v1978_v37 = vpop.f32.mrb[100].mxu0 }
 0x2d8   : > { %v2705_v38 = vmax.f32 %v2704_v30, %v1978_v37  ;;  %v2427_v39 = vpop.f32.mrb[100].mxu1  ;;  %v1980_v40 = vpop.f32.mrb[101].mxu0 }
 0x2d9   : > { %v2779_v42 = vmax.f32 %v2778_v33, %v2427_v39  ;;  %v2742_v43 = vmax.f32 %v2741_v34, %v1980_v40  ;;  %v2429_v44 = vpop.f32.mrb[101].mxu1 }
 0x2da   : > { %v2816_v45 = vmax.f32 %v2815_v36, %v2429_v44 }
 0x2db   : > { %v1984_v46 = vpop.f32.mrb[102].mxu0 }
 0x2dc   : > { %v2706_v47 = vmax.f32 %v2705_v38, %v1984_v46  ;;  %v2433_v48 = vpop.f32.mrb[102].mxu1  ;;  %v1986_v49 = vpop.f32.mrb[103].mxu0 }
 0x2dd   : > { %v2780_v50 = vmax.f32 %v2779_v42, %v2433_v48  ;;  %v2743_v51 = vmax.f32 %v2742_v43, %v1986_v49  ;;  %v2435_v52 = vpop.f32.mrb[103].mxu1 }
 0x2de   : > { %v2817_v53 = vmax.f32 %v2816_v45, %v2435_v52 }
 0x2df   : > { %v1990_v54 = vpop.f32.mrb[104].mxu0 }
 0x2e0   : > { %v2707_v0 = vmax.f32 %v2706_v47, %v1990_v54  ;;  %v2439_v55 = vpop.f32.mrb[104].mxu1  ;;  %v1992_v56 = vpop.f32.mrb[105].mxu0 }
 0x2e1   : > { %v2781_v57 = vmax.f32 %v2780_v50, %v2439_v55  ;;  %v2744_v60 = vmax.f32 %v2743_v51, %v1992_v56  ;;  %v2441_v61 = vpop.f32.mrb[105].mxu1 }
 0x2e2   : > { %v2818_v1 = vmax.f32 %v2817_v53, %v2441_v61 }
 0x2e3   : > { %v1996_v3 = vpop.f32.mrb[106].mxu0 }
 0x2e4   : > { %v2708_v4 = vmax.f32 %v2707_v0, %v1996_v3  ;;  %v2445_v5 = vpop.f32.mrb[106].mxu1  ;;  %v1998_v6 = vpop.f32.mrb[107].mxu0 }
 0x2e5   : > { %v2782_v7 = vmax.f32 %v2781_v57, %v2445_v5  ;;  %v2745_v8 = vmax.f32 %v2744_v60, %v1998_v6  ;;  %v2447_v9 = vpop.f32.mrb[107].mxu1 }
 0x2e6   : > { %v2819_v10 = vmax.f32 %v2818_v1, %v2447_v9 }
 0x2e7   : > { %v2002_v11 = vpop.f32.mrb[108].mxu0 }
 0x2e8   : > { %v2709_v12 = vmax.f32 %v2708_v4, %v2002_v11  ;;  %v2451_v13 = vpop.f32.mrb[108].mxu1  ;;  %v2004_v14 = vpop.f32.mrb[109].mxu0 }
 0x2e9   : > { %v2783_v15 = vmax.f32 %v2782_v7, %v2451_v13  ;;  %v2746_v16 = vmax.f32 %v2745_v8, %v2004_v14  ;;  %v2453_v17 = vpop.f32.mrb[109].mxu1 }
 0x2ea   : > { %v2820_v18 = vmax.f32 %v2819_v10, %v2453_v17 }
 0x2eb   : > { %v2008_v19 = vpop.f32.mrb[110].mxu0 }
 0x2ec   : > { %v2710_v20 = vmax.f32 %v2709_v12, %v2008_v19  ;;  %v2457_v21 = vpop.f32.mrb[110].mxu1  ;;  %v2010_v22 = vpop.f32.mrb[111].mxu0 }
 0x2ed   : > { %v2784_v23 = vmax.f32 %v2783_v15, %v2457_v21  ;;  %v2747_v24 = vmax.f32 %v2746_v16, %v2010_v22  ;;  %v2459_v25 = vpop.f32.mrb[111].mxu1 }
 0x2ee   : > { %v2821_v27 = vmax.f32 %v2820_v18, %v2459_v25 }
 0x2ef   : > { %v2014_v28 = vpop.f32.mrb[112].mxu0 }
 0x2f0   : > { %v2711_v58 = vmax.f32 %v2710_v20, %v2014_v28  ;;  %v2463_v29 = vpop.f32.mrb[112].mxu1  ;;  %v2016_v30 = vpop.f32.mrb[113].mxu0 }
 0x2f1   : > { %v2785_v31 = vmax.f32 %v2784_v23, %v2463_v29  ;;  %v2748_v32 = vmax.f32 %v2747_v24, %v2016_v30  ;;  %v2465_v33 = vpop.f32.mrb[113].mxu1 }
 0x2f2   : > { %v2822_v34 = vmax.f32 %v2821_v27, %v2465_v33 }
 0x2f3   : > { %v2020_v35 = vpop.f32.mrb[114].mxu0 }
 0x2f4   : > { %v2712_v36 = vmax.f32 %v2711_v58, %v2020_v35  ;;  %v2469_v37 = vpop.f32.mrb[114].mxu1  ;;  %v2022_v38 = vpop.f32.mrb[115].mxu0 }
 0x2f5   : > { %v2786_v39 = vmax.f32 %v2785_v31, %v2469_v37  ;;  %v2749_v40 = vmax.f32 %v2748_v32, %v2022_v38  ;;  %v2471_v42 = vpop.f32.mrb[115].mxu1 }
 0x2f6   : > { %v2823_v43 = vmax.f32 %v2822_v34, %v2471_v42 }
 0x2f7   : > { %v2026_v44 = vpop.f32.mrb[116].mxu0 }
 0x2f8   : > { %v2713_v45 = vmax.f32 %v2712_v36, %v2026_v44  ;;  %v2475_v46 = vpop.f32.mrb[116].mxu1  ;;  %v2028_v47 = vpop.f32.mrb[117].mxu0 }
 0x2f9   : > { %v2787_v48 = vmax.f32 %v2786_v39, %v2475_v46  ;;  %v2750_v49 = vmax.f32 %v2749_v40, %v2028_v47  ;;  %v2477_v50 = vpop.f32.mrb[117].mxu1 }
 0x2fa   : > { %v2824_v51 = vmax.f32 %v2823_v43, %v2477_v50 }
 0x2fb   : > { %v2032_v52 = vpop.f32.mrb[118].mxu0 }
 0x2fc   : > { %v2714_v53 = vmax.f32 %v2713_v45, %v2032_v52  ;;  %v2481_v54 = vpop.f32.mrb[118].mxu1  ;;  %v2034_v0 = vpop.f32.mrb[119].mxu0 }
 0x2fd   : > { %v2788_v55 = vmax.f32 %v2787_v48, %v2481_v54  ;;  %v2751_v56 = vmax.f32 %v2750_v49, %v2034_v0  ;;  %v2483_v57 = vpop.f32.mrb[119].mxu1 }
 0x2fe   : > { %v2825_v60 = vmax.f32 %v2824_v51, %v2483_v57 }
 0x2ff   : > { %v2038_v61 = vpop.f32.mrb[120].mxu0 }
 0x300   : > { %v2715_v1 = vmax.f32 %v2714_v53, %v2038_v61  ;;  %v2487_v3 = vpop.f32.mrb[120].mxu1  ;;  %v2040_v4 = vpop.f32.mrb[121].mxu0  ;;  %v2614_v61 = vrot.slane %v4659_v63, 4 }
 0x301   : > { %v2789_v5 = vmax.f32 %v2788_v55, %v2487_v3  ;;  %v2752_v6 = vmax.f32 %v2751_v56, %v2040_v4  ;;  %v2489_v7 = vpop.f32.mrb[121].mxu1  ;;  %v2577_v56 = vrot.slane %v4655_v59, 4  ;;  %v2688_v3 = vrot.slane %v4661_v2, 4 }
 0x302   : > { %v2826_v8 = vmax.f32 %v2825_v60, %v2489_v7  ;;  %v2651_v60 = vrot.slane %v4657_v62, 4 }
 0x303   : > { %v2044_v9 = vpop.f32.mrb[122].mxu0 }
 0x304   : > { %v2716_v10 = vmax.f32 %v2715_v1, %v2044_v9  ;;  %v2493_v11 = vpop.f32.mrb[122].mxu1  ;;  %v2046_v12 = vpop.f32.mrb[123].mxu0 }
 0x305   : > { %v2790_v13 = vmax.f32 %v2789_v5, %v2493_v11  ;;  %v2753_v14 = vmax.f32 %v2752_v6, %v2046_v12  ;;  %v2495_v15 = vpop.f32.mrb[123].mxu1  ;;  %v2652_v12 = vmax.f32 %v4657_v62, %v2651_v60 }
 0x306   : > { %v2827_v16 = vmax.f32 %v2826_v8, %v2495_v15  ;;  %v2689_v15 = vmax.f32 %v4661_v2, %v2688_v3 }
 0x307   : > { %v2050_v17 = vpop.f32.mrb[124].mxu0 }
 0x308   : > { %v2717_v18 = vmax.f32 %v2716_v10, %v2050_v17  ;;  %v2499_v19 = vpop.f32.mrb[124].mxu1  ;;  %v2052_v20 = vpop.f32.mrb[125].mxu0  ;;  %v2578_v10 = vmax.f32 %v4655_v59, %v2577_v56  ;;  %v2690_v59 = vrot.slane %v2689_v15, 2 }
 0x309   : > { %v2791_v21 = vmax.f32 %v2790_v13, %v2499_v19  ;;  %v2754_v22 = vmax.f32 %v2753_v14, %v2052_v20  ;;  %v2501_v23 = vpop.f32.mrb[125].mxu1  ;;  %v2615_v13 = vmax.f32 %v4659_v63, %v2614_v61 }
 0x30a   : > { %v2828_v24 = vmax.f32 %v2827_v16, %v2501_v23 }
 0x30b   : > { %v2056_v25 = vpop.f32.mrb[126].mxu0 }
 0x30c   : > { %v2718_v27 = vmax.f32 %v2717_v18, %v2056_v25  ;;  %v2505_v28 = vpop.f32.mrb[126].mxu1  ;;  %v2058_v58 = vpop.f32.mrb[127].mxu0  ;;  %v2616_v25 = vrot.slane %v2615_v13, 2 }
 0x30d   : > { %v2792_v29 = vmax.f32 %v2791_v21, %v2505_v28  ;;  %v2755_v30 = vmax.f32 %v2754_v22, %v2058_v58  ;;  %v2507_v31 = vpop.f32.mrb[127].mxu1  ;;  %v2579_v22 = vrot.slane %v2578_v10, 2 }
 0x30e   : > { %v2829_v32 = vmax.f32 %v2828_v24, %v2507_v31  ;;  %v2653_v24 = vrot.slane %v2652_v12, 2 }
 0x30f   : > { %v2062_v33 = vpop.f32.mrb[128].mxu0  ;;  %v2580_v31 = vmax.f32 %v2578_v10, %v2579_v22 }
 0x310   : > { %v2719_v34 = vmax.f32 %v2718_v27, %v2062_v33  ;;  %v2511_v35 = vpop.f32.mrb[128].mxu1  ;;  %v2064_v36 = vpop.f32.mrb[129].mxu0  ;;  %v2654_v33 = vmax.f32 %v2652_v12, %v2653_v24 }
 0x311   : > { %v2793_v37 = vmax.f32 %v2792_v29, %v2511_v35  ;;  %v2756_v38 = vmax.f32 %v2755_v30, %v2064_v36  ;;  %v2513_v39 = vpop.f32.mrb[129].mxu1 }
 0x312   : > { %v2830_v40 = vmax.f32 %v2829_v32, %v2513_v39 }
 0x313   : > { %v2068_v42 = vpop.f32.mrb[130].mxu0 }
 0x314   : > { %v2720_v43 = vmax.f32 %v2719_v34, %v2068_v42  ;;  %v2517_v44 = vpop.f32.mrb[130].mxu1  ;;  %v2070_v45 = vpop.f32.mrb[131].mxu0  ;;  %v2617_v34 = vmax.f32 %v2615_v13, %v2616_v25 }
 0x315   : > { %v2794_v46 = vmax.f32 %v2793_v37, %v2517_v44  ;;  %v2757_v47 = vmax.f32 %v2756_v38, %v2070_v45  ;;  %v2519_v48 = vpop.f32.mrb[131].mxu1  ;;  %v2691_v37 = vmax.f32 %v2689_v15, %v2690_v59 }
 0x316   : > { %v2831_v49 = vmax.f32 %v2830_v40, %v2519_v48 }
 0x317   : > { %v2074_v50 = vpop.f32.mrb[132].mxu0 }
 0x318   : > { %v2721_v51 = vmax.f32 %v2720_v43, %v2074_v50  ;;  %v2523_v52 = vpop.f32.mrb[132].mxu1  ;;  %v2076_v53 = vpop.f32.mrb[133].mxu0  ;;  %v2581_v43 = vrot.slane %v2580_v31, 1  ;;  %v2692_v50 = vrot.slane %v2691_v37, 1 }
 0x319   : > { %v2795_v54 = vmax.f32 %v2794_v46, %v2523_v52  ;;  %v2758_v0 = vmax.f32 %v2757_v47, %v2076_v53  ;;  %v2525_v55 = vpop.f32.mrb[133].mxu1  ;;  %v2655_v46 = vrot.slane %v2654_v33, 1  ;;  %v2618_v47 = vrot.slane %v2617_v34, 1 }
 0x31a   : > { %v2832_v57 = vmax.f32 %v2831_v49, %v2525_v55  ;;  %v2693_v3 = vmax.f32 %v2691_v37, %v2692_v50 }
 0x31b   : > { %v2080_v1 = vpop.f32.mrb[134].mxu0  ;;  %v2619_v60 = vmax.f32 %v2617_v34, %v2618_v47 }
 0x31c   : > { %v2722_v4 = vmax.f32 %v2721_v51, %v2080_v1  ;;  %v2529_v5 = vpop.f32.mrb[134].mxu1  ;;  %v2082_v6 = vpop.f32.mrb[135].mxu0 }
 0x31d   : > { %v2796_v7 = vmax.f32 %v2795_v54, %v2529_v5  ;;  %v2759_v8 = vmax.f32 %v2758_v0, %v2082_v6  ;;  %v2531_v9 = vpop.f32.mrb[135].mxu1  ;;  %v2582_v0 = vmax.f32 %v2580_v31, %v2581_v43  ;;  %v2843_v13 = vmax.f32 %v2619_v60, 0.0 }
 0x31e   : > { %v2833_v11 = vmax.f32 %v2832_v57, %v2531_v9  ;;  %v2656_v57 = vmax.f32 %v2654_v33, %v2655_v46 }
 0x31f   : > { %v2086_v14 = vpop.f32.mrb[136].mxu0 }
 0x320   : > { %v2723_v16 = vmax.f32 %v2722_v4, %v2086_v14  ;;  %v2535_v17 = vpop.f32.mrb[136].mxu1  ;;  %v2088_v18 = vpop.f32.mrb[137].mxu0  ;;  %v2844_v12 = vmax.f32 %v2656_v57, 0.0 }
 0x321   : > { %v2797_v19 = vmax.f32 %v2796_v7, %v2535_v17  ;;  %v2760_v20 = vmax.f32 %v2759_v8, %v2088_v18  ;;  %v2537_v21 = vpop.f32.mrb[137].mxu1  ;;  %v2842_v8 = vmax.f32 %v2582_v0, 0.0 }
 0x322   : > { %v2834_v23 = vmax.f32 %v2833_v11, %v2537_v21  ;;  %v2928_v11 = vpop.permute.xlu0 %2927 }
 0x323   : > { %v2092_v27 = vpop.f32.mrb[138].mxu0 }
 0x324   : > { %v2724_v28 = vmax.f32 %v2723_v16, %v2092_v27  ;;  %v2541_v58 = vpop.f32.mrb[138].mxu1  ;;  %v2094_v62 = vpop.f32.mrb[139].mxu0  ;;  %v2845_v16 = vmax.f32 %v2693_v3, 0.0 }
 0x325   : > { %v2798_v29 = vmax.f32 %v2797_v19, %v2541_v58  ;;  %v2761_v63 = vmax.f32 %v2760_v20, %v2094_v62  ;;  %v2543_v30 = vpop.f32.mrb[139].mxu1 }
 0x326   : > { %v2725_v2 = vrot.slane %v2724_v28, 4  ;;  %v2835_v32 = vmax.f32 %v2834_v23, %v2543_v30 }
 0x327   : > { %v2799_v35 = vrot.slane %v2798_v29, 4  ;;  %v2762_v36 = vrot.slane %v2761_v63, 4 }
 0x328   : > { %v2726_v38 = vmax.f32 %v2724_v28, %v2725_v2  ;;  %v2836_v39 = vrot.slane %v2835_v32, 4 }
 0x329   : > { %v2800_v40 = vmax.f32 %v2798_v29, %v2799_v35  ;;  %v2763_v42 = vmax.f32 %v2761_v63, %v2762_v36 }
 0x32a   : > { %v2727_v44 = vrot.slane %v2726_v38, 2  ;;  %v2837_v45 = vmax.f32 %v2835_v32, %v2836_v39 }
 0x32b   : > { %v2801_v48 = vrot.slane %v2800_v40, 2  ;;  %v2764_v49 = vrot.slane %v2763_v42, 2 }
 0x32c   : > { %v2728_v51 = vmax.f32 %v2726_v38, %v2727_v44  ;;  %v2838_v52 = vrot.slane %v2837_v45, 2 }
 0x32d   : > { %v2802_v53 = vmax.f32 %v2800_v40, %v2801_v48  ;;  %v2765_v54 = vmax.f32 %v2763_v42, %v2764_v49 }
 0x32e   : > { %v2729_v55 = vrot.slane %v2728_v51, 1  ;;  %v2839_v56 = vmax.f32 %v2837_v45, %v2838_v52 }
 0x32f   : > { %v2803_v61 = vrot.slane %v2802_v53, 1  ;;  %v2766_v1 = vrot.slane %v2765_v54, 1 }
 0x330   : > { %v2730_v4 = vmax.f32 %v2728_v51, %v2729_v55  ;;  %v2840_v5 = vrot.slane %v2839_v56, 1 }
 0x331   : > { %v2804_v6 = vmax.f32 %v2802_v53, %v2803_v61  ;;  %v2767_v7 = vmax.f32 %v2765_v54, %v2766_v1 }
 0x332   : > { %v2846_v9 = vmax.f32 %v2730_v4, 0.0  ;;  %v2841_v10 = vmax.f32 %v2839_v56, %v2840_v5 }
 0x333   : > { %v2848_v14 = vmax.f32 %v2804_v6, 0.0  ;;  %v2847_v15 = vmax.f32 %v2767_v7, 0.0 }
 0x334   : > { %v2849_v17 = vmax.f32 %v2841_v10, 0.0  ;;  %v2939_v18 = vsel %vm2938_vm3, %v2846_v9, %v2842_v8 }
 0x335   : > { %v2940_v19 = vsel %vm2938_vm3, %v2847_v15, %v2843_v13  ;;  %v2941_v20 = vsel %vm2938_vm3, %v2848_v14, %v2844_v12  ;;  %v2947_v21 = vmul.f32 %v2939_v18, %v2928_v11 }
 0x336   : > { %v2942_v22 = vsel %vm2938_vm3, %v2849_v17, %v2845_v16  ;;  %v2948_v23 = vmul.f32 %v2940_v19, %v2928_v11  ;;  %v2949_v24 = vmul.f32 %v2941_v20, %v2928_v11 }
 0x337   : > { %v2950_v25 = vmul.f32 %v2942_v22, %v2928_v11 }
 0x338   : > { %v2955_v27 = vcombine.low %v2947_v21, %v2948_v23 }
 0x339   : > { %v2956_v59 = vcombine.low %v2949_v24, %v2950_v25 }
 0x33a   : > { %v2963_v28 = vrot.slane %v2955_v27, %v4543_v26 }
 0x33b   : > { %v2970_v58 = vrot.slane %v2956_v59, %v4543_v26 }
 0x33d   : > { %v2971_v62 = vcombine.low %v2963_v28, %v2970_v58  ;;  %v2972_v29 = vcombine.high %v2963_v28, %v2970_v58 }
 0x33f   : > { %v2979_v63 = vrot.slane %v2971_v62, %v4543_v26  ;;  %v2986_v30 = vrot.slane %v2972_v29, %v4543_v26 }
 0x341   : > { %3258 = vst.msk [vmem:[%s4590_s6 + $0x1] ss:$2 sm:$0xf] %vm4576_vm2, %v2979_v63  ;;  %3259 = vst.msk [vmem:[%s4590_s6 + $0x9] ss:$2 sm:$0xf] %vm4576_vm2, %v2986_v30 }
 0x342   : > { %3495 = shalt.err (!%p3492_p7)
}
 0x343   : > { %s3496_s6 = scalar_lea.hbm %s4680_s17, 256  ;;  %s3500_s12 = scalar_lea.hbm %s4737_s5, 512 }
 0x344   : > { %p3497_p9 = scmp.ne.s32.totalorder %s4680_s17, %s3496_s6  ;;  %p3501_p3 = scmp.lt.u32.totalorder %s4680_s17, %s4737_s5 }
 0x345   : > { %p3502_p1 = scmp.lt.u32.totalorder %s3500_s12, %s3496_s6  ;;  %p3504_p2 = scmp.lt.u32.totalorder %s3496_s6, %s4680_s17 }
 0x346   : > { %p3498_p12 = pnand %p3497_p9, %p4763_p4 }
 0x347   : > { %p3503_p10 = por %p3502_p1, %p3501_p3 }
 0x348   : > { %p3499_p6 = pneg %p3498_p12 }
 0x349   : > { %p3505_p0 = por %p3504_p2, %p3503_p10 }
 0x34b   : > { %p3506_p11 = pnand %p3505_p0, %p3499_p6 }
 0x34d   : > { %3509 = shalt.err (!%p3506_p11)
}
 0x34e   : > { %s3566_s14 = smov 128   ;;  %s3567_s29 = smov 256  }
 0x34f   : > { %s3568_s26 = smov 8  }
 0x350   : > { %3326 = dma.vmem_to_hbm [thread:$0]  (%p4763_p4), %s4675_s27, 256, %s4680_s17, %s2994_s9, %s3566_s14, %s3567_s29, %s3568_s26  }
 0x351 PF: > { %s3022_s11 = sand.u32 1, %s3540_s18   ;;  %p4764_p13 = scmp.ne.s32.totalorder %s4751_s10, 0 }
 0x352   : > { %p4765_p8 = scmp.ge.s32.totalorder %s3552_s21, 2  ;;  %s3023_s28 = scalar_lea.sflag [#allocation4], %s3022_s11 }
 0x354   : > { %p3340_p5 = pnand %p4765_p8, %p4764_p13 }
 0x356   : > { %3535 = dma.done.wait (!%p3340_p5), %s3023_s28, 256  }
 0x357   : > { %3537 = vsyncadd (!%p3340_p5), %s3023_s28, 4294967040  ;;  %s4766_s16 = sld [smem:[#allocation12_spill]]  ;;  %p19_p7 = scmp.ge.s32.totalorder %s3620_s22, 4  }
 0x358   : > { %s4767_s18 = smov %s3544_s19  ;;  %s4768_s19 = smov %s3548_s20 }
 0x359   : > { %s4770_s21 = smov %s3620_s22  ;;  %21 = sbr.rel (!%p19_p7) target bundleno = 8 (0x8), region = 104 }
 0x35d   : > { %s4769_s20 = smov %s4766_s16 }
 0x360   :  { %3028 = vsyncpa [#allocation3], 1 }
 0x361   :  { %3030 = vsyncpa [#allocation3 + $0x1], 1 }
 0x362   :  { %3031 = vsyncpa [#allocation6], 1 }
 0x363   :  { %3033 = vsyncpa [#allocation6 + $0x1], 1 }
 0x364   :  { %3034 = vsyncpa [#allocation4], 1 }
 0x365   :  { %3036 = vsyncpa [#allocation4 + $0x1], 1 }

</bundles_post_ra>
